<compile_context>
chip_gen: v7x
topology: tpu7x:2x2x1
jax: 0.10.0
libtpu: 0.0.40
codegen_flags: <defaults>
</compile_context>

<pallas_src>
import functools

import jax
import jax.numpy as jnp
from jax.experimental import pallas as pl
from jax.experimental.pallas import tpu as pltpu


def facenet_head_kernel(x_ref, wb_ref, bn_ref, wc_ref, bc_ref, emb_ref, cls_ref):
    # x_ref: (TB, C, HW) backbone feature map (NCHW with spatial dims flattened).
    x = x_ref[...].astype(jnp.float32)

    # AdaptiveAvgPool2d((1,1)) + flatten == mean over the spatial (last) axis.
    pooled = jnp.mean(x, axis=2)                                    # (TB, C)

    # Dropout (eval mode) is the identity.

    # Bottleneck: Linear(C -> E), no bias.  MXU matmul.
    z = jnp.dot(pooled, wb_ref[...],
                preferred_element_type=jnp.float32)                 # (TB, E)

    # BatchNorm1d(E, eps=1e-3) in eval mode, pre-folded to scale/shift.
    bn = bn_ref[...]                                                # (2, E)
    scale = bn[0:1, :]                                              # (1, E)
    shift = bn[1:2, :]                                              # (1, E)
    before_normalize = z * scale + shift                            # (TB, E)

    # F.normalize(p=2, dim=1): x / max(||x||_2, eps), eps = 1e-12.
    sq = jnp.sum(before_normalize * before_normalize, axis=1, keepdims=True)
    norm = jnp.sqrt(sq)                                             # (TB, 1)
    emb_ref[...] = before_normalize / jnp.maximum(norm, 1e-12)

    # Classifier: Linear(E -> NC_pad) on the pre-normalize activations.
    # (weights / bias are zero-padded to a lane-dense width; sliced in wrapper)
    cls_ref[...] = (jnp.dot(before_normalize, wc_ref[...],
                            preferred_element_type=jnp.float32)
                    + bc_ref[...])


@functools.partial(jax.jit, static_argnames=("block_b",))
def facenet_head(x_nchw, wb, gamma, beta, run_mean, run_var, wc, bc, *,
                 block_b=8):
    """x_nchw: (B, C, H, W) backbone features.  Returns (embedding, cls)."""
    B, C, H, W = x_nchw.shape
    HW = H * W
    E = wb.shape[1]
    NC = wc.shape[1]
    NC_pad = 128 * max(1, -(-NC // 128))          # lane-dense classifier width

    # Free reshape (collapse contiguous last two dims) -- NO transpose, NO extra
    # HBM read/write of the feature map.
    x = x_nchw.reshape(B, C, HW)

    # Fold BatchNorm1d (eval, running stats, eps=1e-3) into scale/shift, packed
    # into a single (2, E) array to minimize tiny per-call DMAs.
    scale = gamma * jax.lax.rsqrt(run_var + 1e-3)
    shift = beta - run_mean * scale
    bn = jnp.concatenate([scale, shift], axis=0).astype(jnp.float32)   # (2, E)

    # Pad classifier weight/bias to a multiple of 128 lanes (zeros).
    wc_p = jnp.pad(wc.astype(jnp.float32), ((0, 0), (0, NC_pad - NC)))
    bc_p = jnp.pad(bc.astype(jnp.float32), ((0, 0), (0, NC_pad - NC)))

    # Batch tile: multiple of 8 sublanes when B is large enough; keeps the
    # double-buffered input tile small enough for v7x's 64 MiB VMEM.
    block_b = max(8, (block_b // 8) * 8)
    if B <= 8:
        TB = B
    else:
        TB = min(block_b, (B // 8) * 8)
    grid = (pl.cdiv(B, TB),)

    cost = pl.CostEstimate(
        flops=2 * B * C * E + 2 * B * E * NC_pad + B * C * HW,
        transcendentals=B,
        bytes_accessed=4 * (B * C * HW + C * E + 2 * E + E * NC_pad + NC_pad
                            + B * E + B * NC_pad),
    )

    emb, cls = pl.pallas_call(
        facenet_head_kernel,
        out_shape=(jax.ShapeDtypeStruct((B, E), jnp.float32),
                   jax.ShapeDtypeStruct((B, NC_pad), jnp.float32)),
        grid=grid,
        in_specs=[
            pl.BlockSpec((TB, C, HW), lambda i: (i, 0, 0)),   # feature map tile
            pl.BlockSpec((C, E), lambda i: (0, 0)),           # bottleneck W (C,E)
            pl.BlockSpec((2, E), lambda i: (0, 0)),           # folded BN scale/shift
            pl.BlockSpec((E, NC_pad), lambda i: (0, 0)),      # classifier W (padded)
            pl.BlockSpec((1, NC_pad), lambda i: (0, 0)),      # classifier b (padded)
        ],
        out_specs=(pl.BlockSpec((TB, E), lambda i: (i, 0)),
                   pl.BlockSpec((TB, NC_pad), lambda i: (i, 0))),
        compiler_params=pltpu.CompilerParams(
            dimension_semantics=("parallel",)),
        cost_estimate=cost,
    )(x, wb, bn, wc_p, bc_p)

    return emb, cls[:, :NC]


def init_params(key, flat_shape=1024, embedding_size=128, num_classes=16):
    k0, k1, k2, k3, k4, k5 = jax.random.split(key, 6)
    # nn.Linear(flat_shape, embedding_size, bias=False): weight (E, C) -> store (C, E)
    wb = (jax.random.normal(k0, (flat_shape, embedding_size), jnp.float32)
          * (1.0 / jnp.sqrt(flat_shape)))
    # BatchNorm1d(embedding_size): affine params + running stats.
    gamma = 1.0 + 0.01 * jax.random.normal(k1, (1, embedding_size), jnp.float32)
    beta = 0.01 * jax.random.normal(k2, (1, embedding_size), jnp.float32)
    run_mean = 0.1 * jax.random.normal(k3, (1, embedding_size), jnp.float32)
    run_var = jnp.abs(1.0 + 0.1 * jax.random.normal(k4, (1, embedding_size),
                                                    jnp.float32))
    # nn.Linear(embedding_size, num_classes): weight (NC, E) -> store (E, NC), bias (NC,)
    wc = (jax.random.normal(k5, (embedding_size, num_classes), jnp.float32)
          * (1.0 / jnp.sqrt(embedding_size)))
    bc = jnp.zeros((1, num_classes), jnp.float32)
    return wb, gamma, beta, run_mean, run_var, wc, bc


if __name__ == "__main__":
    key = jax.random.PRNGKey(0)
    k_x, k_p = jax.random.split(key)

    # Small backbone-output shape consistent with MobileNetV1 (flat_shape=1024).
    B, C, H, W = 2, 1024, 4, 4
    x = jax.random.normal(k_x, (B, C, H, W), jnp.float32)

    params = init_params(k_p, flat_shape=C, embedding_size=128, num_classes=16)
    wb, gamma, beta, run_mean, run_var, wc, bc = params

    emb, cls = facenet_head(x, *params)
    jax.block_until_ready((emb, cls))

    assert emb.shape == (B, 128) and cls.shape == (B, 16)

    # Embedding rows must be unit-norm (F.normalize semantics).
    norms = jnp.linalg.norm(emb, axis=1)
    assert bool(jnp.all(jnp.abs(norms - 1.0) < 1e-4))

    # Pure-JAX reference (loose tolerance to absorb MXU vs. XLA matmul numerics).
    pooled = jnp.mean(x.astype(jnp.float32), axis=(2, 3))
    z = jnp.dot(pooled, wb, precision=jax.lax.Precision.HIGHEST)
    bn_out = (z - run_mean) * jax.lax.rsqrt(run_var + 1e-3) * gamma + beta
    emb_ref = bn_out / jnp.maximum(
        jnp.linalg.norm(bn_out, axis=1, keepdims=True), 1e-12)
    cls_ref = jnp.dot(bn_out, wc, precision=jax.lax.Precision.HIGHEST) + bc
    assert bool(jnp.allclose(emb, emb_ref, rtol=1e-2, atol=1e-2))
    assert bool(jnp.allclose(cls, cls_ref, rtol=1e-2, atol=1e-2))

    print("KERNEL_OK")
</pallas_src>

<mosaic_0001>
module attributes {stable_mosaic.version = 11 : i64} {
  func.func @facenet_head_kernel(%arg0: i32, %arg1: memref<2x1024x16xf32, #tpu.memory_space<vmem>>, %arg2: memref<1024x128xf32, #tpu.memory_space<vmem>>, %arg3: memref<2x128xf32, #tpu.memory_space<vmem>>, %arg4: memref<128x128xf32, #tpu.memory_space<vmem>>, %arg5: memref<1x128xf32, #tpu.memory_space<vmem>>, %arg6: memref<2x128xf32, #tpu.memory_space<vmem>>, %arg7: memref<2x128xf32, #tpu.memory_space<vmem>>) attributes {dimension_semantics = [#tpu.dimension_semantics<parallel>], iteration_bounds = array<i64: 1>, scalar_prefetch = 0 : i64, scratch_operands = 0 : i64, tpu.core_type = #tpu.core_type<tc>, window_params = [{transform_indices = @transform_0, window_bounds = array<i64: 2, 1024, 16>}, {pipeline_mode = #tpu.pipeline_mode<synchronous>, transform_indices = @transform_1, window_bounds = array<i64: 1024, 128>}, {pipeline_mode = #tpu.pipeline_mode<synchronous>, transform_indices = @transform_2, window_bounds = array<i64: 2, 128>}, {pipeline_mode = #tpu.pipeline_mode<synchronous>, transform_indices = @transform_3, window_bounds = array<i64: 128, 128>}, {pipeline_mode = #tpu.pipeline_mode<synchronous>, transform_indices = @transform_4, window_bounds = array<i64: 1, 128>}, {transform_indices = @transform_5, window_bounds = array<i64: 2, 128>}, {transform_indices = @transform_6, window_bounds = array<i64: 2, 128>}]} {
    %c0 = arith.constant 0 : index
    %c0_0 = arith.constant 0 : index
    %c0_1 = arith.constant 0 : index
    %0 = vector.load %arg1[%c0, %c0_0, %c0_1] : memref<2x1024x16xf32, #tpu.memory_space<vmem>>, vector<2x1024x16xf32>
    %cst = arith.constant dense<0.000000e+00> : vector<2x1024xf32>
    %1 = vector.multi_reduction <add>, %0, %cst [2] : vector<2x1024x16xf32> to vector<2x1024xf32>
    %cst_2 = arith.constant 1.600000e+01 : f32
    %2 = vector.broadcast %cst_2 : f32 to vector<2x1024xf32>
    %3 = arith.divf %1, %2 : vector<2x1024xf32>
    %c0_3 = arith.constant 0 : index
    %c0_4 = arith.constant 0 : index
    %4 = vector.load %arg2[%c0_3, %c0_4] : memref<1024x128xf32, #tpu.memory_space<vmem>>, vector<1024x128xf32>
    %cst_5 = arith.constant dense<0.000000e+00> : vector<2x128xf32>
    %5 = tpu.matmul %3, %4, %cst_5 {dimension_numbers = #tpu.dot_dimension_numbers<[1], [0], [0], [1], [0, 0, 1, 1], [], []>} : vector<2x1024xf32>, vector<1024x128xf32>, vector<2x128xf32> -> vector<2x128xf32>
    %c0_6 = arith.constant 0 : index
    %c0_7 = arith.constant 0 : index
    %6 = vector.load %arg3[%c0_6, %c0_7] : memref<2x128xf32, #tpu.memory_space<vmem>>, vector<2x128xf32>
    %7 = vector.extract_strided_slice %6 {offsets = [0, 0], sizes = [1, 128], strides = [1, 1]} : vector<2x128xf32> to vector<1x128xf32>
    %8 = vector.extract_strided_slice %6 {offsets = [1, 0], sizes = [1, 128], strides = [1, 1]} : vector<2x128xf32> to vector<1x128xf32>
    %9 = vector.broadcast %7 : vector<1x128xf32> to vector<2x128xf32>
    %10 = arith.mulf %5, %9 : vector<2x128xf32>
    %11 = vector.broadcast %8 : vector<1x128xf32> to vector<2x128xf32>
    %12 = arith.addf %10, %11 : vector<2x128xf32>
    %13 = arith.mulf %12, %12 : vector<2x128xf32>
    %cst_8 = arith.constant dense<0.000000e+00> : vector<2xf32>
    %14 = vector.multi_reduction <add>, %13, %cst_8 [1] : vector<2x128xf32> to vector<2xf32>
    %15 = vector.shape_cast %14 : vector<2xf32> to vector<2x1xf32>
    %16 = math.sqrt %15 : vector<2x1xf32>
    %cst_9 = arith.constant 9.99999996E-13 : f32
    %17 = vector.broadcast %cst_9 : f32 to vector<2x1xf32>
    %18 = arith.maximumf %16, %17 : vector<2x1xf32>
    %19 = vector.broadcast %18 : vector<2x1xf32> to vector<2x128xf32>
    %20 = arith.divf %12, %19 : vector<2x128xf32>
    %c0_10 = arith.constant 0 : index
    %c0_11 = arith.constant 0 : index
    %21 = vector.load %arg6[%c0_10, %c0_11] : memref<2x128xf32, #tpu.memory_space<vmem>>, vector<2x128xf32>
    tpu.vector_store %arg6[%c0_10, %c0_11], %20 {strides = array<i32>} : memref<2x128xf32, #tpu.memory_space<vmem>>, vector<2x128xf32>,
    %c0_12 = arith.constant 0 : index
    %c0_13 = arith.constant 0 : index
    %22 = vector.load %arg4[%c0_12, %c0_13] : memref<128x128xf32, #tpu.memory_space<vmem>>, vector<128x128xf32>
    %cst_14 = arith.constant dense<0.000000e+00> : vector<2x128xf32>
    %23 = tpu.matmul %12, %22, %cst_14 {dimension_numbers = #tpu.dot_dimension_numbers<[1], [0], [0], [1], [0, 0, 1, 1], [], []>} : vector<2x128xf32>, vector<128x128xf32>, vector<2x128xf32> -> vector<2x128xf32>
    %c0_15 = arith.constant 0 : index
    %c0_16 = arith.constant 0 : index
    %24 = vector.load %arg5[%c0_15, %c0_16] : memref<1x128xf32, #tpu.memory_space<vmem>>, vector<1x128xf32>
    %25 = vector.broadcast %24 : vector<1x128xf32> to vector<2x128xf32>
    %26 = arith.addf %23, %25 : vector<2x128xf32>
    %c0_17 = arith.constant 0 : index
    %c0_18 = arith.constant 0 : index
    %27 = vector.load %arg7[%c0_17, %c0_18] : memref<2x128xf32, #tpu.memory_space<vmem>>, vector<2x128xf32>
    tpu.vector_store %arg7[%c0_17, %c0_18], %26 {strides = array<i32>} : memref<2x128xf32, #tpu.memory_space<vmem>>, vector<2x128xf32>,
    return
  }
  func.func @transform_0(%arg0: i32) -> (i32, i32, i32) {
    %c0_i32 = arith.constant 0 : i32
    %c0_i32_0 = arith.constant 0 : i32
    %c0_i32_1 = arith.constant 0 : i32
    return %arg0, %c0_i32, %c0_i32_0 : i32, i32, i32
  }
  func.func @transform_1(%arg0: i32) -> (i32, i32) {
    %c0_i32 = arith.constant 0 : i32
    %c0_i32_0 = arith.constant 0 : i32
    %c0_i32_1 = arith.constant 0 : i32
    return %c0_i32, %c0_i32_0 : i32, i32
  }
  func.func @transform_2(%arg0: i32) -> (i32, i32) {
    %c0_i32 = arith.constant 0 : i32
    %c0_i32_0 = arith.constant 0 : i32
    %c0_i32_1 = arith.constant 0 : i32
    return %c0_i32, %c0_i32_0 : i32, i32
  }
  func.func @transform_3(%arg0: i32) -> (i32, i32) {
    %c0_i32 = arith.constant 0 : i32
    %c0_i32_0 = arith.constant 0 : i32
    %c0_i32_1 = arith.constant 0 : i32
    return %c0_i32, %c0_i32_0 : i32, i32
  }
  func.func @transform_4(%arg0: i32) -> (i32, i32) {
    %c0_i32 = arith.constant 0 : i32
    %c0_i32_0 = arith.constant 0 : i32
    %c0_i32_1 = arith.constant 0 : i32
    return %c0_i32, %c0_i32_0 : i32, i32
  }
  func.func @transform_5(%arg0: i32) -> (i32, i32) {
    %c0_i32 = arith.constant 0 : i32
    %c0_i32_0 = arith.constant 0 : i32
    return %arg0, %c0_i32 : i32, i32
  }
  func.func @transform_6(%arg0: i32) -> (i32, i32) {
    %c0_i32 = arith.constant 0 : i32
    %c0_i32_0 = arith.constant 0 : i32
    return %arg0, %c0_i32 : i32, i32
  }
}

</mosaic_0001>

<bundles_post_ra>
// kernel: facenet_head.1
= control target key start
LH: loop header
LB: loop body
LE: loop exit
PB: predicated region body
PF: predicated region fallthrough
CT: control target
= control target key end

     0   :  { %12 = vsyncpa [#allocation3], 0  ;;  %vm280_vm0 = vcmask 130048   ;;  %s6344_s0 = inlined_call_operand.vmem [shape: f32[2,1024,16], index: 0, kind: input, shape index: {}]   ;;  %s6345_s1 = inlined_call_operand.vmem [shape: f32[1024,128], index: 1, kind: input, shape index: {}]   ;;  %s6346_s2 = inlined_call_operand.vmem [shape: f32[2,128], index: 2, kind: input, shape index: {}]   ;;  %s6347_s3 = inlined_call_operand.vmem [shape: f32[128,128], index: 3, kind: input, shape index: {}]   ;;  %s6348_s4 = inlined_call_operand.vmem [shape: f32[1,128], index: 4, kind: input, shape index: {}]   ;;  %s6349_s5 = inlined_call_operand.hbm [shape: f32[2,128], index: 5, kind: output, shape index: {0}]   ;;  %s6350_s6 = inlined_call_operand.hbm [shape: f32[2,128], index: 6, kind: output, shape index: {1}]  }
   0x1   :  { %v168_v0 = vld [vmem:[%s6344_s0 + $0x480] sm:$0xff]  ;;  %v169_v2 = vld [vmem:[%s6344_s0 + $0x488] sm:$0xff]  ;;  %v42_v13 = vld [vmem:[%s6344_s0 + $0x90] sm:$0xff] }
   0x2   :  { %v40_v1 = vld [vmem:[%s6344_s0 + $0x80] sm:$0xff]  ;;  %v713_v3 = vsel %vm280_vm0, %v168_v0, 0.0  ;;  %v41_v5 = vld [vmem:[%s6344_s0 + $0x88] sm:$0xff]  ;;  %v716_v6 = vsel %vm280_vm0, %v169_v2, 0.0  ;;  %v335_v15 = vsel %vm280_vm0, %v42_v13, 0.0  ;;  %v170_v16 = vld [vmem:[%s6344_s0 + $0x490] sm:$0xff] }
   0x3   :  { %v329_v4 = vsel %vm280_vm0, %v40_v1, 0.0  ;;  %714 = vadd.xlane.f32.xlu1 %v713_v3  ;;  %v332_v7 = vsel %vm280_vm0, %v41_v5, 0.0  ;;  %v25_v8 = vld [vmem:[%s6344_s0 + $0x8] sm:$0xff]  ;;  %v24_v9 = vld [vmem:[%s6344_s0] sm:$0xff]  ;;  %v719_v18 = vsel %vm280_vm0, %v170_v16, 0.0  ;;  %v43_v20 = vld [vmem:[%s6344_s0 + $0x98] sm:$0xff] }
   0x4   :  { %330 = vadd.xlane.f32.xlu0 %v329_v4  ;;  %v284_v10 = vsel %vm280_vm0, %v25_v8, 0.0  ;;  %v281_v11 = vsel %vm280_vm0, %v24_v9, 0.0  ;;  %v152_v12 = vld [vmem:[%s6344_s0 + $0x400] sm:$0xff]  ;;  %v153_v17 = vld [vmem:[%s6344_s0 + $0x408] sm:$0xff]  ;;  %v26_v21 = vld [vmem:[%s6344_s0 + $0x10] sm:$0xff]  ;;  %v338_v22 = vsel %vm280_vm0, %v43_v20, 0.0 }
   0x5   :  { %v665_v14 = vsel %vm280_vm0, %v152_v12, 0.0  ;;  %v668_v19 = vsel %vm280_vm0, %v153_v17, 0.0  ;;  %v287_v23 = vsel %vm280_vm0, %v26_v21, 0.0  ;;  %v73_v24 = vld [vmem:[%s6344_s0 + $0x188] sm:$0xff]  ;;  %v72_v25 = vld [vmem:[%s6344_s0 + $0x180] sm:$0xff]  ;;  %v171_v28 = vld [vmem:[%s6344_s0 + $0x498] sm:$0xff] }
   0x6   :  { %v428_v26 = vsel %vm280_vm0, %v73_v24, 0.0  ;;  %v425_v27 = vsel %vm280_vm0, %v72_v25, 0.0  ;;  %v154_v29 = vld [vmem:[%s6344_s0 + $0x410] sm:$0xff]  ;;  %v722_v30 = vsel %vm280_vm0, %v171_v28, 0.0 }
   0x7   :  { %717 = vadd.xlane.f32.xlu1 %v716_v6  ;;  %v671_v31 = vsel %vm280_vm0, %v154_v29, 0.0 }
   0x8   :  { %333 = vadd.xlane.f32.xlu0 %v332_v7 }
   0xb   :  { %285 = vadd.xlane.f32.xlu1 %v284_v10 }
   0xc   :  { %282 = vadd.xlane.f32.xlu0 %v281_v11 }
   0xf   :  { %666 = vadd.xlane.f32.xlu1 %v665_v14 }
  0x10   :  { %336 = vadd.xlane.f32.xlu0 %v335_v15 }
  0x13   :  { %720 = vadd.xlane.f32.xlu1 %v719_v18 }
  0x14   :  { %669 = vadd.xlane.f32.xlu0 %v668_v19 }
  0x17   :  { %339 = vadd.xlane.f32.xlu1 %v338_v22 }
  0x18   :  { %288 = vadd.xlane.f32.xlu0 %v287_v23 }
  0x1b   :  { %429 = vadd.xlane.f32.xlu1 %v428_v26 }
  0x1c   :  { %426 = vadd.xlane.f32.xlu0 %v425_v27 }
  0x1d   :  { %13 = vsyncpa [#allocation5], 0  ;;  %v201_v32 = vld [vmem:[%s6344_s0 + $0x588] sm:$0xff]  ;;  %v200_v33 = vld [vmem:[%s6344_s0 + $0x580] sm:$0xff]  ;;  %vm1701_vm1 = vcmask 130112   ;;  %vm1708_vm2 = vcmask 195712  }
  0x1e   :  { %v812_v34 = vsel %vm280_vm0, %v201_v32, 0.0  ;;  %v809_v35 = vsel %vm280_vm0, %v200_v33, 0.0  ;;  %v44_v36 = vld [vmem:[%s6344_s0 + $0xa0] sm:$0xff]  ;;  %v27_v37 = vld [vmem:[%s6344_s0 + $0x18] sm:$0xff]  ;;  %v57_v40 = vld [vmem:[%s6344_s0 + $0x108] sm:$0xff]  ;;  %vm1715_vm3 = vcmask 261312  }
  0x1f   :  { %723 = vadd.xlane.f32.xlu1 %v722_v30  ;;  %v341_v38 = vsel %vm280_vm0, %v44_v36, 0.0  ;;  %v290_v39 = vsel %vm280_vm0, %v27_v37, 0.0  ;;  %v56_v41 = vld [vmem:[%s6344_s0 + $0x100] sm:$0xff]  ;;  %v380_v42 = vsel %vm280_vm0, %v57_v40, 0.0  ;;  %v155_v44 = vld [vmem:[%s6344_s0 + $0x418] sm:$0xff]  ;;  %v74_v45 = vld [vmem:[%s6344_s0 + $0x190] sm:$0xff] }
  0x20   :  { %672 = vadd.xlane.f32.xlu0 %v671_v31  ;;  %v377_v43 = vsel %vm280_vm0, %v56_v41, 0.0  ;;  %v674_v46 = vsel %vm280_vm0, %v155_v44, 0.0  ;;  %v431_v47 = vsel %vm280_vm0, %v74_v45, 0.0  ;;  %v184_v48 = vld [vmem:[%s6344_s0 + $0x500] sm:$0xff]  ;;  %v202_v52 = vld [vmem:[%s6344_s0 + $0x590] sm:$0xff]  ;;  %v185_v53 = vld [vmem:[%s6344_s0 + $0x508] sm:$0xff] }
  0x21   :  { %v172_v49 = vld [vmem:[%s6344_s0 + $0x4a0] sm:$0xff]  ;;  %v761_v50 = vsel %vm280_vm0, %v184_v48, 0.0  ;;  %v815_v54 = vsel %vm280_vm0, %v202_v52, 0.0  ;;  %v764_v55 = vsel %vm280_vm0, %v185_v53, 0.0  ;;  %v45_v56 = vld [vmem:[%s6344_s0 + $0xa8] sm:$0xff]  ;;  %v75_v60 = vld [vmem:[%s6344_s0 + $0x198] sm:$0xff] }
  0x22   :  { %v725_v51 = vsel %vm280_vm0, %v172_v49, 0.0  ;;  %v28_v57 = vld [vmem:[%s6344_s0 + $0x20] sm:$0xff]  ;;  %v344_v58 = vsel %vm280_vm0, %v45_v56, 0.0  ;;  %v58_v61 = vld [vmem:[%s6344_s0 + $0x110] sm:$0xff]  ;;  %v434_v62 = vsel %vm280_vm0, %v75_v60, 0.0  ;;  %v173_v0 = vld [vmem:[%s6344_s0 + $0x4a8] sm:$0xff] }
  0x23   :  { %813 = vadd.xlane.f32.xlu1 %v812_v34  ;;  %v293_v59 = vsel %vm280_vm0, %v28_v57, 0.0  ;;  %v383_v63 = vsel %vm280_vm0, %v58_v61, 0.0  ;;  %v156_v1 = vld [vmem:[%s6344_s0 + $0x420] sm:$0xff]  ;;  %v728_v2 = vsel %vm280_vm0, %v173_v0, 0.0  ;;  %v203_v4 = vld [vmem:[%s6344_s0 + $0x598] sm:$0xff]  ;;  %v186_v5 = vld [vmem:[%s6344_s0 + $0x510] sm:$0xff] }
  0x24   :  { %810 = vadd.xlane.f32.xlu0 %v809_v35  ;;  %v677_v3 = vsel %vm280_vm0, %v156_v1, 0.0  ;;  %v818_v6 = vsel %vm280_vm0, %v203_v4, 0.0  ;;  %v767_v7 = vsel %vm280_vm0, %v186_v5, 0.0  ;;  %v46_v8 = vld [vmem:[%s6344_s0 + $0xb0] sm:$0xff]  ;;  %v29_v9 = vld [vmem:[%s6344_s0 + $0x28] sm:$0xff]  ;;  %v76_v12 = vld [vmem:[%s6344_s0 + $0x1a0] sm:$0xff] }
  0x25   :  { %v347_v10 = vsel %vm280_vm0, %v46_v8, 0.0  ;;  %v296_v11 = vsel %vm280_vm0, %v29_v9, 0.0  ;;  %v59_v13 = vld [vmem:[%s6344_s0 + $0x118] sm:$0xff]  ;;  %v437_v14 = vsel %vm280_vm0, %v76_v12, 0.0  ;;  %v174_v16 = vld [vmem:[%s6344_s0 + $0x4b0] sm:$0xff]  ;;  %v157_v17 = vld [vmem:[%s6344_s0 + $0x428] sm:$0xff] }
  0x26   :  { %v386_v15 = vsel %vm280_vm0, %v59_v13, 0.0  ;;  %v731_v18 = vsel %vm280_vm0, %v174_v16, 0.0  ;;  %v680_v19 = vsel %vm280_vm0, %v157_v17, 0.0  ;;  %v204_v20 = vld [vmem:[%s6344_s0 + $0x5a0] sm:$0xff]  ;;  %v187_v21 = vld [vmem:[%s6344_s0 + $0x518] sm:$0xff]  ;;  %v30_v25 = vld [vmem:[%s6344_s0 + $0x30] sm:$0xff] }
  0x27   :  { %342 = vadd.xlane.f32.xlu1 %v341_v38  ;;  %v821_v22 = vsel %vm280_vm0, %v204_v20, 0.0  ;;  %v770_v23 = vsel %vm280_vm0, %v187_v21, 0.0  ;;  %v47_v24 = vld [vmem:[%s6344_s0 + $0xb8] sm:$0xff]  ;;  %v299_v27 = vsel %vm280_vm0, %v30_v25, 0.0  ;;  %v77_v28 = vld [vmem:[%s6344_s0 + $0x1a8] sm:$0xff]  ;;  %v60_v29 = vld [vmem:[%s6344_s0 + $0x120] sm:$0xff] }
  0x28   :  { %291 = vadd.xlane.f32.xlu0 %v290_v39  ;;  %v350_v26 = vsel %vm280_vm0, %v47_v24, 0.0  ;;  %v440_v30 = vsel %vm280_vm0, %v77_v28, 0.0  ;;  %v389_v31 = vsel %vm280_vm0, %v60_v29, 0.0  ;;  %v175_v32 = vld [vmem:[%s6344_s0 + $0x4b8] sm:$0xff]  ;;  %v158_v33 = vld [vmem:[%s6344_s0 + $0x430] sm:$0xff]  ;;  %v205_v36 = vld [vmem:[%s6344_s0 + $0x5a8] sm:$0xff] }
  0x29   :  { %v734_v34 = vsel %vm280_vm0, %v175_v32, 0.0  ;;  %v683_v35 = vsel %vm280_vm0, %v158_v33, 0.0  ;;  %v188_v37 = vld [vmem:[%s6344_s0 + $0x520] sm:$0xff]  ;;  %v824_v38 = vsel %vm280_vm0, %v205_v36, 0.0  ;;  %v31_v41 = vld [vmem:[%s6344_s0 + $0x38] sm:$0xff]  ;;  %v78_v44 = vld [vmem:[%s6344_s0 + $0x1b0] sm:$0xff] }
  0x2a   :  { %v773_v39 = vsel %vm280_vm0, %v188_v37, 0.0  ;;  %v48_v40 = vld [vmem:[%s6344_s0 + $0xc0] sm:$0xff]  ;;  %v61_v45 = vld [vmem:[%s6344_s0 + $0x128] sm:$0xff]  ;;  %v159_v49 = vld [vmem:[%s6344_s0 + $0x438] sm:$0xff]  ;;  %vm1722_vm4 = vcmask 326912   ;;  %vm1729_vm5 = vcmask 392512  }
  0x2b   :  { %381 = vadd.xlane.f32.xlu1 %v380_v42  ;;  %v353_v42 = vsel %vm280_vm0, %v48_v40, 0.0  ;;  %v176_v48 = vld [vmem:[%s6344_s0 + $0x4c0] sm:$0xff]  ;;  %v206_v52 = vld [vmem:[%s6344_s0 + $0x5b0] sm:$0xff]  ;;  %v189_v53 = vld [vmem:[%s6344_s0 + $0x528] sm:$0xff]  ;;  %vm1736_vm6 = vcmask 458112   ;;  %vm1743_vm7 = vcmask 523712  }
  0x2c   :  { %378 = vadd.xlane.f32.xlu0 %v377_v43  ;;  %v302_v43 = vsel %vm280_vm0, %v31_v41, 0.0  ;;  %v49_v56 = vld [vmem:[%s6344_s0 + $0xc8] sm:$0xff]  ;;  %v32_v57 = vld [vmem:[%s6344_s0 + $0x40] sm:$0xff]  ;;  %v79_v60 = vld [vmem:[%s6344_s0 + $0x1b8] sm:$0xff]  ;;  %vm1750_vm8 = vcmask 589312   ;;  %vm6351_vm9 = vcmask 654912  }
  0x2d   :  { %v62_v61 = vld [vmem:[%s6344_s0 + $0x130] sm:$0xff]  ;;  %v177_v0 = vld [vmem:[%s6344_s0 + $0x4c8] sm:$0xff]  ;;  %v160_v1 = vld [vmem:[%s6344_s0 + $0x440] sm:$0xff]  ;;  %vm1764_vm10 = vcmask 720512   ;;  %vm1771_vm11 = vcmask 786112   ;;  %vm1778_vm12 = vcmask 851712  }
  0x2e   :  { %v207_v4 = vld [vmem:[%s6344_s0 + $0x5b8] sm:$0xff]  ;;  %v190_v5 = vld [vmem:[%s6344_s0 + $0x530] sm:$0xff]  ;;  %v33_v9 = vld [vmem:[%s6344_s0 + $0x48] sm:$0xff]  ;;  %vm1785_vm13 = vcmask 917312   ;;  %vm1792_vm14 = vcmask 982912   ;;  %vm1799_vm15 = vcmask 1048512  }
  0x2f   :  { %675 = vadd.xlane.f32.xlu1 %v674_v46  ;;  %v443_v46 = vsel %vm280_vm0, %v78_v44, 0.0  ;;  %v50_v8 = vld [vmem:[%s6344_s0 + $0xd0] sm:$0xff]  ;;  %v80_v12 = vld [vmem:[%s6344_s0 + $0x1c0] sm:$0xff]  ;;  %v63_v13 = vld [vmem:[%s6344_s0 + $0x138] sm:$0xff] }
  0x30   :  { %432 = vadd.xlane.f32.xlu0 %v431_v47  ;;  %v392_v47 = vsel %vm280_vm0, %v61_v45, 0.0  ;;  %v398_v16 = vsel %vm280_vm0, %v63_v13, 0.0  ;;  %v192_v13 = vld [vmem:[%s6344_s0 + $0x540] sm:$0xff] }
  0x33   :  { %762 = vadd.xlane.f32.xlu1 %v761_v50  ;;  %v737_v50 = vsel %vm280_vm0, %v176_v48, 0.0 }
  0x34   :  { %726 = vadd.xlane.f32.xlu0 %v725_v51  ;;  %v686_v51 = vsel %vm280_vm0, %v159_v49, 0.0 }
  0x37   :  { %816 = vadd.xlane.f32.xlu1 %v815_v54  ;;  %v827_v54 = vsel %vm280_vm0, %v206_v52, 0.0 }
  0x38   :  { %765 = vadd.xlane.f32.xlu0 %v764_v55  ;;  %v776_v55 = vsel %vm280_vm0, %v189_v53, 0.0  ;;  %v81_v53 = vld [vmem:[%s6344_s0 + $0x1c8] sm:$0xff] }
  0x3b   :  { %345 = vadd.xlane.f32.xlu1 %v344_v58  ;;  %v356_v58 = vsel %vm280_vm0, %v49_v56, 0.0 }
  0x3c   :  { %294 = vadd.xlane.f32.xlu0 %v293_v59  ;;  %v305_v59 = vsel %vm280_vm0, %v32_v57, 0.0 }
  0x3f   :  { %435 = vadd.xlane.f32.xlu1 %v434_v62  ;;  %v446_v62 = vsel %vm280_vm0, %v79_v60, 0.0  ;;  %v452_v60 = vsel %vm280_vm0, %v81_v53, 0.0  ;;  %v180_v53 = vld [vmem:[%s6344_s0 + $0x4e0] sm:$0xff] }
  0x40   :  { %384 = vadd.xlane.f32.xlu0 %v383_v63  ;;  %v395_v63 = vsel %vm280_vm0, %v62_v61, 0.0 }
  0x43   :  { %729 = vadd.xlane.f32.xlu1 %v728_v2  ;;  %v740_v2 = vsel %vm280_vm0, %v177_v0, 0.0  ;;  %v179_v0 = vld [vmem:[%s6344_s0 + $0x4d8] sm:$0xff] }
  0x44   :  { %678 = vadd.xlane.f32.xlu0 %v677_v3  ;;  %v689_v3 = vsel %vm280_vm0, %v160_v1, 0.0  ;;  %v162_v1 = vld [vmem:[%s6344_s0 + $0x450] sm:$0xff] }
  0x47   :  { %819 = vadd.xlane.f32.xlu1 %v818_v6  ;;  %v830_v6 = vsel %vm280_vm0, %v207_v4, 0.0 }
  0x48   :  { %768 = vadd.xlane.f32.xlu0 %v767_v7  ;;  %v779_v7 = vsel %vm280_vm0, %v190_v5, 0.0 }
  0x4b   :  { %348 = vadd.xlane.f32.xlu1 %v347_v10  ;;  %v359_v10 = vsel %vm280_vm0, %v50_v8, 0.0  ;;  %v695_v8 = vsel %vm280_vm0, %v162_v1, 0.0 }
  0x4c   :  { %297 = vadd.xlane.f32.xlu0 %v296_v11  ;;  %v308_v11 = vsel %vm280_vm0, %v33_v9, 0.0 }
  0x4f   :  { %438 = vadd.xlane.f32.xlu1 %v437_v14  ;;  %v1690_v14 = vlaneseq }
  0x50   :  { %387 = vadd.xlane.f32.xlu0 %v386_v15  ;;  %v449_v15 = vsel %vm280_vm0, %v80_v12, 0.0  ;;  %v209_v12 = vld [vmem:[%s6344_s0 + $0x5c8] sm:$0xff] }
  0x51   :  { %v4162_v17 = vand.u32 127, %v1690_v14  ;;  %v4170_v20 = vshrl.u32 %v1690_v14, 7 }
  0x53   :  { %732 = vadd.xlane.f32.xlu1 %v731_v18  ;;  %v178_v18 = vld [vmem:[%s6344_s0 + $0x4d0] sm:$0xff]  ;;  %6358 = vst [vmem:[#allocation8_spill] sm:$0xff] %v4170_v20  ;;  %v1696_v21 = vadd.s32 4294967288, %v4162_v17  ;;  %v4183_v28 = vsub.s32 %v4162_v17, %v4170_v20  ;;  %v1703_v44 = vadd.s32 4294967280, %v4162_v17 }
  0x54   :  { %681 = vadd.xlane.f32.xlu0 %v680_v19  ;;  %v161_v19 = vld [vmem:[%s6344_s0 + $0x448] sm:$0xff]  ;;  %v743_v24 = vsel %vm280_vm0, %v178_v18, 0.0 }
  0x55   :  { %v692_v25 = vsel %vm280_vm0, %v161_v19, 0.0  ;;  %v4214_v57 = vsub.s32 %v1703_v44, %v4170_v20 }
  0x57   :  { %822 = vadd.xlane.f32.xlu1 %v821_v22 }
  0x58   :  { %771 = vadd.xlane.f32.xlu0 %v770_v23 }
  0x5b   :  { %351 = vadd.xlane.f32.xlu1 %v350_v26  ;;  %v208_v26 = vld [vmem:[%s6344_s0 + $0x5c0] sm:$0xff] }
  0x5c   :  { %300 = vadd.xlane.f32.xlu0 %v299_v27  ;;  %v191_v27 = vld [vmem:[%s6344_s0 + $0x538] sm:$0xff] }
  0x5f   :  { %441 = vadd.xlane.f32.xlu1 %v440_v30 }
  0x60   :  { %390 = vadd.xlane.f32.xlu0 %v389_v31  ;;  %v4186_v31 = vsub.s32 %v1696_v21, %v4170_v20 }
  0x63   :  { %735 = vadd.xlane.f32.xlu1 %v734_v34  ;;  %v833_v34 = vsel %vm280_vm0, %v208_v26, 0.0 }
  0x64   :  { %684 = vadd.xlane.f32.xlu0 %v683_v35  ;;  %v782_v35 = vsel %vm280_vm0, %v191_v27, 0.0 }
  0x67   :  { %825 = vadd.xlane.f32.xlu1 %v824_v38  ;;  %v51_v38 = vld [vmem:[%s6344_s0 + $0xd8] sm:$0xff] }
  0x68   :  { %774 = vadd.xlane.f32.xlu0 %v773_v39  ;;  %v34_v39 = vld [vmem:[%s6344_s0 + $0x50] sm:$0xff] }
  0x69   :  { %v311_v48 = vsel %vm280_vm0, %v34_v39, 0.0 }
  0x6b   :  { %354 = vadd.xlane.f32.xlu1 %v353_v42 }
  0x6c   :  { %303 = vadd.xlane.f32.xlu0 %v302_v43 }
  0x6f   :  { %444 = vadd.xlane.f32.xlu1 %v443_v46 }
  0x70   :  { %393 = vadd.xlane.f32.xlu0 %v392_v47  ;;  %v362_v47 = vsel %vm280_vm0, %v51_v38, 0.0 }
  0x73   :  { %738 = vadd.xlane.f32.xlu1 %v737_v50 }
  0x74   :  { %687 = vadd.xlane.f32.xlu0 %v686_v51 }
  0x77   :  { %828 = vadd.xlane.f32.xlu1 %v827_v54  ;;  %v64_v54 = vld [vmem:[%s6344_s0 + $0x140] sm:$0xff] }
  0x78   :  { %777 = vadd.xlane.f32.xlu0 %v776_v55  ;;  %v401_v61 = vsel %vm280_vm0, %v64_v54, 0.0  ;;  %v163_v54 = vld [vmem:[%s6344_s0 + $0x458] sm:$0xff] }
  0x7b   :  { %357 = vadd.xlane.f32.xlu1 %v356_v58 }
  0x7c   :  { %306 = vadd.xlane.f32.xlu0 %v305_v59 }
  0x7f   :  { %447 = vadd.xlane.f32.xlu1 %v446_v62 }
  0x80   :  { %396 = vadd.xlane.f32.xlu0 %v395_v63 }
  0x83   :  { %741 = vadd.xlane.f32.xlu1 %v740_v2  ;;  %v1710_v2 = vadd.s32 4294967272, %v4162_v17 }
  0x84   :  { %690 = vadd.xlane.f32.xlu0 %v689_v3 }
  0x85   :  { %v4237_v14 = vsub.s32 %v1710_v2, %v4170_v20 }
  0x87   :  { %831 = vadd.xlane.f32.xlu1 %v830_v6 }
  0x88   :  { %780 = vadd.xlane.f32.xlu0 %v779_v7  ;;  %v746_v7 = vsel %vm280_vm0, %v179_v0, 0.0 }
  0x8b   :  { %360 = vadd.xlane.f32.xlu1 %v359_v10 }
  0x8c   :  { %309 = vadd.xlane.f32.xlu0 %v308_v11 }
  0x8f   :  { %450 = vadd.xlane.f32.xlu1 %v449_v15 }
  0x90   :  { %399 = vadd.xlane.f32.xlu0 %v398_v16  ;;  %v715_v22 = vpop.xlane.xlu1 %714 }
  0x91   :  { %v331_v23 = vpop.xlane.xlu0 %330  ;;  %v1194_v29 = vmul.f32 0.0625, %v715_v22  ;;  %v836_v22 = vsel %vm280_vm0, %v209_v12, 0.0 }
  0x92   :  { %v1066_v30 = vmul.f32 0.0625, %v331_v23  ;;  %v785_v23 = vsel %vm280_vm0, %v192_v13, 0.0 }
  0x93   :  { %744 = vadd.xlane.f32.xlu1 %v743_v24  ;;  %v2436_v40 = vrot.slane %v1194_v29, %v4183_v28  ;;  %v52_v29 = vld [vmem:[%s6344_s0 + $0xe0] sm:$0xff] }
  0x94   :  { %693 = vadd.xlane.f32.xlu0 %v692_v25  ;;  %v718_v32 = vpop.xlane.xlu1 %717  ;;  %v1804_v41 = vrot.slane %v1066_v30, %v4183_v28  ;;  %v35_v30 = vld [vmem:[%s6344_s0 + $0x58] sm:$0xff] }
  0x95   :  { %v334_v33 = vpop.xlane.xlu0 %333  ;;  %v1195_v36 = vmul.f32 0.0625, %v718_v32 }
  0x96   :  { %v1067_v37 = vmul.f32 0.0625, %v334_v33 }
  0x97   :  { %v2440_v42 = vrot.slane %v1195_v36, %v4186_v31  ;;  %834 = vadd.xlane.f32.xlu1 %v833_v34  ;;  %v365_v36 = vsel %vm280_vm0, %v52_v29, 0.0 }
  0x98   :  { %v1808_v43 = vrot.slane %v1067_v37, %v4186_v31  ;;  %783 = vadd.xlane.f32.xlu0 %v782_v35  ;;  %v286_v45 = vpop.xlane.xlu1 %285  ;;  %v314_v37 = vsel %vm280_vm0, %v35_v30, 0.0 }
  0x99   :  { %v283_v46 = vpop.xlane.xlu0 %282  ;;  %v2441_v49 = vsel %vm1701_vm1, %v2440_v42, %v2436_v40  ;;  %v1051_v51 = vmul.f32 0.0625, %v286_v45  ;;  %v82_v42 = vld [vmem:[%s6344_s0 + $0x1d0] sm:$0xff] }
  0x9a   :  { %v1809_v50 = vsel %vm1701_vm1, %v1808_v43, %v1804_v41  ;;  %v1050_v52 = vmul.f32 0.0625, %v283_v46  ;;  %v65_v43 = vld [vmem:[%s6344_s0 + $0x148] sm:$0xff] }
  0x9b   :  { %v1700_v55 = vrot.slane %v1051_v51, %v4186_v31  ;;  %363 = vadd.xlane.f32.xlu1 %v362_v47 }
  0x9c   :  { %v1695_v56 = vrot.slane %v1050_v52, %v4183_v28  ;;  %312 = vadd.xlane.f32.xlu0 %v311_v48  ;;  %v667_v58 = vpop.xlane.xlu1 %666  ;;  %v455_v48 = vsel %vm280_vm0, %v82_v42, 0.0 }
  0x9d   :  { %v337_v59 = vpop.xlane.xlu0 %336  ;;  %v1178_v3 = vmul.f32 0.0625, %v667_v58  ;;  %v1717_v58 = vadd.s32 4294967264, %v4162_v17 }
  0x9e   :  { %v1702_v62 = vsel %vm1701_vm1, %v1700_v55, %v1695_v56  ;;  %v1068_v63 = vmul.f32 0.0625, %v337_v59 }
  0x9f   :  { %453 = vadd.xlane.f32.xlu1 %v452_v60  ;;  %v2357_v15 = vrot.slane %v1178_v3, %v4183_v28  ;;  %v210_v3 = vld [vmem:[%s6344_s0 + $0x5d0] sm:$0xff] }
  0xa0   :  { %v1813_v4 = vrot.slane %v1068_v63, %v4214_v57  ;;  %402 = vadd.xlane.f32.xlu0 %v401_v61  ;;  %v721_v5 = vpop.xlane.xlu1 %720  ;;  %v749_v61 = vsel %vm280_vm0, %v180_v53, 0.0 }
  0xa1   :  { %v670_v6 = vpop.xlane.xlu0 %669  ;;  %v1196_v10 = vmul.f32 0.0625, %v721_v5 }
  0xa2   :  { %v1814_v9 = vsel %vm1708_vm2, %v1813_v4, %v1809_v50  ;;  %v1179_v11 = vmul.f32 0.0625, %v670_v6  ;;  %v193_v4 = vld [vmem:[%s6344_s0 + $0x548] sm:$0xff] }
  0xa3   :  { %v2445_v16 = vrot.slane %v1196_v10, %v4214_v57  ;;  %747 = vadd.xlane.f32.xlu1 %v746_v7  ;;  %v4295_v7 = vsub.s32 %v1717_v58, %v4170_v20  ;;  %v839_v10 = vsel %vm280_vm0, %v210_v3, 0.0  ;;  %v1724_v58 = vadd.s32 4294967256, %v4162_v17 }
  0xa4   :  { %v2361_v18 = vrot.slane %v1179_v11, %v4186_v31  ;;  %696 = vadd.xlane.f32.xlu0 %v695_v8  ;;  %v340_v19 = vpop.xlane.xlu1 %339  ;;  %v788_v11 = vsel %vm280_vm0, %v193_v4, 0.0  ;;  %v54_v4 = vld [vmem:[%s6344_s0 + $0xf0] sm:$0xff] }
  0xa5   :  { %v289_v21 = vpop.xlane.xlu0 %288  ;;  %v2446_v24 = vsel %vm1708_vm2, %v2445_v16, %v2441_v49  ;;  %v1069_v26 = vmul.f32 0.0625, %v340_v19  ;;  %v404_v49 = vsel %vm280_vm0, %v65_v43, 0.0  ;;  %v53_v16 = vld [vmem:[%s6344_s0 + $0xe8] sm:$0xff] }
  0xa6   :  { %v2362_v25 = vsel %vm1701_vm1, %v2361_v18, %v2357_v15  ;;  %v1052_v27 = vmul.f32 0.0625, %v289_v21  ;;  %v36_v18 = vld [vmem:[%s6344_s0 + $0x60] sm:$0xff]  ;;  %v181_v43 = vld [vmem:[%s6344_s0 + $0x4e8] sm:$0xff] }
  0xa7   :  { %v1818_v32 = vrot.slane %v1069_v26, %v4237_v14  ;;  %837 = vadd.xlane.f32.xlu1 %v836_v22 }
  0xa8   :  { %v1707_v33 = vrot.slane %v1052_v27, %v4214_v57  ;;  %786 = vadd.xlane.f32.xlu0 %v785_v23  ;;  %v430_v34 = vpop.xlane.xlu1 %429 }
  0xa9   :  { %v427_v35 = vpop.xlane.xlu0 %426  ;;  %v1819_v38 = vsel %vm1715_vm3, %v1818_v32, %v1814_v9  ;;  %v1099_v40 = vmul.f32 0.0625, %v430_v34  ;;  %v83_v32 = vld [vmem:[%s6344_s0 + $0x1d8] sm:$0xff] }
  0xaa   :  { %v1709_v39 = vsel %vm1708_vm2, %v1707_v33, %v1702_v62  ;;  %v1098_v41 = vmul.f32 0.0625, %v427_v35  ;;  %v698_v62 = vsel %vm280_vm0, %v163_v54, 0.0  ;;  %v66_v33 = vld [vmem:[%s6344_s0 + $0x150] sm:$0xff] }
  0xab   :  { %v1966_v44 = vrot.slane %v1099_v40, %v4186_v31  ;;  %366 = vadd.xlane.f32.xlu1 %v365_v36 }
  0xac   :  { %v1962_v45 = vrot.slane %v1098_v41, %v4183_v28  ;;  %315 = vadd.xlane.f32.xlu0 %v314_v37  ;;  %v724_v46 = vpop.xlane.xlu1 %723 }
  0xad   :  { %v673_v47 = vpop.xlane.xlu0 %672  ;;  %v1197_v51 = vmul.f32 0.0625, %v724_v46 }
  0xae   :  { %v4269_v50 = vsel %vm1701_vm1, %v1966_v44, %v1962_v45  ;;  %v1180_v52 = vmul.f32 0.0625, %v673_v47  ;;  %v164_v44 = vld [vmem:[%s6344_s0 + $0x460] sm:$0xff] }
  0xaf   :  { %v2450_v55 = vrot.slane %v1197_v51, %v4237_v14  ;;  %456 = vadd.xlane.f32.xlu1 %v455_v48  ;;  %v701_v51 = vsel %vm280_vm0, %v164_v44, 0.0 }
  0xb0   :  { %v2366_v56 = vrot.slane %v1180_v52, %v4214_v57  ;;  %405 = vadd.xlane.f32.xlu0 %v404_v49  ;;  %v814_v59 = vpop.xlane.xlu1 %813  ;;  %v752_v49 = vsel %vm280_vm0, %v181_v43, 0.0 }
  0xb1   :  { %v811_v60 = vpop.xlane.xlu0 %810  ;;  %v4283_v63 = vsel %vm1715_vm3, %v2450_v55, %v2446_v24  ;;  %v1227_v1 = vmul.f32 0.0625, %v814_v59  ;;  %v368_v24 = vsel %vm280_vm0, %v53_v16, 0.0  ;;  %v211_v55 = vld [vmem:[%s6344_s0 + $0x5d8] sm:$0xff] }
  0xb2   :  { %v2367_v0 = vsel %vm1708_vm2, %v2366_v56, %v2362_v25  ;;  %v1226_v2 = vmul.f32 0.0625, %v811_v60  ;;  %v317_v25 = vsel %vm280_vm0, %v36_v18, 0.0  ;;  %v194_v56 = vld [vmem:[%s6344_s0 + $0x550] sm:$0xff] }
  0xb3   :  { %v2598_v5 = vrot.slane %v1227_v1, %v4186_v31  ;;  %750 = vadd.xlane.f32.xlu1 %v749_v61 }
  0xb4   :  { %v2594_v6 = vrot.slane %v1226_v2, %v4183_v28  ;;  %699 = vadd.xlane.f32.xlu0 %v698_v62  ;;  %v343_v8 = vpop.xlane.xlu1 %342 }
  0xb5   :  { %v292_v9 = vpop.xlane.xlu0 %291  ;;  %v1070_v13 = vmul.f32 0.0625, %v343_v8 }
  0xb6   :  { %v4300_v12 = vsel %vm1701_vm1, %v2598_v5, %v2594_v6  ;;  %v1053_v15 = vmul.f32 0.0625, %v292_v9  ;;  %v37_v5 = vld [vmem:[%s6344_s0 + $0x68] sm:$0xff]  ;;  %v4365_v6 = vsub.s32 %v1724_v58, %v4170_v20 }
  0xb7   :  { %v1823_v19 = vrot.slane %v1070_v13, %v4295_v7  ;;  %840 = vadd.xlane.f32.xlu1 %v839_v10  ;;  %v371_v13 = vsel %vm280_vm0, %v54_v4, 0.0 }
  0xb8   :  { %v1714_v21 = vrot.slane %v1053_v15, %v4237_v14  ;;  %789 = vadd.xlane.f32.xlu0 %v788_v11  ;;  %v382_v22 = vpop.xlane.xlu1 %381  ;;  %v320_v15 = vsel %vm280_vm0, %v37_v5, 0.0 }
  0xb9   :  { %v379_v23 = vpop.xlane.xlu0 %378  ;;  %v4313_v26 = vsel %vm1722_vm4, %v1823_v19, %v1819_v38  ;;  %v1083_v29 = vmul.f32 0.0625, %v382_v22  ;;  %v458_v38 = vsel %vm280_vm0, %v83_v32, 0.0  ;;  %v84_v22 = vld [vmem:[%s6344_s0 + $0x1e0] sm:$0xff] }
  0xba   :  { %v4316_v27 = vsel %vm1715_vm3, %v1714_v21, %v1709_v39  ;;  %v1082_v30 = vmul.f32 0.0625, %v379_v23  ;;  %v407_v39 = vsel %vm280_vm0, %v66_v33, 0.0  ;;  %v67_v23 = vld [vmem:[%s6344_s0 + $0x158] sm:$0xff] }
  0xbb   :  { %v1887_v34 = vrot.slane %v1083_v29, %v4186_v31  ;;  %369 = vadd.xlane.f32.xlu1 %v368_v24  ;;  %v410_v32 = vsel %vm280_vm0, %v67_v23, 0.0 }
  0xbc   :  { %v1883_v35 = vrot.slane %v1082_v30, %v4183_v28  ;;  %318 = vadd.xlane.f32.xlu0 %v317_v25  ;;  %v676_v36 = vpop.xlane.xlu1 %675  ;;  %v461_v30 = vsel %vm280_vm0, %v84_v22, 0.0 }
  0xbd   :  { %v433_v37 = vpop.xlane.xlu0 %432  ;;  %v1181_v41 = vmul.f32 0.0625, %v676_v36 }
  0xbe   :  { %v4329_v40 = vsel %vm1701_vm1, %v1887_v34, %v1883_v35  ;;  %v1100_v42 = vmul.f32 0.0625, %v433_v37  ;;  %v182_v37 = vld [vmem:[%s6344_s0 + $0x4f0] sm:$0xff] }
  0xbf   :  { %v2371_v45 = vrot.slane %v1181_v41, %v4237_v14  ;;  %459 = vadd.xlane.f32.xlu1 %v458_v38  ;;  %v165_v38 = vld [vmem:[%s6344_s0 + $0x468] sm:$0xff] }
  0xc0   :  { %v1971_v46 = vrot.slane %v1100_v42, %v4214_v57  ;;  %408 = vadd.xlane.f32.xlu0 %v407_v39  ;;  %v763_v47 = vpop.xlane.xlu1 %762  ;;  %v704_v43 = vsel %vm280_vm0, %v165_v38, 0.0 }
  0xc1   :  { %v727_v48 = vpop.xlane.xlu0 %726  ;;  %v4342_v52 = vsel %vm1715_vm3, %v2371_v45, %v2367_v0  ;;  %v1210_v59 = vmul.f32 0.0625, %v763_v47  ;;  %v791_v0 = vsel %vm280_vm0, %v194_v56, 0.0 }
  0xc2   :  { %v1972_v53 = vsel %vm1708_vm2, %v1971_v46, %v4269_v50  ;;  %v1198_v54 = vmul.f32 0.0625, %v727_v48  ;;  %v842_v50 = vsel %vm280_vm0, %v211_v55, 0.0  ;;  %v212_v48 = vld [vmem:[%s6344_s0 + $0x5e0] sm:$0xff] }
  0xc3   :  { %753 = vadd.xlane.f32.xlu1 %v752_v49  ;;  %v2515_v8 = vrot.slane %v1210_v59, %v4183_v28  ;;  %v195_v49 = vld [vmem:[%s6344_s0 + $0x558] sm:$0xff]  ;;  %v845_v56 = vsel %vm280_vm0, %v212_v48, 0.0  ;;  %v1306_v48 = vld [vmem:[%s6345_s1] sm:$0xff] }
  0xc4   :  { %v2455_v60 = vrot.slane %v1198_v54, %v4295_v7  ;;  %702 = vadd.xlane.f32.xlu0 %v701_v51  ;;  %v817_v61 = vpop.xlane.xlu1 %816  ;;  %v794_v58 = vsel %vm280_vm0, %v195_v49, 0.0 }
  0xc5   :  { %v766_v62 = vpop.xlane.xlu0 %765  ;;  %v1228_v2 = vmul.f32 0.0625, %v817_v61 }
  0xc6   :  { %v2456_v1 = vsel %vm1722_vm4, %v2455_v60, %v4283_v63  ;;  %v1211_v3 = vmul.f32 0.0625, %v766_v62 }
  0xc7   :  { %v2603_v9 = vrot.slane %v1228_v2, %v4214_v57  ;;  %843 = vadd.xlane.f32.xlu1 %v842_v50  ;;  %v55_v50 = vld [vmem:[%s6344_s0 + $0xf8] sm:$0xff] }
  0xc8   :  { %v2519_v10 = vrot.slane %v1211_v3, %v4186_v31  ;;  %792 = vadd.xlane.f32.xlu0 %v791_v0  ;;  %v346_v63 = vpop.xlane.xlu1 %345  ;;  %v38_v0 = vld [vmem:[%s6344_s0 + $0x70] sm:$0xff]  ;;  %v374_v5 = vsel %vm280_vm0, %v55_v50, 0.0 }
  0xc9   :  { %v295_v11 = vpop.xlane.xlu0 %294  ;;  %v2604_v16 = vsel %vm1708_vm2, %v2603_v9, %v4300_v12  ;;  %v1071_v19 = vmul.f32 0.0625, %v346_v63 }
  0xca   :  { %v2520_v18 = vsel %vm1701_vm1, %v2519_v10, %v2515_v8  ;;  %v1054_v21 = vmul.f32 0.0625, %v295_v11  ;;  %v323_v8 = vsel %vm280_vm0, %v38_v0, 0.0 }
  0xcb   :  { %v1828_v24 = vrot.slane %v1071_v19, %v4365_v6  ;;  %372 = vadd.xlane.f32.xlu1 %v371_v13  ;;  %v85_v13 = vld [vmem:[%s6344_s0 + $0x1e8] sm:$0xff] }
  0xcc   :  { %v1721_v25 = vrot.slane %v1054_v21, %v4295_v7  ;;  %321 = vadd.xlane.f32.xlu0 %v320_v15  ;;  %v436_v12 = vpop.xlane.xlu1 %435  ;;  %v68_v15 = vld [vmem:[%s6344_s0 + $0x160] sm:$0xff]  ;;  %v464_v22 = vsel %vm280_vm0, %v85_v13, 0.0 }
  0xcd   :  { %v385_v29 = vpop.xlane.xlu0 %384  ;;  %v1829_v33 = vsel %vm1729_vm5, %v1828_v24, %v4313_v26  ;;  %v1101_v35 = vmul.f32 0.0625, %v436_v12  ;;  %v413_v23 = vsel %vm280_vm0, %v68_v15, 0.0 }
  0xce   :  { %v1723_v34 = vsel %vm1722_vm4, %v1721_v25, %v4316_v27  ;;  %v1084_v36 = vmul.f32 0.0625, %v385_v29  ;;  %v755_v27 = vsel %vm280_vm0, %v182_v37, 0.0 }
  0xcf   :  { %v1976_v39 = vrot.slane %v1101_v35, %v4237_v14  ;;  %462 = vadd.xlane.f32.xlu1 %v461_v30  ;;  %v183_v30 = vld [vmem:[%s6344_s0 + $0x4f8] sm:$0xff] }
  0xd0   :  { %v1892_v41 = vrot.slane %v1084_v36, %v4214_v57  ;;  %411 = vadd.xlane.f32.xlu0 %v410_v32  ;;  %v730_v26 = vpop.xlane.xlu1 %729  ;;  %v166_v32 = vld [vmem:[%s6344_s0 + $0x470] sm:$0xff] }
  0xd1   :  { %v679_v42 = vpop.xlane.xlu0 %678  ;;  %v1977_v44 = vsel %vm1715_vm3, %v1976_v39, %v1972_v53  ;;  %v1199_v46 = vmul.f32 0.0625, %v730_v26  ;;  %v1731_v53 = vadd.s32 4294967248, %v4162_v17  ;;  %v707_v38 = vsel %vm280_vm0, %v166_v32, 0.0  ;;  %v1322_v39 = vld [vmem:[%s6345_s1 + $0x80] sm:$0xff]  ;;  %v167_v32 = vld [vmem:[%s6344_s0 + $0x478] sm:$0xff] }
  0xd2   :  { %v1893_v45 = vsel %vm1708_vm2, %v1892_v41, %v4329_v40  ;;  %v1182_v47 = vmul.f32 0.0625, %v679_v42  ;;  %v1323_v41 = vld [vmem:[%s6345_s1 + $0x88] sm:$0xff] }
  0xd3   :  { %v2460_v51 = vrot.slane %v1199_v46, %v4365_v6  ;;  %756 = vadd.xlane.f32.xlu1 %v755_v27  ;;  %v213_v46 = vld [vmem:[%s6344_s0 + $0x5e8] sm:$0xff]  ;;  %v3625_v49 = vpack.c.bf16 %v1323_v41, %v1322_v39  ;;  %v710_v41 = vsel %vm280_vm0, %v167_v32, 0.0 }
  0xd4   :  { %v2376_v54 = vrot.slane %v1182_v47, %v4295_v7  ;;  %705 = vadd.xlane.f32.xlu0 %v704_v43  ;;  %v820_v55 = vpop.xlane.xlu1 %819  ;;  %v196_v47 = vld [vmem:[%s6344_s0 + $0x560] sm:$0xff] }
  0xd5   :  { %v769_v40 = vpop.xlane.xlu0 %768  ;;  %v4414_v59 = vsel %vm1729_vm5, %v2460_v51, %v2456_v1  ;;  %v1229_v61 = vmul.f32 0.0625, %v820_v55  ;;  %v4429_v1 = vsub.s32 %v1731_v53, %v4170_v20  ;;  %3626 = vmatprep.subr.bf16.mxu0 %v3625_v49 }
  0xd6   :  { %v4418_v60 = vsel %vm1722_vm4, %v2376_v54, %v4342_v52  ;;  %v1212_v62 = vmul.f32 0.0625, %v769_v40 }
  0xd7   :  { %v2608_v2 = vrot.slane %v1229_v61, %v4237_v14  ;;  %846 = vadd.xlane.f32.xlu1 %v845_v56  ;;  %v848_v56 = vsel %vm280_vm0, %v213_v46, 0.0  ;;  %v1324_v61 = vld [vmem:[%s6345_s1 + $0x90] sm:$0xff]  ;;  %v1329_v46 = vld [vmem:[%s6345_s1 + $0xb8] sm:$0xff] }
  0xd8   :  { %v2524_v3 = vrot.slane %v1212_v62, %v4214_v57  ;;  %795 = vadd.xlane.f32.xlu0 %v794_v58  ;;  %v349_v52 = vpop.xlane.xlu1 %348  ;;  %v797_v58 = vsel %vm280_vm0, %v196_v47, 0.0  ;;  %v1325_v62 = vld [vmem:[%s6345_s1 + $0x98] sm:$0xff] }
  0xd9   :  { %v298_v4 = vpop.xlane.xlu0 %297  ;;  %v4434_v9 = vsel %vm1715_vm3, %v2608_v2, %v2604_v16  ;;  %v1072_v63 = vmul.f32 0.0625, %v349_v52  ;;  %v69_v52 = vld [vmem:[%s6344_s0 + $0x168] sm:$0xff] }
  0xda   :  { %v4437_v10 = vsel %vm1708_vm2, %v2524_v3, %v2520_v18  ;;  %v1055_v11 = vmul.f32 0.0625, %v298_v4  ;;  %v39_v4 = vld [vmem:[%s6344_s0 + $0x78] sm:$0xff] }
  0xdb   :  { %v1833_v19 = vrot.slane %v1072_v63, %v4429_v1  ;;  %375 = vadd.xlane.f32.xlu1 %v374_v5 }
  0xdc   :  { %v1728_v21 = vrot.slane %v1055_v11, %v4365_v6  ;;  %324 = vadd.xlane.f32.xlu0 %v323_v8  ;;  %v439_v16 = vpop.xlane.xlu1 %438  ;;  %v1309_v8 = vld [vmem:[%s6345_s1 + $0x18] sm:$0xff] }
  0xdd   :  { %v388_v18 = vpop.xlane.xlu0 %387  ;;  %v4450_v24 = vsel %vm1736_vm6, %v1833_v19, %v1829_v33  ;;  %v1102_v12 = vmul.f32 0.0625, %v439_v16  ;;  %v326_v16 = vsel %vm280_vm0, %v39_v4, 0.0 }
  0xde   :  { %v4453_v25 = vsel %vm1729_vm5, %v1728_v21, %v1723_v34  ;;  %v1085_v29 = vmul.f32 0.0625, %v388_v18  ;;  %v758_v34 = vsel %vm280_vm0, %v183_v30, 0.0  ;;  %v416_v21 = vsel %vm280_vm0, %v69_v52, 0.0  ;;  %v1326_v18 = vld [vmem:[%s6345_s1 + $0xa0] sm:$0xff] }
  0xdf   :  { %v1981_v35 = vrot.slane %v1102_v12, %v4295_v7  ;;  %465 = vadd.xlane.f32.xlu1 %v464_v22  ;;  %v1327_v22 = vld [vmem:[%s6345_s1 + $0xa8] sm:$0xff]  ;;  %v1354_v52 = vld [vmem:[%s6345_s1 + $0x180] sm:$0xff] }
  0xe0   :  { %v1897_v36 = vrot.slane %v1085_v29, %v4237_v14  ;;  %414 = vadd.xlane.f32.xlu0 %v413_v23  ;;  %v733_v33 = vpop.xlane.xlu1 %732 }
  0xe1   :  { %v682_v37 = vpop.xlane.xlu0 %681  ;;  %v4472_v26 = vsel %vm1722_vm4, %v1981_v35, %v1977_v44  ;;  %v1200_v27 = vmul.f32 0.0625, %v733_v33  ;;  %v1738_v44 = vadd.s32 4294967240, %v4162_v17  ;;  %v86_v35 = vld [vmem:[%s6344_s0 + $0x1f0] sm:$0xff] }
  0xe2   :  { %v4475_v42 = vsel %vm1715_vm3, %v1897_v36, %v1893_v45  ;;  %v1183_v43 = vmul.f32 0.0625, %v682_v37  ;;  %v1307_v45 = vld [vmem:[%s6345_s1 + $0x8] sm:$0xff]  ;;  %v3633_v36 = vpack.c.bf16 %v1327_v22, %v1326_v18 }
  0xe3   :  { %v2465_v51 = vrot.slane %v1200_v27, %v4429_v1  ;;  %759 = vadd.xlane.f32.xlu1 %v758_v34  ;;  %v3627_v53 = vpack.c.bf16 %v1307_v45, %v1306_v48  ;;  %v4518_v5 = vsub.s32 %v1738_v44, %v4170_v20  ;;  %v467_v27 = vsel %vm280_vm0, %v86_v35, 0.0  ;;  %v214_v45 = vld [vmem:[%s6344_s0 + $0x5f0] sm:$0xff] }
  0xe4   :  { %v2381_v54 = vrot.slane %v1183_v43, %v4365_v6  ;;  %708 = vadd.xlane.f32.xlu0 %v707_v38  ;;  %v823_v55 = vpop.xlane.xlu1 %822  ;;  %v1328_v43 = vld [vmem:[%s6345_s1 + $0xb0] sm:$0xff] }
  0xe5   :  { %v772_v40 = vpop.xlane.xlu0 %771  ;;  %v4502_v50 = vsel %vm1736_vm6, %v2465_v51, %v4414_v59  ;;  %v1230_v2 = vmul.f32 0.0625, %v823_v55  ;;  %3628 = vmatpush3.bf16.msra.mxu0 %v3627_v53  ;;  %v1308_v59 = vld [vmem:[%s6345_s1 + $0x10] sm:$0xff]  ;;  %v197_v51 = vld [vmem:[%s6344_s0 + $0x568] sm:$0xff] }
  0xe6   :  { %v4506_v0 = vsel %vm1729_vm5, %v2381_v54, %v4418_v60  ;;  %v1213_v3 = vmul.f32 0.0625, %v772_v40  ;;  %v3629_v60 = vpack.c.bf16 %v1325_v62, %v1324_v61  ;;  %v3631_v13 = vpack.c.bf16 %v1309_v8, %v1308_v59 }
  0xe7   :  { %v2613_v63 = vrot.slane %v1230_v2, %v4295_v7  ;;  %849 = vadd.xlane.f32.xlu1 %v848_v56  ;;  %v3637_v54 = vpack.c.bf16 %v1329_v46, %v1328_v43  ;;  %v851_v61 = vsel %vm280_vm0, %v214_v45, 0.0  ;;  %v800_v62 = vsel %vm280_vm0, %v197_v51, 0.0  ;;  %v1330_v2 = vld [vmem:[%s6345_s1 + $0xc0] sm:$0xff]  ;;  %v215_v43 = vld [vmem:[%s6344_s0 + $0x5f8] sm:$0xff]  ;;  %v198_v46 = vld [vmem:[%s6344_s0 + $0x570] sm:$0xff] }
  0xe8   :  { %v2529_v11 = vrot.slane %v1213_v3, %v4237_v14  ;;  %798 = vadd.xlane.f32.xlu0 %v797_v58  ;;  %v352_v15 = vpop.xlane.xlu1 %351  ;;  %3630 = vmatprep.subr.bf16.mxu0 %v3629_v60  ;;  %v1331_v3 = vld [vmem:[%s6345_s1 + $0xc8] sm:$0xff]  ;;  %v1316_v45 = vld [vmem:[%s6345_s1 + $0x50] sm:$0xff]  ;;  %v1317_v51 = vld [vmem:[%s6345_s1 + $0x58] sm:$0xff] }
  0xe9   :  { %v301_v19 = vpop.xlane.xlu0 %300  ;;  %v4535_v23 = vsel %vm1722_vm4, %v2613_v63, %v4434_v9  ;;  %v1073_v29 = vmul.f32 0.0625, %v352_v15  ;;  %3632 = vmatpush3.bf16.msra.mxu0 %v3631_v13  ;;  %v1310_v9 = vld [vmem:[%s6345_s1 + $0x20] sm:$0xff]  ;;  %v87_v63 = vld [vmem:[%s6344_s0 + $0x1f8] sm:$0xff]  ;;  %v1745_v13 = vadd.s32 4294967232, %v4162_v17  ;;  %v3641_v15 = vpack.c.bf16 %v1331_v3, %v1330_v2 }
  0xea   :  { %v4539_v12 = vsel %vm1715_vm3, %v2529_v11, %v4437_v10  ;;  %v1056_v30 = vmul.f32 0.0625, %v301_v19  ;;  %v1311_v10 = vld [vmem:[%s6345_s1 + $0x28] sm:$0xff]  ;;  %3634 = vmatprep.subr.bf16.mxu0 %v3633_v36  ;;  %v70_v11 = vld [vmem:[%s6344_s0 + $0x170] sm:$0xff]  ;;  %v1314_v19 = vld [vmem:[%s6345_s1 + $0x40] sm:$0xff] }
  0xeb   :  { %v1838_v33 = vrot.slane %v1073_v29, %v4518_v5  ;;  %417 = vadd.xlane.f32.xlu1 %v416_v21  ;;  %v3635_v34 = vpack.c.bf16 %v1311_v10, %v1310_v9  ;;  %v1315_v21 = vld [vmem:[%s6345_s1 + $0x48] sm:$0xff]  ;;  %v470_v9 = vsel %vm280_vm0, %v87_v63, 0.0  ;;  %v419_v36 = vsel %vm280_vm0, %v70_v11, 0.0  ;;  %v71_v2 = vld [vmem:[%s6344_s0 + $0x178] sm:$0xff]  ;;  %v1334_v11 = vld [vmem:[%s6345_s1 + $0xe0] sm:$0xff] }
  0xec   :  { %v1735_v37 = vrot.slane %v1056_v30, %v4429_v1  ;;  %327 = vadd.xlane.f32.xlu0 %v326_v16  ;;  %v442_v38 = vpop.xlane.xlu1 %441  ;;  %v1338_v16 = vld [vmem:[%s6345_s1 + $0x100] sm:$0xff]  ;;  %v3643_v29 = vpack.c.bf16 %v1315_v21, %v1314_v19  ;;  %v1339_v30 = vld [vmem:[%s6345_s1 + $0x108] sm:$0xff] }
  0xed   :  { %v391_v39 = vpop.xlane.xlu0 %390  ;;  %v4565_v47 = vsel %vm1743_vm7, %v1838_v33, %v4450_v24  ;;  %v1103_v44 = vmul.f32 0.0625, %v442_v38  ;;  %3636 = vmatpush3.bf16.msra.mxu0 %v3635_v34  ;;  %v1312_v24 = vld [vmem:[%s6345_s1 + $0x30] sm:$0xff]  ;;  %v3659_v10 = vpack.c.bf16 %v1339_v30, %v1338_v16  ;;  %v1318_v21 = vld [vmem:[%s6345_s1 + $0x60] sm:$0xff]  ;;  %v1319_v16 = vld [vmem:[%s6345_s1 + $0x68] sm:$0xff] }
  0xee   :  { %v4569_v48 = vsel %vm1736_vm6, %v1735_v37, %v4453_v25  ;;  %v1086_v49 = vmul.f32 0.0625, %v391_v39  ;;  %v1313_v25 = vld [vmem:[%s6345_s1 + $0x38] sm:$0xff]  ;;  %3638 = vmatprep.subr.bf16.mxu0 %v3637_v54  ;;  %v1332_v33 = vld [vmem:[%s6345_s1 + $0xd0] sm:$0xff] }
  0xef   :  { %v1986_v53 = vrot.slane %v1103_v44, %v4365_v6  ;;  %711 = vadd.xlane.f32.xlu1 %v710_v41  ;;  %v3639_v40 = vpack.c.bf16 %v1313_v25, %v1312_v24  ;;  %v1333_v37 = vld [vmem:[%s6345_s1 + $0xd8] sm:$0xff]  ;;  %v1356_v34 = vld [vmem:[%s6345_s1 + $0x190] sm:$0xff]  ;;  %v4657_v44 = vsub.s32 %v1745_v13, %v4170_v20 }
  0xf0   :  { %v1902_v55 = vrot.slane %v1086_v49, %v4295_v7  ;;  %468 = vadd.xlane.f32.xlu0 %v467_v27  ;;  %v736_v56 = vpop.xlane.xlu1 %735  ;;  %v1340_v24 = vld [vmem:[%s6345_s1 + $0x110] sm:$0xff] }
  0xf1   :  { %v685_v58 = vpop.xlane.xlu0 %684  ;;  %v4598_v4 = vsel %vm1729_vm5, %v1986_v53, %v4472_v26  ;;  %v1201_v60 = vmul.f32 0.0625, %v736_v56  ;;  %3640 = vmatpush3.bf16.msra.mxu0 %v3639_v40  ;;  %v1355_v26 = vld [vmem:[%s6345_s1 + $0x188] sm:$0xff]  ;;  %6359 = vst [vmem:[#allocation9_spill] sm:$0xff] %v4657_v44  ;;  %v3647_v53 = vpack.c.bf16 %v1317_v51, %v1316_v45  ;;  %v1320_v51 = vld [vmem:[%s6345_s1 + $0x70] sm:$0xff] }
  0xf2   :  { %v4602_v59 = vsel %vm1722_vm4, %v1902_v55, %v4475_v42  ;;  %v1184_v8 = vmul.f32 0.0625, %v685_v58  ;;  %v3657_v42 = vpack.c.bf16 %v1355_v26, %v1354_v52  ;;  %3642 = vmatprep.subr.bf16.mxu0 %v3641_v15  ;;  %v1341_v55 = vld [vmem:[%s6345_s1 + $0x118] sm:$0xff]  ;;  %v854_v58 = vsel %vm280_vm0, %v215_v43, 0.0  ;;  %v1335_v26 = vld [vmem:[%s6345_s1 + $0xe8] sm:$0xff] }
  0xf3   :  { %v2470_v18 = vrot.slane %v1201_v60, %v4518_v5  ;;  %852 = vadd.xlane.f32.xlu1 %v851_v61  ;;  %v803_v61 = vsel %vm280_vm0, %v198_v46, 0.0  ;;  %v3663_v3 = vpack.c.bf16 %v1341_v55, %v1340_v24  ;;  %v3649_v13 = vpack.c.bf16 %v1335_v26, %v1334_v11  ;;  %v1337_v43 = vld [vmem:[%s6345_s1 + $0xf8] sm:$0xff]  ;;  %v1362_v11 = vld [vmem:[%s6345_s1 + $0x1c0] sm:$0xff] }
  0xf4   :  { %v2386_v22 = vrot.slane %v1184_v8, %v4429_v1  ;;  %801 = vadd.xlane.f32.xlu0 %v800_v62  ;;  %v826_v32 = vpop.xlane.xlu1 %825  ;;  %3658 = vmatprep.subr.bf16.mxu1 %v3657_v42  ;;  %v199_v62 = vld [vmem:[%s6344_s0 + $0x578] sm:$0xff] }
  0xf5   :  { %v775_v35 = vpop.xlane.xlu0 %774  ;;  %v4641_v38 = vsel %vm1743_vm7, %v2470_v18, %v4502_v50  ;;  %v1231_v41 = vmul.f32 0.0625, %v826_v32  ;;  %3644 = vmatpush3.bf16.msra.mxu0 %v3643_v29  ;;  %v1357_v50 = vld [vmem:[%s6345_s1 + $0x198] sm:$0xff]  ;;  %3660 = vmatpush3.bf16.msra.mxu1 %v3659_v10  ;;  %v1342_v18 = vld [vmem:[%s6345_s1 + $0x120] sm:$0xff]  ;;  %v806_v30 = vsel %vm280_vm0, %v199_v62, 0.0  ;;  %v422_v32 = vsel %vm280_vm0, %v71_v2, 0.0  ;;  %v1343_v10 = vld [vmem:[%s6345_s1 + $0x128] sm:$0xff] }
  0xf6   :  { %v4645_v39 = vsel %vm1736_vm6, %v2386_v22, %v4506_v0  ;;  %v1214_v27 = vmul.f32 0.0625, %v775_v35  ;;  %v3645_v0 = vpack.c.bf16 %v1333_v37, %v1332_v33  ;;  %v3661_v49 = vpack.c.bf16 %v1357_v50, %v1356_v34  ;;  %v105_v35 = vld [vmem:[%s6344_s0 + $0x288] sm:$0xff]  ;;  %v1321_v24 = vld [vmem:[%s6345_s1 + $0x78] sm:$0xff] }
  0xf7   :  { %v2618_v54 = vrot.slane %v1231_v41, %v4365_v6  ;;  %471 = vadd.xlane.f32.xlu1 %v470_v9  ;;  %v104_v9 = vld [vmem:[%s6344_s0 + $0x280] sm:$0xff]  ;;  %v3667_v46 = vpack.c.bf16 %v1343_v10, %v1342_v18  ;;  %v524_v55 = vsel %vm280_vm0, %v105_v35, 0.0  ;;  %v1364_v10 = vld [vmem:[%s6345_s1 + $0x1d0] sm:$0xff] }
  0xf8   :  { %v2534_v25 = vrot.slane %v1214_v27, %v4295_v7  ;;  %420 = vadd.xlane.f32.xlu0 %v419_v36  ;;  %v355_v40 = vpop.xlane.xlu1 %354  ;;  %3646 = vmatprep.subr.bf16.mxu0 %v3645_v0  ;;  %v3651_v36 = vpack.c.bf16 %v1319_v16, %v1318_v21  ;;  %v1336_v27 = vld [vmem:[%s6345_s1 + $0xf0] sm:$0xff] }
  0xf9   :  { %v304_v56 = vpop.xlane.xlu0 %303  ;;  %3662 = vmatprep.subr.bf16.mxu1 %v3661_v49  ;;  %v4683_v52 = vsel %vm1729_vm5, %v2618_v54, %v4535_v23  ;;  %v1074_v8 = vmul.f32 0.0625, %v355_v40  ;;  %3648 = vmatpush3.bf16.msra.mxu0 %v3647_v53  ;;  %v1358_v23 = vld [vmem:[%s6345_s1 + $0x1a0] sm:$0xff]  ;;  %v3653_v50 = vpack.c.bf16 %v1337_v43, %v1336_v27  ;;  %v1344_v54 = vld [vmem:[%s6345_s1 + $0x130] sm:$0xff]  ;;  %v521_v40 = vsel %vm280_vm0, %v104_v9, 0.0 }
  0xfa   :  { %v4687_v60 = vsel %vm1722_vm4, %v2534_v25, %v4539_v12  ;;  %v1057_v63 = vmul.f32 0.0625, %v304_v56  ;;  %3664 = vmatpush3.bf16.msra.mxu1 %v3663_v3  ;;  %v1359_v12 = vld [vmem:[%s6345_s1 + $0x1a8] sm:$0xff]  ;;  %3650 = vmatprep.subr.bf16.mxu0 %v3649_v13 }
  0xfb   :  { %v1843_v15 = vrot.slane %v1074_v8, %v4657_v44  ;;  %855 = vadd.xlane.f32.xlu1 %v854_v58  ;;  %v3665_v19 = vpack.c.bf16 %v1359_v12, %v1358_v23  ;;  %v233_v56 = vld [vmem:[%s6344_s0 + $0x688] sm:$0xff]  ;;  %v3655_v58 = vpack.c.bf16 %v1321_v24, %v1320_v51 }
  0xfc   :  { %v1742_v42 = vrot.slane %v1057_v63, %v4518_v5  ;;  %804 = vadd.xlane.f32.xlu0 %v803_v61  ;;  %v445_v22 = vpop.xlane.xlu1 %444  ;;  %v1345_v61 = vld [vmem:[%s6345_s1 + $0x138] sm:$0xff]  ;;  %v232_v63 = vld [vmem:[%s6344_s0 + $0x680] sm:$0xff]  ;;  %v908_v16 = vsel %vm280_vm0, %v233_v56, 0.0 }
  0xfd   :  { %v394_v29 = vpop.xlane.xlu0 %393  ;;  %v4725_v33 = vsel %vm1750_vm8, %v1843_v15, %v4565_v47  ;;  %v1104_v34 = vmul.f32 0.0625, %v445_v22  ;;  %3666 = vmatprep.subr.bf16.mxu1 %v3665_v19  ;;  %v1360_v47 = vld [vmem:[%s6345_s1 + $0x1b0] sm:$0xff]  ;;  %3652 = vmatpush3.bf16.msra.mxu0 %v3651_v36  ;;  %v3671_v26 = vpack.c.bf16 %v1345_v61, %v1344_v54  ;;  %v1752_v15 = vadd.s32 4294967224, %v4162_v17  ;;  %v89_v22 = vld [vmem:[%s6344_s0 + $0x208] sm:$0xff]  ;;  %v88_v36 = vld [vmem:[%s6344_s0 + $0x200] sm:$0xff] }
  0xfe   :  { %v4729_v37 = vsel %vm1743_vm7, %v1742_v42, %v4569_v48  ;;  %v1087_v41 = vmul.f32 0.0625, %v394_v29  ;;  %v1361_v48 = vld [vmem:[%s6345_s1 + $0x1b8] sm:$0xff]  ;;  %3668 = vmatpush3.bf16.msra.mxu1 %v3667_v46  ;;  %3654 = vmatprep.subr.bf16.mxu0 %v3653_v50  ;;  %v1347_v42 = vld [vmem:[%s6345_s1 + $0x148] sm:$0xff]  ;;  %v905_v18 = vsel %vm280_vm0, %v232_v63, 0.0 }
  0xff   :  { %v1991_v0 = vrot.slane %v1104_v34, %v4429_v1  ;;  %807 = vadd.xlane.f32.xlu1 %v806_v30  ;;  %v3669_v45 = vpack.c.bf16 %v1361_v48, %v1360_v47  ;;  %v4816_v43 = vsub.s32 %v1752_v15, %v4170_v20  ;;  %v1349_v47 = vld [vmem:[%s6345_s1 + $0x158] sm:$0xff]  ;;  %v476_v48 = vsel %vm280_vm0, %v89_v22, 0.0  ;;  %v1351_v61 = vld [vmem:[%s6345_s1 + $0x168] sm:$0xff] }
 0x100   :  { %v1907_v49 = vrot.slane %v1087_v41, %v4365_v6  ;;  %423 = vadd.xlane.f32.xlu0 %v422_v32  ;;  %v739_v25 = vpop.xlane.xlu1 %738  ;;  %v217_v15 = vld [vmem:[%s6344_s0 + $0x608] sm:$0xff] }
 0x101   :  { %v688_v53 = vpop.xlane.xlu0 %687  ;;  %v4764_v62 = vsel %vm1736_vm6, %v1991_v0, %v4598_v4  ;;  %v1202_v3 = vmul.f32 0.0625, %v739_v25  ;;  %3670 = vmatprep.subr.bf16.mxu1 %v3669_v45  ;;  %v1363_v4 = vld [vmem:[%s6345_s1 + $0x1c8] sm:$0xff]  ;;  %3656 = vmatpush3.bf16.msra.mxu0 %v3655_v58  ;;  %6360 = vst [vmem:[#allocation10_spill] sm:$0xff] %v4816_v43  ;;  %v473_v0 = vsel %vm280_vm0, %v88_v36, 0.0 }
 0x102   :  { %v4768_v2 = vsel %vm1729_vm5, %v1907_v49, %v4602_v59  ;;  %v1185_v8 = vmul.f32 0.0625, %v688_v53  ;;  %v3673_v23 = vpack.c.bf16 %v1363_v4, %v1362_v11  ;;  %v1346_v59 = vld [vmem:[%s6345_s1 + $0x140] sm:$0xff]  ;;  %3672 = vmatpush3.bf16.msra.mxu1 %v3671_v26  ;;  %v106_v53 = vld [vmem:[%s6344_s0 + $0x290] sm:$0xff] }
 0x103   :  { %v2475_v13 = vrot.slane %v1202_v3, %v4657_v44  ;;  %525 = vadd.xlane.f32.xlu1 %v524_v55  ;;  %v3675_v29 = vpack.c.bf16 %v1347_v42, %v1346_v59  ;;  %v216_v49 = vld [vmem:[%s6344_s0 + $0x600] sm:$0xff]  ;;  %v527_v11 = vsel %vm280_vm0, %v106_v53, 0.0  ;;  %v234_v4 = vld [vmem:[%s6344_s0 + $0x690] sm:$0xff]  ;;  %v137_v53 = vld [vmem:[%s6344_s0 + $0x388] sm:$0xff] }
 0x104   :  { %v2391_v12 = vrot.slane %v1185_v8, %v4518_v5  ;;  %522 = vadd.xlane.f32.xlu0 %v521_v40  ;;  %v829_v19 = vpop.xlane.xlu1 %828  ;;  %3674 = vmatprep.subr.bf16.mxu1 %v3673_v23  ;;  %v1366_v55 = vld [vmem:[%s6345_s1 + $0x1e0] sm:$0xff]  ;;  %v857_v63 = vsel %vm280_vm0, %v216_v49, 0.0  ;;  %v1368_v42 = vld [vmem:[%s6345_s1 + $0x1f0] sm:$0xff] }
 0x105   :  { %v778_v21 = vpop.xlane.xlu0 %777  ;;  %v4795_v30 = vsel %vm1750_vm8, %v2475_v13, %v4641_v38  ;;  %v1232_v35 = vmul.f32 0.0625, %v829_v19  ;;  %v1365_v38 = vld [vmem:[%s6345_s1 + $0x1d8] sm:$0xff] }
 0x106   :  { %v4799_v32 = vsel %vm1743_vm7, %v2391_v12, %v4645_v39  ;;  %v1215_v9 = vmul.f32 0.0625, %v778_v21  ;;  %v3677_v34 = vpack.c.bf16 %v1365_v38, %v1364_v10  ;;  %v1348_v39 = vld [vmem:[%s6345_s1 + $0x150] sm:$0xff]  ;;  %3676 = vmatpush3.bf16.msra.mxu1 %v3675_v29 }
 0x107   :  { %v2623_v41 = vrot.slane %v1232_v35, %v4429_v1  ;;  %909 = vadd.xlane.f32.xlu1 %v908_v16  ;;  %v3679_v45 = vpack.c.bf16 %v1349_v47, %v1348_v39  ;;  %v911_v35 = vsel %vm280_vm0, %v234_v4, 0.0  ;;  %v218_v4 = vld [vmem:[%s6344_s0 + $0x610] sm:$0xff] }
 0x108   :  { %v2539_v27 = vrot.slane %v1215_v9, %v4365_v6  ;;  %906 = vadd.xlane.f32.xlu0 %v905_v18  ;;  %v358_v46 = vpop.xlane.xlu1 %357  ;;  %3678 = vmatprep.subr.bf16.mxu1 %v3677_v34  ;;  %v1353_v18 = vld [vmem:[%s6345_s1 + $0x178] sm:$0xff]  ;;  %v860_v9 = vsel %vm280_vm0, %v217_v15, 0.0  ;;  %v863_v15 = vsel %vm280_vm0, %v218_v4, 0.0 }
 0x109   :  { %v307_v50 = vpop.xlane.xlu0 %306  ;;  %v4828_v51 = vsel %vm1736_vm6, %v2623_v41, %v4683_v52  ;;  %v1075_v54 = vmul.f32 0.0625, %v358_v46  ;;  %v1367_v52 = vld [vmem:[%s6345_s1 + $0x1e8] sm:$0xff]  ;;  %v107_v41 = vld [vmem:[%s6344_s0 + $0x298] sm:$0xff] }
 0x10a   :  { %v4832_v24 = vsel %vm1729_vm5, %v2539_v27, %v4687_v60  ;;  %v1058_v25 = vmul.f32 0.0625, %v307_v50  ;;  %v3681_v40 = vpack.c.bf16 %v1367_v52, %v1366_v55  ;;  %v1350_v60 = vld [vmem:[%s6345_s1 + $0x160] sm:$0xff]  ;;  %3680 = vmatpush3.bf16.msra.mxu1 %v3679_v45  ;;  %v90_v27 = vld [vmem:[%s6344_s0 + $0x210] sm:$0xff]  ;;  %v219_v4 = vld [vmem:[%s6344_s0 + $0x618] sm:$0xff] }
 0x10b   :  { %v1848_v56 = vrot.slane %v1075_v54, %v4816_v43  ;;  %477 = vadd.xlane.f32.xlu1 %v476_v48  ;;  %v3683_v26 = vpack.c.bf16 %v1351_v61, %v1350_v60  ;;  %v530_v48 = vsel %vm280_vm0, %v107_v41, 0.0  ;;  %v136_v55 = vld [vmem:[%s6344_s0 + $0x380] sm:$0xff] }
 0x10c   :  { %v1749_v58 = vrot.slane %v1058_v25, %v4657_v44  ;;  %474 = vadd.xlane.f32.xlu0 %v473_v0  ;;  %v448_v3 = vpop.xlane.xlu1 %447  ;;  %3682 = vmatprep.subr.bf16.mxu1 %v3681_v40  ;;  %v479_v0 = vsel %vm280_vm0, %v90_v27, 0.0  ;;  %v108_v41 = vld [vmem:[%s6344_s0 + $0x2a0] sm:$0xff]  ;;  %v91_v27 = vld [vmem:[%s6344_s0 + $0x218] sm:$0xff] }
 0x10d   :  { %v397_v8 = vpop.xlane.xlu0 %396  ;;  %v4858_v23 = vsel %vm6351_vm9, %v1848_v56, %v4725_v33  ;;  %v1105_v13 = vmul.f32 0.0625, %v448_v3  ;;  %v1369_v33 = vld [vmem:[%s6345_s1 + $0x1f8] sm:$0xff]  ;;  %v620_v56 = vsel %vm280_vm0, %v137_v53, 0.0  ;;  %v121_v53 = vld [vmem:[%s6344_s0 + $0x308] sm:$0xff] }
 0x10e   :  { %v4862_v59 = vsel %vm1750_vm8, %v1749_v58, %v4729_v37  ;;  %v1088_v12 = vmul.f32 0.0625, %v397_v8  ;;  %v3685_v19 = vpack.c.bf16 %v1369_v33, %v1368_v42  ;;  %v1352_v37 = vld [vmem:[%s6345_s1 + $0x170] sm:$0xff]  ;;  %3684 = vmatpush3.bf16.msra.mxu1 %v3683_v26  ;;  %v617_v58 = vsel %vm280_vm0, %v136_v55, 0.0  ;;  %v120_v55 = vld [vmem:[%s6344_s0 + $0x300] sm:$0xff] }
 0x10f   :  { %v1996_v21 = vrot.slane %v1105_v13, %v4518_v5  ;;  %858 = vadd.xlane.f32.xlu1 %v857_v63  ;;  %v3687_v36 = vpack.c.bf16 %v1353_v18, %v1352_v37 }
 0x110   :  { %v1912_v16 = vrot.slane %v1088_v12, %v4429_v1  ;;  %528 = vadd.xlane.f32.xlu0 %v527_v11  ;;  %v742_v22 = vpop.xlane.xlu1 %741  ;;  %3686 = vmatprep.subr.bf16.mxu1 %v3685_v19  ;;  %v235_v11 = vld [vmem:[%s6344_s0 + $0x698] sm:$0xff] }
 0x111   :  { %v691_v29 = vpop.xlane.xlu0 %690  ;;  %v1997_v10 = vsel %vm1743_vm7, %v1996_v21, %v4764_v62  ;;  %v1203_v34 = vmul.f32 0.0625, %v742_v22  ;;  %v1759_v62 = vadd.s32 4294967216, %v4162_v17  ;;  %v265_v21 = vld [vmem:[%s6344_s0 + $0x788] sm:$0xff] }
 0x112   :  { %v1913_v38 = vsel %vm1736_vm6, %v1912_v16, %v4768_v2  ;;  %v1186_v39 = vmul.f32 0.0625, %v691_v29  ;;  %3688 = vmatpush3.bf16.msra.mxu1 %v3687_v36  ;;  %v264_v16 = vld [vmem:[%s6344_s0 + $0x780] sm:$0xff] }
 0x113   :  { %v2480_v47 = vrot.slane %v1203_v34, %v4816_v43  ;;  %912 = vadd.xlane.f32.xlu1 %v911_v35  ;;  %v1001_v35 = vsel %vm280_vm0, %v264_v16, 0.0  ;;  %v248_v16 = vld [vmem:[%s6344_s0 + $0x700] sm:$0xff] }
 0x114   :  { %v2396_v46 = vrot.slane %v1186_v39, %v4657_v44  ;;  %861 = vadd.xlane.f32.xlu0 %v860_v9  ;;  %v832_v2 = vpop.xlane.xlu1 %831 }
 0x115   :  { %v781_v50 = vpop.xlane.xlu0 %780  ;;  %v2481_v49 = vsel %vm6351_vm9, %v2480_v47, %v4795_v30  ;;  %v1233_v54 = vmul.f32 0.0625, %v832_v2  ;;  %v4911_v30 = vsub.s32 %v1759_v62, %v4170_v20  ;;  %v533_v2 = vsel %vm280_vm0, %v108_v41, 0.0  ;;  %v266_v41 = vld [vmem:[%s6344_s0 + $0x790] sm:$0xff] }
 0x116   :  { %v2397_v45 = vsel %vm1750_vm8, %v2396_v46, %v4799_v32  ;;  %v1216_v25 = vmul.f32 0.0625, %v781_v50  ;;  %v482_v50 = vsel %vm280_vm0, %v91_v27, 0.0  ;;  %v249_v27 = vld [vmem:[%s6344_s0 + $0x708] sm:$0xff] }
 0x117   :  { %v2628_v52 = vrot.slane %v1233_v54, %v4518_v5  ;;  %531 = vadd.xlane.f32.xlu1 %v530_v48 }
 0x118   :  { %v2544_v40 = vrot.slane %v1216_v25, %v4429_v1  ;;  %480 = vadd.xlane.f32.xlu0 %v479_v0  ;;  %v361_v32 = vpop.xlane.xlu1 %360 }
 0x119   :  { %v310_v60 = vpop.xlane.xlu0 %309  ;;  %v2629_v61 = vsel %vm1743_vm7, %v2628_v52, %v4828_v51  ;;  %v1076_v8 = vmul.f32 0.0625, %v361_v32 }
 0x11a   :  { %v2545_v3 = vsel %vm1736_vm6, %v2544_v40, %v4832_v24  ;;  %v1059_v63 = vmul.f32 0.0625, %v310_v60  ;;  %v914_v24 = vsel %vm280_vm0, %v235_v11, 0.0  ;;  %v572_v60 = vsel %vm280_vm0, %v121_v53, 0.0 }
 0x11b   :  { %v1853_v26 = vrot.slane %v1076_v8, %v4911_v30  ;;  %621 = vadd.xlane.f32.xlu1 %v620_v56  ;;  %v569_v56 = vsel %vm280_vm0, %v120_v55, 0.0 }
 0x11c   :  { %v1756_v13 = vrot.slane %v1059_v63, %v4816_v43  ;;  %618 = vadd.xlane.f32.xlu0 %v617_v58  ;;  %v451_v51 = vpop.xlane.xlu1 %450 }
 0x11d   :  { %v400_v12 = vpop.xlane.xlu0 %399  ;;  %v1854_v42 = vsel %vm1764_vm10, %v1853_v26, %v4858_v23  ;;  %v1106_v19 = vmul.f32 0.0625, %v451_v51  ;;  %v138_v26 = vld [vmem:[%s6344_s0 + $0x390] sm:$0xff] }
 0x11e   :  { %v1758_v33 = vsel %vm6351_vm9, %v1756_v13, %v4862_v59  ;;  %v1089_v37 = vmul.f32 0.0625, %v400_v12  ;;  %v1004_v59 = vsel %vm280_vm0, %v265_v21, 0.0 }
 0x11f   :  { %v2001_v18 = vrot.slane %v1106_v19, %v4657_v44  ;;  %915 = vadd.xlane.f32.xlu1 %v914_v24  ;;  %v623_v24 = vsel %vm280_vm0, %v138_v26, 0.0 }
 0x120   :  { %v1917_v22 = vrot.slane %v1089_v37, %v4518_v5  ;;  %864 = vadd.xlane.f32.xlu0 %v863_v15  ;;  %v745_v23 = vpop.xlane.xlu1 %744 }
 0x121   :  { %v694_v29 = vpop.xlane.xlu0 %693  ;;  %v2002_v9 = vsel %vm1750_vm8, %v2001_v18, %v1997_v10  ;;  %v1204_v34 = vmul.f32 0.0625, %v745_v23  ;;  %v1766_v10 = vadd.s32 4294967208, %v4162_v17  ;;  %v236_v18 = vld [vmem:[%s6344_s0 + $0x6a0] sm:$0xff] }
 0x122   :  { %v1918_v36 = vsel %vm1743_vm7, %v1917_v22, %v1913_v38  ;;  %v1187_v39 = vmul.f32 0.0625, %v694_v29 }
 0x123   :  { %v2485_v47 = vrot.slane %v1204_v34, %v4911_v30  ;;  %1005 = vadd.xlane.f32.xlu1 %v1004_v59  ;;  %v917_v59 = vsel %vm280_vm0, %v236_v18, 0.0 }
 0x124   :  { %v2401_v46 = vrot.slane %v1187_v39, %v4816_v43  ;;  %1002 = vadd.xlane.f32.xlu0 %v1001_v35  ;;  %v835_v62 = vpop.xlane.xlu1 %834 }
 0x125   :  { %v784_v38 = vpop.xlane.xlu0 %783  ;;  %v4957_v48 = vsel %vm1764_vm10, %v2485_v47, %v2481_v49  ;;  %v1234_v54 = vmul.f32 0.0625, %v835_v62  ;;  %v4969_v49 = vsub.s32 %v1766_v10, %v4170_v20  ;;  %v1007_v62 = vsel %vm280_vm0, %v266_v41, 0.0 }
 0x126   :  { %v2402_v0 = vsel %vm6351_vm9, %v2401_v46, %v2397_v45  ;;  %v1217_v25 = vmul.f32 0.0625, %v784_v38 }
 0x127   :  { %v2633_v52 = vrot.slane %v1234_v54, %v4657_v44  ;;  %534 = vadd.xlane.f32.xlu1 %v533_v2  ;;  %v92_v54 = vld [vmem:[%s6344_s0 + $0x220] sm:$0xff] }
 0x128   :  { %v2549_v40 = vrot.slane %v1217_v25, %v4518_v5  ;;  %483 = vadd.xlane.f32.xlu0 %v482_v50  ;;  %v364_v45 = vpop.xlane.xlu1 %363  ;;  %v109_v50 = vld [vmem:[%s6344_s0 + $0x2a8] sm:$0xff] }
 0x129   :  { %v313_v32 = vpop.xlane.xlu0 %312  ;;  %v2634_v58 = vsel %vm1750_vm8, %v2633_v52, %v2629_v61  ;;  %v1077_v63 = vmul.f32 0.0625, %v364_v45  ;;  %v536_v52 = vsel %vm280_vm0, %v109_v50, 0.0  ;;  %v140_v50 = vld [vmem:[%s6344_s0 + $0x3a0] sm:$0xff] }
 0x12a   :  { %v2550_v8 = vsel %vm1743_vm7, %v2549_v40, %v2545_v3  ;;  %v1060_v11 = vmul.f32 0.0625, %v313_v32  ;;  %v866_v3 = vsel %vm280_vm0, %v219_v4, 0.0  ;;  %v485_v40 = vsel %vm280_vm0, %v92_v54, 0.0  ;;  %v123_v54 = vld [vmem:[%s6344_s0 + $0x318] sm:$0xff] }
 0x12b   :  { %v1858_v13 = vrot.slane %v1077_v63, %v4969_v49  ;;  %573 = vadd.xlane.f32.xlu1 %v572_v60  ;;  %v122_v63 = vld [vmem:[%s6344_s0 + $0x310] sm:$0xff] }
 0x12c   :  { %v1763_v51 = vrot.slane %v1060_v11, %v4911_v30  ;;  %570 = vadd.xlane.f32.xlu0 %v569_v56  ;;  %v454_v61 = vpop.xlane.xlu1 %453  ;;  %v139_v56 = vld [vmem:[%s6344_s0 + $0x398] sm:$0xff] }
 0x12d   :  { %v403_v12 = vpop.xlane.xlu0 %402  ;;  %v4986_v15 = vsel %vm1771_vm11, %v1858_v13, %v1854_v42  ;;  %v1107_v37 = vmul.f32 0.0625, %v454_v61  ;;  %v575_v13 = vsel %vm280_vm0, %v122_v63, 0.0 }
 0x12e   :  { %v1765_v19 = vsel %vm1764_vm10, %v1763_v51, %v1758_v33  ;;  %v1090_v21 = vmul.f32 0.0625, %v403_v12  ;;  %v953_v33 = vsel %vm280_vm0, %v248_v16, 0.0  ;;  %v237_v12 = vld [vmem:[%s6344_s0 + $0x6a8] sm:$0xff] }
 0x12f   :  { %v2006_v22 = vrot.slane %v1107_v37, %v4816_v43  ;;  %867 = vadd.xlane.f32.xlu1 %v866_v3  ;;  %v220_v3 = vld [vmem:[%s6344_s0 + $0x620] sm:$0xff]  ;;  %v920_v16 = vsel %vm280_vm0, %v237_v12, 0.0  ;;  %v111_v12 = vld [vmem:[%s6344_s0 + $0x2b8] sm:$0xff] }
 0x130   :  { %v1922_v23 = vrot.slane %v1090_v21, %v4657_v44  ;;  %624 = vadd.xlane.f32.xlu0 %v623_v24  ;;  %v4997_v42 = vpop.xlane.xlu1 %747  ;;  %v869_v18 = vsel %vm280_vm0, %v220_v3, 0.0  ;;  %v94_v3 = vld [vmem:[%s6344_s0 + $0x230] sm:$0xff] }
 0x131   :  { %v697_v29 = vpop.xlane.xlu0 %696  ;;  %v2007_v35 = vsel %vm6351_vm9, %v2006_v22, %v2002_v9  ;;  %v956_v9 = vsel %vm280_vm0, %v249_v27, 0.0 }
 0x132   :  { %v1923_v34 = vsel %vm1750_vm8, %v1922_v23, %v1918_v36  ;;  %v1188_v39 = vmul.f32 0.0625, %v697_v29  ;;  %v267_v29 = vld [vmem:[%s6344_s0 + $0x798] sm:$0xff] }
 0x133   :  { %954 = vadd.xlane.f32.xlu1 %v953_v33  ;;  %v250_v33 = vld [vmem:[%s6344_s0 + $0x710] sm:$0xff]  ;;  %v1010_v41 = vsel %vm280_vm0, %v267_v29, 0.0  ;;  %v141_v29 = vld [vmem:[%s6344_s0 + $0x3a8] sm:$0xff] }
 0x134   :  { %v2406_v47 = vrot.slane %v1188_v39, %v4911_v30  ;;  %918 = vadd.xlane.f32.xlu0 %v917_v59  ;;  %v838_v46 = vpop.xlane.xlu1 %837 }
 0x135   :  { %v787_v10 = vpop.xlane.xlu0 %786  ;;  %v1235_v38 = vmul.f32 0.0625, %v838_v46 }
 0x136   :  { %v5013_v36 = vsel %vm1764_vm10, %v2406_v47, %v2402_v0  ;;  %v1218_v2 = vmul.f32 0.0625, %v787_v10  ;;  %v93_v47 = vld [vmem:[%s6344_s0 + $0x228] sm:$0xff] }
 0x137   :  { %v2638_v25 = vrot.slane %v1235_v38, %v4816_v43  ;;  %1008 = vadd.xlane.f32.xlu1 %v1007_v62  ;;  %v488_v38 = vsel %vm280_vm0, %v93_v47, 0.0  ;;  %v222_v47 = vld [vmem:[%s6344_s0 + $0x630] sm:$0xff] }
 0x138   :  { %v2554_v53 = vrot.slane %v1218_v2, %v4657_v44  ;;  %957 = vadd.xlane.f32.xlu0 %v956_v9  ;;  %v5023_v55 = vpop.xlane.xlu1 %366 }
 0x139   :  { %v316_v0 = vpop.xlane.xlu0 %315  ;;  %v5028_v45 = vsel %vm6351_vm9, %v2638_v25, %v2634_v58  ;;  %v626_v58 = vsel %vm280_vm0, %v139_v56, 0.0 }
 0x13a   :  { %v2555_v32 = vsel %vm1750_vm8, %v2554_v53, %v2550_v8  ;;  %v1061_v60 = vmul.f32 0.0625, %v316_v0  ;;  %v629_v0 = vsel %vm280_vm0, %v140_v50, 0.0  ;;  %v875_v50 = vsel %vm280_vm0, %v222_v47, 0.0 }
 0x13b   :  { %537 = vadd.xlane.f32.xlu1 %v536_v52  ;;  %v578_v52 = vsel %vm280_vm0, %v123_v54, 0.0  ;;  %v269_v54 = vld [vmem:[%s6344_s0 + $0x7a8] sm:$0xff]  ;;  %v1078_v47 = vmul.f32 0.0625, %v5023_v55 }
 0x13c   :  { %v1770_v11 = vrot.slane %v1061_v60, %v4969_v49  ;;  %486 = vadd.xlane.f32.xlu0 %v485_v40  ;;  %v457_v4 = vpop.xlane.xlu1 %456  ;;  %v238_v40 = vld [vmem:[%s6344_s0 + $0x6b0] sm:$0xff] }
 0x13d   :  { %v406_v26 = vpop.xlane.xlu0 %405  ;;  %v1108_v51 = vmul.f32 0.0625, %v457_v4  ;;  %v923_v63 = vsel %vm280_vm0, %v238_v40, 0.0  ;;  %v268_v4 = vld [vmem:[%s6344_s0 + $0x7a0] sm:$0xff] }
 0x13e   :  { %v5041_v8 = vsel %vm1771_vm11, %v1770_v11, %v1765_v19  ;;  %v1091_v61 = vmul.f32 0.0625, %v406_v26  ;;  %v251_v26 = vld [vmem:[%s6344_s0 + $0x718] sm:$0xff] }
 0x13f   :  { %v2011_v24 = vrot.slane %v1108_v51, %v4911_v30  ;;  %627 = vadd.xlane.f32.xlu1 %v626_v58  ;;  %v1013_v51 = vsel %vm280_vm0, %v268_v4, 0.0  ;;  %v95_v4 = vld [vmem:[%s6344_s0 + $0x238] sm:$0xff] }
 0x140   :  { %v1927_v37 = vrot.slane %v1091_v61, %v4816_v43  ;;  %576 = vadd.xlane.f32.xlu0 %v575_v13  ;;  %v5051_v21 = vpop.xlane.xlu1 %750  ;;  %v962_v61 = vsel %vm280_vm0, %v251_v26, 0.0  ;;  %v1773_v26 = vadd.s32 4294967200, %v4162_v17 }
 0x141   :  { %v5053_v19 = vpop.xlane.xlu0 %699  ;;  %v5058_v22 = vsel %vm1764_vm10, %v2011_v24, %v2007_v35  ;;  %v959_v35 = vsel %vm280_vm0, %v250_v33, 0.0  ;;  %v124_v33 = vld [vmem:[%s6344_s0 + $0x320] sm:$0xff] }
 0x142   :  { %v5061_v23 = vsel %vm6351_vm9, %v1927_v37, %v1923_v34  ;;  %v110_v34 = vld [vmem:[%s6344_s0 + $0x2b0] sm:$0xff] }
 0x143   :  { %921 = vadd.xlane.f32.xlu1 %v920_v16  ;;  %v539_v9 = vsel %vm280_vm0, %v110_v34, 0.0  ;;  %v542_v16 = vsel %vm280_vm0, %v111_v12, 0.0  ;;  %v239_v34 = vld [vmem:[%s6344_s0 + $0x6b8] sm:$0xff] }
 0x144   :  { %870 = vadd.xlane.f32.xlu0 %v869_v18  ;;  %v5069_v59 = vpop.xlane.xlu1 %840  ;;  %v491_v18 = vsel %vm280_vm0, %v94_v3, 0.0 }
 0x145   :  { %v790_v39 = vpop.xlane.xlu0 %789 }
 0x146   :  { %v1219_v27 = vmul.f32 0.0625, %v790_v39 }
 0x147   :  { %1011 = vadd.xlane.f32.xlu1 %v1010_v41 }
 0x148   :  { %v2559_v46 = vrot.slane %v1219_v27, %v4816_v43  ;;  %960 = vadd.xlane.f32.xlu0 %v959_v35  ;;  %v5080_v10 = vpop.xlane.xlu1 %369  ;;  %v632_v35 = vsel %vm280_vm0, %v141_v29, 0.0  ;;  %v581_v27 = vsel %vm280_vm0, %v124_v33, 0.0  ;;  %v1205_v29 = vmul.f32 0.0625, %v4997_v42 }
 0x149   :  { %v5082_v62 = vpop.xlane.xlu0 %318  ;;  %v1794_v33 = vadd.s32 4294967176, %v4162_v17 }
 0x14a   :  { %v5087_v2 = vsel %vm6351_vm9, %v2559_v46, %v2555_v32  ;;  %v221_v32 = vld [vmem:[%s6344_s0 + $0x628] sm:$0xff]  ;;  %vm2986_vm9 = vcmask 1041409  }
 0x14b   :  { %540 = vadd.xlane.f32.xlu1 %v539_v9  ;;  %v872_v11 = vsel %vm280_vm0, %v221_v32, 0.0  ;;  %v1016_v32 = vsel %vm280_vm0, %v269_v54, 0.0 }
 0x14c   :  { %489 = vadd.xlane.f32.xlu0 %v488_v38  ;;  %v5095_v25 = vpop.xlane.xlu1 %459  ;;  %v926_v38 = vsel %vm280_vm0, %v239_v34, 0.0  ;;  %v5191_v34 = vsub.s32 %v1773_v26, %v4170_v20  ;;  %v240_v26 = vld [vmem:[%s6344_s0 + $0x6c0] sm:$0xff] }
 0x14d   :  { %v5097_v53 = vpop.xlane.xlu0 %408 }
 0x14f   :  { %630 = vadd.xlane.f32.xlu1 %v629_v0  ;;  %v252_v0 = vld [vmem:[%s6344_s0 + $0x720] sm:$0xff] }
 0x150   :  { %579 = vadd.xlane.f32.xlu0 %v578_v52  ;;  %v5107_v60 = vpop.xlane.xlu1 %753 }
 0x151   :  { %v5109_v56 = vpop.xlane.xlu0 %702  ;;  %v1207_v42 = vmul.f32 0.0625, %v5107_v60 }
 0x153   :  { %924 = vadd.xlane.f32.xlu1 %v923_v63  ;;  %v965_v63 = vsel %vm280_vm0, %v252_v0, 0.0 }
 0x154   :  { %873 = vadd.xlane.f32.xlu0 %v872_v11  ;;  %v5119_v58 = vpop.xlane.xlu1 %843  ;;  %v112_v11 = vld [vmem:[%s6344_s0 + $0x2c0] sm:$0xff] }
 0x155   :  { %v5121_v13 = vpop.xlane.xlu0 %792 }
 0x157   :  { %1014 = vadd.xlane.f32.xlu1 %v1013_v51  ;;  %v1780_v51 = vadd.s32 4294967192, %v4162_v17 }
 0x158   :  { %963 = vadd.xlane.f32.xlu0 %v962_v61  ;;  %v373_v24 = vpop.xlane.xlu1 %372  ;;  %v1787_v61 = vadd.s32 4294967184, %v4162_v17  ;;  %v1079_v17 = vmul.f32 0.0625, %v5080_v10  ;;  %v5211_v10 = vsub.s32 %v1794_v33, %v4170_v20 }
 0x159   :  { %v5131_v37 = vpop.xlane.xlu0 %321  ;;  %v1080_v0 = vmul.f32 0.0625, %v373_v24  ;;  %v223_v24 = vld [vmem:[%s6344_s0 + $0x638] sm:$0xff] }
 0x15a   :  { %v5201_v54 = vsub.s32 %v1787_v61, %v4170_v20  ;;  %v270_v61 = vld [vmem:[%s6344_s0 + $0x7b0] sm:$0xff] }
 0x15b   :  { %543 = vadd.xlane.f32.xlu1 %v542_v16  ;;  %v545_v16 = vsel %vm280_vm0, %v112_v11, 0.0 }
 0x15c   :  { %492 = vadd.xlane.f32.xlu0 %v491_v18  ;;  %v5141_v39 = vpop.xlane.xlu1 %462  ;;  %v494_v18 = vsel %vm280_vm0, %v95_v4, 0.0  ;;  %v2490_v4 = vrot.slane %v1205_v29, %v4969_v49  ;;  %v1873_v29 = vrot.slane %v1080_v0, %v5201_v54  ;;  %v1019_v0 = vsel %vm280_vm0, %v270_v61, 0.0 }
 0x15d   :  { %v5143_v41 = vpop.xlane.xlu0 %411 }
 0x15f   :  { %633 = vadd.xlane.f32.xlu1 %v632_v35  ;;  %v142_v35 = vld [vmem:[%s6344_s0 + $0x3b0] sm:$0xff] }
 0x160   :  { %582 = vadd.xlane.f32.xlu0 %v581_v27  ;;  %v757_v46 = vpop.xlane.xlu1 %756  ;;  %v125_v27 = vld [vmem:[%s6344_s0 + $0x328] sm:$0xff]  ;;  %v635_v55 = vsel %vm280_vm0, %v142_v35, 0.0 }
 0x161   :  { %v5153_v9 = vpop.xlane.xlu0 %705 }
 0x163   :  { %927 = vadd.xlane.f32.xlu1 %v926_v38  ;;  %v1206_v38 = vmul.f32 0.0625, %v5051_v21  ;;  %v584_v21 = vsel %vm280_vm0, %v125_v27, 0.0 }
 0x164   :  { %876 = vadd.xlane.f32.xlu0 %v875_v50  ;;  %v5163_v52 = vpop.xlane.xlu1 %846  ;;  %v5196_v50 = vsub.s32 %v1780_v51, %v4170_v20 }
 0x165   :  { %v5165_v40 = vpop.xlane.xlu0 %795  ;;  %v2495_v51 = vrot.slane %v1206_v38, %v5191_v34  ;;  %v878_v38 = vsel %vm280_vm0, %v223_v24, 0.0 }
 0x167   :  { %1017 = vadd.xlane.f32.xlu1 %v1016_v32  ;;  %v1208_v32 = vmul.f32 0.0625, %v757_v46  ;;  %v1863_v46 = vrot.slane %v1078_v47, %v5191_v34  ;;  %v929_v47 = vsel %vm280_vm0, %v240_v26, 0.0 }
 0x168   :  { %966 = vadd.xlane.f32.xlu0 %v965_v63  ;;  %v376_v12 = vpop.xlane.xlu1 %375 }
 0x169   :  { %v5178_v3 = vpop.xlane.xlu0 %324  ;;  %v1081_v60 = vmul.f32 0.0625, %v376_v12  ;;  %v1868_v12 = vrot.slane %v1079_v17, %v5196_v50  ;;  %v2505_v33 = vrot.slane %v1208_v32, %v5201_v54  ;;  %v113_v17 = vld [vmem:[%s6344_s0 + $0x2c8] sm:$0xff]  ;;  %v96_v32 = vld [vmem:[%s6344_s0 + $0x240] sm:$0xff]  ;;  %v1864_v26 = vsel %vm1778_vm12, %v1863_v46, %v4986_v15 }
 0x16a   :  { %v548_v46 = vsel %vm280_vm0, %v113_v17, 0.0 }
 0x16b   :  { %546 = vadd.xlane.f32.xlu1 %v545_v16  ;;  %v2500_v16 = vrot.slane %v1207_v42, %v5196_v50  ;;  %v2491_v42 = vsel %vm1771_vm11, %v2490_v4, %v4957_v48  ;;  %v143_v48 = vld [vmem:[%s6344_s0 + $0x3b8] sm:$0xff]  ;;  %v126_v4 = vld [vmem:[%s6344_s0 + $0x330] sm:$0xff]  ;;  %v1869_v61 = vsel %vm1785_vm13, %v1868_v12, %v1864_v26  ;;  %v497_v12 = vsel %vm280_vm0, %v96_v32, 0.0 }
 0x16c   :  { %495 = vadd.xlane.f32.xlu0 %v494_v18  ;;  %v5203_v63 = vpop.xlane.xlu1 %465  ;;  %v253_v18 = vld [vmem:[%s6344_s0 + $0x728] sm:$0xff]  ;;  %v2496_v24 = vsel %vm1778_vm12, %v2495_v51, %v2491_v42  ;;  %v638_v26 = vsel %vm280_vm0, %v143_v48, 0.0  ;;  %v1062_v32 = vmul.f32 0.0625, %v5082_v62 }
 0x16d   :  { %v5205_v11 = vpop.xlane.xlu0 %414  ;;  %v968_v20 = vsel %vm280_vm0, %v253_v18, 0.0  ;;  %v2501_v15 = vsel %vm1785_vm13, %v2500_v16, %v2496_v24  ;;  %v241_v51 = vld [vmem:[%s6344_s0 + $0x6c8] sm:$0xff]  ;;  %v1189_v18 = vmul.f32 0.0625, %v5053_v19  ;;  %v224_v16 = vld [vmem:[%s6344_s0 + $0x640] sm:$0xff]  ;;  %v1190_v24 = vmul.f32 0.0625, %v5109_v56 }
 0x16e   :  { %v97_v48 = vld [vmem:[%s6344_s0 + $0x248] sm:$0xff]  ;;  %v5296_v62 = vsel %vm280_vm0, %v224_v16, 0.0 }
 0x16f   :  { %636 = vadd.xlane.f32.xlu1 %v635_v55  ;;  %v1878_v55 = vrot.slane %v1081_v60, %v5211_v10 }
 0x170   :  { %585 = vadd.xlane.f32.xlu0 %v584_v21  ;;  %v760_v35 = vpop.xlane.xlu1 %759 }
 0x171   :  { %v709_v27 = vpop.xlane.xlu0 %708  ;;  %v1209_v21 = vmul.f32 0.0625, %v760_v35 }
 0x173   :  { %v2510_v60 = vrot.slane %v1209_v21, %v5211_v10  ;;  %930 = vadd.xlane.f32.xlu1 %v929_v47  ;;  %v1874_v21 = vsel %vm1792_vm14, %v1873_v29, %v1869_v61  ;;  %v2506_v47 = vsel %vm1792_vm14, %v2505_v33, %v2501_v15  ;;  %v587_v29 = vsel %vm280_vm0, %v126_v4, 0.0  ;;  %v254_v33 = vld [vmem:[%s6344_s0 + $0x730] sm:$0xff] }
 0x174   :  { %879 = vadd.xlane.f32.xlu0 %v878_v38  ;;  %v5261_v35 = vpop.xlane.xlu1 %849  ;;  %v271_v38 = vld [vmem:[%s6344_s0 + $0x7b8] sm:$0xff]  ;;  %v1879_v19 = vsel %vm1799_vm15, %v1878_v55, %v1874_v21  ;;  %v5285_v15 = vsel %vm280_vm0, %v241_v51, 0.0  ;;  %v114_v55 = vld [vmem:[%s6344_s0 + $0x2d0] sm:$0xff]  ;;  %v1063_v4 = vmul.f32 0.0625, %v5131_v37  ;;  %v2411_v51 = vrot.slane %v1189_v18, %v4969_v49 }
 0x175   :  { %v5263_v42 = vpop.xlane.xlu0 %798  ;;  %v2511_v17 = vsel %vm1799_vm15, %v2510_v60, %v2506_v47  ;;  %v1191_v60 = vmul.f32 0.0625, %v5153_v9  ;;  %v5299_v56 = vsel %vm280_vm0, %v271_v38, 0.0  ;;  %v1064_v21 = vmul.f32 0.0625, %v5178_v3  ;;  %v144_v9 = vld [vmem:[%s6344_s0 + $0x3c0] sm:$0xff] }
 0x176   :  { %v2988_v61 = vsel %vm2986_vm9, %v2511_v17, %v1879_v19  ;;  %v1192_v47 = vmul.f32 0.0625, %v709_v27  ;;  %v5306_v37 = vsel %vm280_vm0, %v254_v33, 0.0  ;;  %v1236_v18 = vmul.f32 0.0625, %v5069_v59 }
 0x177   :  { %1020 = vadd.xlane.f32.xlu1 %v1019_v0  ;;  %3067 = vmatprep.mubr.f32.mxu0 %v2988_v61  ;;  %v127_v0 = vld [vmem:[%s6344_s0 + $0x338] sm:$0xff]  ;;  %v5316_v3 = vsel %vm280_vm0, %v114_v55, 0.0  ;;  %v1777_v27 = vrot.slane %v1062_v32, %v5191_v34  ;;  %v1109_v38 = vmul.f32 0.0625, %v5095_v25  ;;  %v1092_v33 = vmul.f32 0.0625, %v5097_v53 }
 0x178   :  { %969 = vadd.xlane.f32.xlu0 %v968_v20  ;;  %v5303_v19 = vpop.xlane.xlu1 %417  ;;  %v5319_v20 = vsel %vm280_vm0, %v97_v48, 0.0  ;;  %v2416_v61 = vrot.slane %v1190_v24, %v5191_v34  ;;  %v1784_v43 = vrot.slane %v1063_v4, %v5196_v50  ;;  %v2421_v44 = vrot.slane %v1191_v60, %v5196_v50 }
 0x179   :  { %v328_v17 = vpop.xlane.xlu0 %327  ;;  %v5328_v59 = vsel %vm280_vm0, %v144_v9, 0.0  ;;  %v5331_v55 = vsel %vm280_vm0, %v127_v0, 0.0  ;;  %v2412_v32 = vsel %vm1771_vm11, %v2411_v51, %v5013_v36  ;;  %v1237_v25 = vmul.f32 0.0625, %v5119_v58 }
 0x17a   :  { %v1065_v16 = vmul.f32 0.0625, %v328_v17  ;;  %v1791_v53 = vrot.slane %v1064_v21, %v5201_v54  ;;  %v2426_v24 = vrot.slane %v1192_v47, %v5201_v54  ;;  %v1220_v60 = vmul.f32 0.0625, %v5121_v13 }
 0x17b   :  { %549 = vadd.xlane.f32.xlu1 %v548_v46  ;;  %v2643_v46 = vrot.slane %v1236_v18, %v4911_v30  ;;  %v1779_v0 = vsel %vm1778_vm12, %v1777_v27, %v5041_v8  ;;  %v2016_v36 = vrot.slane %v1109_v38, %v4969_v49  ;;  %v1932_v58 = vrot.slane %v1092_v33, %v4911_v30 }
 0x17c   :  { %498 = vadd.xlane.f32.xlu0 %v497_v12  ;;  %v712_v48 = vpop.xlane.xlu1 %711  ;;  %v1798_v17 = vrot.slane %v1065_v16, %v5211_v10  ;;  %v2417_v51 = vsel %vm1778_vm12, %v2416_v61, %v2412_v32  ;;  %v1786_v12 = vsel %vm1785_vm13, %v1784_v43, %v1779_v0  ;;  %v1110_v21 = vmul.f32 0.0625, %v5141_v39 }
 0x17d   :  { %v469_v4 = vpop.xlane.xlu0 %468  ;;  %v1193_v9 = vmul.f32 0.0625, %v712_v48  ;;  %v2422_v47 = vsel %vm1785_vm13, %v2421_v44, %v2417_v51  ;;  %v2648_v18 = vrot.slane %v1237_v25, %v4969_v49  ;;  %v1093_v16 = vmul.f32 0.0625, %v5143_v41 }
 0x17e   :  { %v1793_v38 = vsel %vm1792_vm14, %v1791_v53, %v1786_v12  ;;  %v2427_v33 = vsel %vm1792_vm14, %v2426_v24, %v2422_v47  ;;  %v2564_v43 = vrot.slane %v1220_v60, %v4911_v30  ;;  %v1238_v39 = vmul.f32 0.0625, %v5163_v52 }
 0x17f   :  { %v2431_v13 = vrot.slane %v1193_v9, %v5211_v10  ;;  %639 = vadd.xlane.f32.xlu1 %v638_v26  ;;  %v1800_v44 = vsel %vm1799_vm15, %v1798_v17, %v1793_v38  ;;  %v2644_v26 = vsel %vm1764_vm10, %v2643_v46, %v5028_v45  ;;  %v1221_v41 = vmul.f32 0.0625, %v5165_v40 }
 0x180   :  { %588 = vadd.xlane.f32.xlu0 %v587_v29  ;;  %v853_v8 = vpop.xlane.xlu1 %852  ;;  %v1094_v29 = vmul.f32 0.0625, %v5205_v11  ;;  %v2017_v25 = vsel %vm1771_vm11, %v2016_v36, %v5058_v22  ;;  %v2021_v53 = vrot.slane %v1110_v21, %v5191_v34  ;;  %v1111_v52 = vmul.f32 0.0625, %v5203_v63 }
 0x181   :  { %v802_v27 = vpop.xlane.xlu0 %801  ;;  %v2432_v61 = vsel %vm1799_vm15, %v2431_v13, %v2427_v33  ;;  %v1239_v24 = vmul.f32 0.0625, %v5261_v35  ;;  %v1933_v45 = vsel %vm1764_vm10, %v1932_v58, %v5061_v23  ;;  %v1937_v40 = vrot.slane %v1093_v16, %v4969_v49 }
 0x182   :  { %v2987_v32 = vsel %vm2986_vm9, %v2432_v61, %v1800_v44  ;;  %v1112_v11 = vmul.f32 0.0625, %v469_v4  ;;  %v1240_v48 = vmul.f32 0.0625, %v853_v8  ;;  %v2649_v60 = vsel %vm1771_vm11, %v2648_v18, %v2644_v26 }
 0x183   :  { %933 = vadd.xlane.f32.xlu1 %v5285_v15  ;;  %3068 = vmatmul.mubr.f32.vlgmr.msra.gmra.mrb[0].mxu0 %v2987_v32  ;;  %v2565_v63 = vsel %vm1764_vm10, %v2564_v43, %v5087_v2  ;;  %v2653_v35 = vrot.slane %v1238_v39, %v5191_v34  ;;  %v2569_v17 = vrot.slane %v1221_v41, %v4969_v49  ;;  %v1222_v9 = vmul.f32 0.0625, %v5263_v42 }
 0x184   :  { %882 = vadd.xlane.f32.xlu0 %v5296_v62  ;;  %v472_v46 = vpop.xlane.xlu1 %471  ;;  %v1942_v23 = vrot.slane %v1094_v29, %v5191_v34  ;;  %v1095_v4 = vmul.f32 0.0625, %v5303_v19  ;;  %v2022_v62 = vsel %vm1778_vm12, %v2021_v53, %v2017_v25  ;;  %v2026_v0 = vrot.slane %v1111_v52, %v5196_v50 }
 0x185   :  { %v421_v22 = vpop.xlane.xlu0 %420  ;;  %v1113_v15 = vmul.f32 0.0625, %v472_v46  ;;  %v2658_v36 = vrot.slane %v1239_v24, %v5196_v50  ;;  %v1223_v58 = vmul.f32 0.0625, %v802_v27  ;;  %v1938_v2 = vsel %vm1771_vm11, %v1937_v40, %v1933_v45  ;;  %v242_v24 = vld [vmem:[%s6344_s0 + $0x6d0] sm:$0xff] }
 0x186   :  { %v2031_v51 = vrot.slane %v1112_v11, %v5201_v54  ;;  %v2663_v12 = vrot.slane %v1240_v48, %v5201_v54  ;;  %v1096_v21 = vmul.f32 0.0625, %v421_v22  ;;  %v2654_v47 = vsel %vm1778_vm12, %v2653_v35, %v2649_v60 }
 0x187   :  { %1023 = vadd.xlane.f32.xlu1 %v5299_v56  ;;  %v2036_v13 = vrot.slane %v1113_v15, %v5211_v10  ;;  %v2570_v8 = vsel %vm1771_vm11, %v2569_v17, %v2565_v63  ;;  %v1943_v56 = vsel %vm1778_vm12, %v1942_v23, %v1938_v2  ;;  %v2574_v27 = vrot.slane %v1222_v9, %v5191_v34 }
 0x188   :  { %972 = vadd.xlane.f32.xlu0 %v5306_v37  ;;  %v856_v42 = vpop.xlane.xlu1 %855  ;;  %v1947_v38 = vrot.slane %v1095_v4, %v5196_v50  ;;  %v2579_v33 = vrot.slane %v1223_v58, %v5196_v50  ;;  %v2027_v43 = vsel %vm1785_vm13, %v2026_v0, %v2022_v62  ;;  %v2659_v39 = vsel %vm1785_vm13, %v2658_v36, %v2654_v47  ;;  %v255_v36 = vld [vmem:[%s6344_s0 + $0x738] sm:$0xff] }
 0x189   :  { %v805_v19 = vpop.xlane.xlu0 %804  ;;  %v1241_v18 = vmul.f32 0.0625, %v856_v42  ;;  %v1952_v44 = vrot.slane %v1096_v21, %v5201_v54  ;;  %v2032_v29 = vsel %vm1792_vm14, %v2031_v51, %v2027_v43  ;;  %v2664_v32 = vsel %vm1792_vm14, %v2663_v12, %v2659_v39 }
 0x18a   :  { %v1224_v16 = vmul.f32 0.0625, %v805_v19  ;;  %v2575_v45 = vsel %vm1778_vm12, %v2574_v27, %v2570_v8  ;;  %v1948_v40 = vsel %vm1785_vm13, %v1947_v38, %v1943_v56  ;;  %v935_v35 = vsel %vm280_vm0, %v242_v24, 0.0 }
 0x18b   :  { %v2668_v37 = vrot.slane %v1241_v18, %v5211_v10  ;;  %552 = vadd.xlane.f32.xlu1 %v5316_v3  ;;  %v2037_v3 = vsel %vm1799_vm15, %v2036_v13, %v2032_v29  ;;  %v2580_v48 = vsel %vm1785_vm13, %v2579_v33, %v2575_v45  ;;  %v1953_v17 = vsel %vm1792_vm14, %v1952_v44, %v1948_v40  ;;  %v115_v18 = vld [vmem:[%s6344_s0 + $0x2d8] sm:$0xff]  ;;  %v226_v45 = vld [vmem:[%s6344_s0 + $0x650] sm:$0xff] }
 0x18c   :  { %v2584_v61 = vrot.slane %v1224_v16, %v5201_v54  ;;  %501 = vadd.xlane.f32.xlu0 %v5319_v20  ;;  %v808_v26 = vpop.xlane.xlu1 %807  ;;  %v225_v20 = vld [vmem:[%s6344_s0 + $0x648] sm:$0xff]  ;;  %v974_v13 = vsel %vm280_vm0, %v255_v36, 0.0  ;;  %v98_v16 = vld [vmem:[%s6344_s0 + $0x250] sm:$0xff]  ;;  %v554_v33 = vsel %vm280_vm0, %v115_v18, 0.0 }
 0x18d   :  { %v424_v41 = vpop.xlane.xlu0 %423  ;;  %v1225_v25 = vmul.f32 0.0625, %v808_v26  ;;  %v2669_v52 = vsel %vm1799_vm15, %v2668_v37, %v2664_v32  ;;  %v884_v15 = vsel %vm280_vm0, %v225_v20, 0.0  ;;  %v503_v44 = vsel %vm280_vm0, %v98_v16, 0.0  ;;  %v128_v26 = vld [vmem:[%s6344_s0 + $0x340] sm:$0xff]  ;;  %v243_v20 = vld [vmem:[%s6344_s0 + $0x6d8] sm:$0xff] }
 0x18e   :  { %v1097_v53 = vmul.f32 0.0625, %v424_v41  ;;  %v2990_v11 = vsel %vm2986_vm9, %v2669_v52, %v2037_v3  ;;  %v2585_v23 = vsel %vm1792_vm14, %v2584_v61, %v2580_v48  ;;  %v145_v61 = vld [vmem:[%s6344_s0 + $0x3c8] sm:$0xff]  ;;  %v593_v24 = vsel %vm280_vm0, %v128_v26, 0.0 }
 0x18f   :  { %v2589_v46 = vrot.slane %v1225_v25, %v5211_v10  ;;  %642 = vadd.xlane.f32.xlu1 %v5328_v59  ;;  %3137 = vmatprep.mubr.f32.mxu1 %v2990_v11  ;;  %v272_v59 = vld [vmem:[%s6344_s0 + $0x7c0] sm:$0xff] }
 0x190   :  { %v1957_v22 = vrot.slane %v1097_v53, %v5211_v10  ;;  %591 = vadd.xlane.f32.xlu0 %v5331_v55  ;;  %v526_v60 = vpop.xlane.xlu1 %525  ;;  %v1025_v21 = vsel %vm280_vm0, %v272_v59, 0.0  ;;  %v644_v53 = vsel %vm280_vm0, %v145_v61, 0.0 }
 0x191   :  { %v523_v63 = vpop.xlane.xlu0 %522  ;;  %v1131_v9 = vmul.f32 0.0625, %v526_v60  ;;  %v2590_v0 = vsel %vm1799_vm15, %v2589_v46, %v2585_v23  ;;  %v256_v23 = vld [vmem:[%s6344_s0 + $0x740] sm:$0xff] }
 0x192   :  { %v1130_v4 = vmul.f32 0.0625, %v523_v63  ;;  %v1958_v62 = vsel %vm1799_vm15, %v1957_v22, %v1953_v17  ;;  %v938_v22 = vsel %vm280_vm0, %v243_v20, 0.0  ;;  %v273_v17 = vld [vmem:[%s6344_s0 + $0x7c8] sm:$0xff]  ;;  %v977_v36 = vsel %vm280_vm0, %v256_v23, 0.0 }
 0x193   :  { %v2989_v55 = vsel %vm2986_vm9, %v2590_v0, %v1958_v62  ;;  %v2124_v58 = vrot.slane %v1131_v9, %v4186_v31  ;;  %936 = vadd.xlane.f32.xlu1 %v935_v35 }
 0x194   :  { %v2120_v2 = vrot.slane %v1130_v4, %v4183_v28  ;;  %3138 = vmatmul.mubr.f32.vlgmr.msra.gmra.mrb[0].mxu1 %v2989_v55  ;;  %885 = vadd.xlane.f32.xlu0 %v884_v15  ;;  %v910_v51 = vpop.xlane.xlu1 %909  ;;  %v887_v15 = vsel %vm280_vm0, %v226_v45, 0.0  ;;  %v1028_v55 = vsel %vm280_vm0, %v273_v17, 0.0 }
 0x195   :  { %v907_v12 = vpop.xlane.xlu0 %906  ;;  %v1259_v19 = vmul.f32 0.0625, %v910_v51 }
 0x196   :  { %v2125_v42 = vsel %vm1701_vm1, %v2124_v58, %v2120_v2  ;;  %v1258_v47 = vmul.f32 0.0625, %v907_v12 }
 0x197   :  { %v2756_v8 = vrot.slane %v1259_v19, %v4186_v31  ;;  %1026 = vadd.xlane.f32.xlu1 %v1025_v21  ;;  %v116_v21 = vld [vmem:[%s6344_s0 + $0x2e0] sm:$0xff] }
 0x198   :  { %v2752_v56 = vrot.slane %v1258_v47, %v4183_v28  ;;  %975 = vadd.xlane.f32.xlu0 %v974_v13  ;;  %v478_v27 = vpop.xlane.xlu1 %477  ;;  %v557_v16 = vsel %vm280_vm0, %v116_v21, 0.0 }
 0x199   :  { %v475_v38 = vpop.xlane.xlu0 %474  ;;  %v1115_v43 = vmul.f32 0.0625, %v478_v27 }
 0x19a   :  { %v2757_v37 = vsel %vm1701_vm1, %v2756_v8, %v2752_v56  ;;  %v1114_v39 = vmul.f32 0.0625, %v475_v38 }
 0x19b   :  { %v2045_v41 = vrot.slane %v1115_v43, %v4186_v31  ;;  %555 = vadd.xlane.f32.xlu1 %v554_v33  ;;  %v129_v43 = vld [vmem:[%s6344_s0 + $0x348] sm:$0xff] }
 0x19c   :  { %v2041_v29 = vrot.slane %v1114_v39, %v4183_v28  ;;  %504 = vadd.xlane.f32.xlu0 %v503_v44  ;;  %v859_v32 = vpop.xlane.xlu1 %858 }
 0x19d   :  { %v529_v25 = vpop.xlane.xlu0 %528  ;;  %v1242_v40 = vmul.f32 0.0625, %v859_v32 }
 0x19e   :  { %v2046_v3 = vsel %vm1701_vm1, %v2045_v41, %v2041_v29  ;;  %v1132_v52 = vmul.f32 0.0625, %v529_v25 }
 0x19f   :  { %645 = vadd.xlane.f32.xlu1 %v644_v53  ;;  %v2673_v9 = vrot.slane %v1242_v40, %v4183_v28  ;;  %v596_v53 = vsel %vm280_vm0, %v129_v43, 0.0 }
 0x1a0   :  { %v2129_v11 = vrot.slane %v1132_v52, %v4214_v57  ;;  %594 = vadd.xlane.f32.xlu0 %v593_v24  ;;  %v913_v48 = vpop.xlane.xlu1 %912  ;;  %v227_v52 = vld [vmem:[%s6344_s0 + $0x658] sm:$0xff] }
 0x1a1   :  { %v862_v46 = vpop.xlane.xlu0 %861  ;;  %v1260_v63 = vmul.f32 0.0625, %v913_v48  ;;  %v890_v48 = vsel %vm280_vm0, %v227_v52, 0.0 }
 0x1a2   :  { %v2130_v60 = vsel %vm1708_vm2, %v2129_v11, %v2125_v42  ;;  %v1243_v35 = vmul.f32 0.0625, %v862_v46  ;;  %v99_v42 = vld [vmem:[%s6344_s0 + $0x258] sm:$0xff] }
 0x1a3   :  { %v2761_v4 = vrot.slane %v1260_v63, %v4214_v57  ;;  %939 = vadd.xlane.f32.xlu1 %v938_v22  ;;  %v506_v8 = vsel %vm280_vm0, %v99_v42, 0.0 }
 0x1a4   :  { %v2677_v62 = vrot.slane %v1243_v35, %v4186_v31  ;;  %888 = vadd.xlane.f32.xlu0 %v887_v15  ;;  %v532_v0 = vpop.xlane.xlu1 %531  ;;  %v274_v35 = vld [vmem:[%s6344_s0 + $0x7d0] sm:$0xff]  ;;  %v257_v15 = vld [vmem:[%s6344_s0 + $0x748] sm:$0xff] }
 0x1a5   :  { %v481_v59 = vpop.xlane.xlu0 %480  ;;  %v2762_v58 = vsel %vm1708_vm2, %v2761_v4, %v2757_v37  ;;  %v1133_v51 = vmul.f32 0.0625, %v532_v0  ;;  %v146_v37 = vld [vmem:[%s6344_s0 + $0x3d0] sm:$0xff] }
 0x1a6   :  { %v2678_v2 = vsel %vm1701_vm1, %v2677_v62, %v2673_v9  ;;  %v1116_v12 = vmul.f32 0.0625, %v481_v59  ;;  %v647_v41 = vsel %vm280_vm0, %v146_v37, 0.0  ;;  %v1031_v62 = vsel %vm280_vm0, %v274_v35, 0.0 }
 0x1a7   :  { %v2134_v19 = vrot.slane %v1133_v51, %v4237_v14  ;;  %1029 = vadd.xlane.f32.xlu1 %v1028_v55 }
 0x1a8   :  { %v2050_v47 = vrot.slane %v1116_v12, %v4214_v57  ;;  %978 = vadd.xlane.f32.xlu0 %v977_v36  ;;  %v622_v13 = vpop.xlane.xlu1 %621  ;;  %v980_v36 = vsel %vm280_vm0, %v257_v15, 0.0 }
 0x1a9   :  { %v619_v18 = vpop.xlane.xlu0 %618  ;;  %v2135_v56 = vsel %vm1715_vm3, %v2134_v19, %v2130_v60  ;;  %v1163_v38 = vmul.f32 0.0625, %v622_v13 }
 0x1aa   :  { %v2051_v27 = vsel %vm1708_vm2, %v2050_v47, %v2046_v3  ;;  %v1162_v33 = vmul.f32 0.0625, %v619_v18  ;;  %v244_v3 = vld [vmem:[%s6344_s0 + $0x6e0] sm:$0xff] }
 0x1ab   :  { %v2282_v39 = vrot.slane %v1163_v38, %v4186_v31  ;;  %558 = vadd.xlane.f32.xlu1 %v557_v16  ;;  %v941_v11 = vsel %vm280_vm0, %v244_v3, 0.0  ;;  %v147_v38 = vld [vmem:[%s6344_s0 + $0x3d8] sm:$0xff] }
 0x1ac   :  { %v2278_v44 = vrot.slane %v1162_v33, %v4183_v28  ;;  %507 = vadd.xlane.f32.xlu0 %v506_v8  ;;  %v916_v61 = vpop.xlane.xlu1 %915  ;;  %v130_v33 = vld [vmem:[%s6344_s0 + $0x350] sm:$0xff] }
 0x1ad   :  { %v865_v26 = vpop.xlane.xlu0 %864  ;;  %v1261_v32 = vmul.f32 0.0625, %v916_v61 }
 0x1ae   :  { %v5506_v29 = vsel %vm1701_vm1, %v2282_v39, %v2278_v44  ;;  %v1244_v25 = vmul.f32 0.0625, %v865_v26 }
 0x1af   :  { %v2766_v24 = vrot.slane %v1261_v32, %v4237_v14  ;;  %648 = vadd.xlane.f32.xlu1 %v647_v41  ;;  %v599_v41 = vsel %vm280_vm0, %v130_v33, 0.0  ;;  %v245_v32 = vld [vmem:[%s6344_s0 + $0x6e8] sm:$0xff] }
 0x1b0   :  { %v2682_v20 = vrot.slane %v1244_v25, %v4214_v57  ;;  %597 = vadd.xlane.f32.xlu0 %v596_v53  ;;  %v1006_v45 = vpop.xlane.xlu1 %1005  ;;  %v228_v25 = vld [vmem:[%s6344_s0 + $0x660] sm:$0xff] }
 0x1b1   :  { %v1003_v40 = vpop.xlane.xlu0 %1002  ;;  %v5520_v46 = vsel %vm1715_vm3, %v2766_v24, %v2762_v58  ;;  %v1291_v60 = vmul.f32 0.0625, %v1006_v45  ;;  %v117_v58 = vld [vmem:[%s6344_s0 + $0x2e8] sm:$0xff] }
 0x1b2   :  { %v2683_v22 = vsel %vm1708_vm2, %v2682_v20, %v2678_v2  ;;  %v1290_v63 = vmul.f32 0.0625, %v1003_v40  ;;  %v100_v2 = vld [vmem:[%s6344_s0 + $0x260] sm:$0xff]  ;;  %v560_v19 = vsel %vm280_vm0, %v117_v58, 0.0  ;;  %v944_v20 = vsel %vm280_vm0, %v245_v32, 0.0 }
 0x1b3   :  { %v2914_v17 = vrot.slane %v1291_v60, %v4186_v31  ;;  %942 = vadd.xlane.f32.xlu1 %v941_v11  ;;  %v509_v47 = vsel %vm280_vm0, %v100_v2, 0.0  ;;  %v275_v60 = vld [vmem:[%s6344_s0 + $0x7d8] sm:$0xff] }
 0x1b4   :  { %v2910_v23 = vrot.slane %v1290_v63, %v4183_v28  ;;  %891 = vadd.xlane.f32.xlu0 %v890_v48  ;;  %v535_v9 = vpop.xlane.xlu1 %534  ;;  %v893_v48 = vsel %vm280_vm0, %v228_v25, 0.0  ;;  %v258_v63 = vld [vmem:[%s6344_s0 + $0x750] sm:$0xff] }
 0x1b5   :  { %v484_v4 = vpop.xlane.xlu0 %483  ;;  %v1134_v59 = vmul.f32 0.0625, %v535_v9 }
 0x1b6   :  { %v5533_v0 = vsel %vm1701_vm1, %v2914_v17, %v2910_v23  ;;  %v1117_v55 = vmul.f32 0.0625, %v484_v4 }
 0x1b7   :  { %v2139_v51 = vrot.slane %v1134_v59, %v4295_v7  ;;  %1032 = vadd.xlane.f32.xlu1 %v1031_v62  ;;  %v983_v62 = vsel %vm280_vm0, %v258_v63, 0.0  ;;  %v118_v59 = vld [vmem:[%s6344_s0 + $0x2f0] sm:$0xff] }
 0x1b8   :  { %v2055_v12 = vrot.slane %v1117_v55, %v4237_v14  ;;  %981 = vadd.xlane.f32.xlu0 %v980_v36  ;;  %v574_v21 = vpop.xlane.xlu1 %573  ;;  %v101_v55 = vld [vmem:[%s6344_s0 + $0x268] sm:$0xff] }
 0x1b9   :  { %v571_v42 = vpop.xlane.xlu0 %570  ;;  %v5547_v13 = vsel %vm1722_vm4, %v2139_v51, %v2135_v56  ;;  %v1147_v16 = vmul.f32 0.0625, %v574_v21  ;;  %v512_v21 = vsel %vm280_vm0, %v101_v55, 0.0 }
 0x1ba   :  { %v5550_v18 = vsel %vm1715_vm3, %v2055_v12, %v2051_v27  ;;  %v1146_v8 = vmul.f32 0.0625, %v571_v42  ;;  %v650_v27 = vsel %vm280_vm0, %v147_v38, 0.0  ;;  %v563_v12 = vsel %vm280_vm0, %v118_v59, 0.0 }
 0x1bb   :  { %v2203_v37 = vrot.slane %v1147_v16, %v4186_v31  ;;  %561 = vadd.xlane.f32.xlu1 %v560_v19 }
 0x1bc   :  { %v2199_v43 = vrot.slane %v1146_v8, %v4183_v28  ;;  %510 = vadd.xlane.f32.xlu0 %v509_v47  ;;  %v868_v56 = vpop.xlane.xlu1 %867 }
 0x1bd   :  { %v625_v39 = vpop.xlane.xlu0 %624  ;;  %v1245_v61 = vmul.f32 0.0625, %v868_v56 }
 0x1be   :  { %v5562_v44 = vsel %vm1701_vm1, %v2203_v37, %v2199_v43  ;;  %v1164_v26 = vmul.f32 0.0625, %v625_v39 }
 0x1bf   :  { %v2687_v53 = vrot.slane %v1245_v61, %v4237_v14  ;;  %651 = vadd.xlane.f32.xlu1 %v650_v27  ;;  %v246_v61 = vld [vmem:[%s6344_s0 + $0x6f0] sm:$0xff] }
 0x1c0   :  { %v2287_v3 = vrot.slane %v1164_v26, %v4214_v57  ;;  %600 = vadd.xlane.f32.xlu0 %v599_v41  ;;  %v955_v52 = vpop.xlane.xlu1 %954  ;;  %v229_v26 = vld [vmem:[%s6344_s0 + $0x668] sm:$0xff]  ;;  %v947_v25 = vsel %vm280_vm0, %v246_v61, 0.0 }
 0x1c1   :  { %v919_v24 = vpop.xlane.xlu0 %918  ;;  %v5575_v45 = vsel %vm1715_vm3, %v2687_v53, %v2683_v22  ;;  %v1274_v35 = vmul.f32 0.0625, %v955_v52  ;;  %v896_v52 = vsel %vm280_vm0, %v229_v26, 0.0 }
 0x1c2   :  { %v2288_v40 = vsel %vm1708_vm2, %v2287_v3, %v5506_v29  ;;  %v1262_v11 = vmul.f32 0.0625, %v919_v24  ;;  %v1034_v29 = vsel %vm280_vm0, %v275_v60, 0.0  ;;  %v276_v24 = vld [vmem:[%s6344_s0 + $0x7e0] sm:$0xff] }
 0x1c3   :  { %945 = vadd.xlane.f32.xlu1 %v944_v20  ;;  %v2831_v36 = vrot.slane %v1274_v35, %v4183_v28  ;;  %v148_v28 = vld [vmem:[%s6344_s0 + $0x3e0] sm:$0xff]  ;;  %v259_v20 = vld [vmem:[%s6344_s0 + $0x758] sm:$0xff]  ;;  %v1037_v63 = vsel %vm280_vm0, %v276_v24, 0.0 }
 0x1c4   :  { %v2771_v15 = vrot.slane %v1262_v11, %v4295_v7  ;;  %894 = vadd.xlane.f32.xlu0 %v893_v48  ;;  %v1009_v22 = vpop.xlane.xlu1 %1008  ;;  %v653_v37 = vsel %vm280_vm0, %v148_v28, 0.0  ;;  %v986_v35 = vsel %vm280_vm0, %v259_v20, 0.0  ;;  %v1386_v20 = vld [vmem:[%s6345_s1 + $0x280] sm:$0xff] }
 0x1c5   :  { %v958_v17 = vpop.xlane.xlu0 %957  ;;  %v1292_v9 = vmul.f32 0.0625, %v1009_v22 }
 0x1c6   :  { %v2772_v23 = vsel %vm1722_vm4, %v2771_v15, %v5520_v46  ;;  %v1275_v4 = vmul.f32 0.0625, %v958_v17 }
 0x1c7   :  { %v2919_v58 = vrot.slane %v1292_v9, %v4214_v57  ;;  %1035 = vadd.xlane.f32.xlu1 %v1034_v29  ;;  %v119_v9 = vld [vmem:[%s6344_s0 + $0x2f8] sm:$0xff] }
 0x1c8   :  { %v2835_v2 = vrot.slane %v1275_v4, %v4186_v31  ;;  %984 = vadd.xlane.f32.xlu0 %v983_v62  ;;  %v538_v46 = vpop.xlane.xlu1 %537  ;;  %v131_v31 = vld [vmem:[%s6344_s0 + $0x358] sm:$0xff]  ;;  %v102_v4 = vld [vmem:[%s6344_s0 + $0x270] sm:$0xff] }
 0x1c9   :  { %v487_v51 = vpop.xlane.xlu0 %486  ;;  %v2920_v42 = vsel %vm1708_vm2, %v2919_v58, %v5533_v0  ;;  %v1135_v47 = vmul.f32 0.0625, %v538_v46  ;;  %v602_v27 = vsel %vm280_vm0, %v131_v31, 0.0  ;;  %v515_v58 = vsel %vm280_vm0, %v102_v4, 0.0 }
 0x1ca   :  { %v2836_v19 = vsel %vm1701_vm1, %v2835_v2, %v2831_v36  ;;  %v1118_v16 = vmul.f32 0.0625, %v487_v51  ;;  %v566_v36 = vsel %vm280_vm0, %v119_v9, 0.0 }
 0x1cb   :  { %v2144_v8 = vrot.slane %v1135_v47, %v4365_v6  ;;  %564 = vadd.xlane.f32.xlu1 %v563_v12  ;;  %v132_v47 = vld [vmem:[%s6344_s0 + $0x360] sm:$0xff] }
 0x1cc   :  { %v2060_v38 = vrot.slane %v1118_v16, %v4295_v7  ;;  %513 = vadd.xlane.f32.xlu0 %v512_v21  ;;  %v628_v33 = vpop.xlane.xlu1 %627  ;;  %v149_v21 = vld [vmem:[%s6344_s0 + $0x3e8] sm:$0xff] }
 0x1cd   :  { %v577_v0 = vpop.xlane.xlu0 %576  ;;  %v2145_v43 = vsel %vm1729_vm5, %v2144_v8, %v5547_v13  ;;  %v1165_v39 = vmul.f32 0.0625, %v628_v33  ;;  %v656_v8 = vsel %vm280_vm0, %v149_v21, 0.0 }
 0x1ce   :  { %v2061_v56 = vsel %vm1722_vm4, %v2060_v38, %v5550_v18  ;;  %v605_v38 = vsel %vm280_vm0, %v132_v47, 0.0 }
 0x1cf   :  { %v2292_v41 = vrot.slane %v1165_v39, %v4237_v14  ;;  %654 = vadd.xlane.f32.xlu1 %v653_v37 }
 0x1d0   :  { %603 = vadd.xlane.f32.xlu0 %v602_v27  ;;  %v922_v32 = vpop.xlane.xlu1 %921  ;;  %v247_v27 = vld [vmem:[%s6344_s0 + $0x6f8] sm:$0xff] }
 0x1d1   :  { %v871_v13 = vpop.xlane.xlu0 %870  ;;  %v2293_v18 = vsel %vm1715_vm3, %v2292_v41, %v2288_v40  ;;  %v1263_v53 = vmul.f32 0.0625, %v922_v32  ;;  %v950_v32 = vsel %vm280_vm0, %v247_v27, 0.0  ;;  %v150_v27 = vld [vmem:[%s6344_s0 + $0x3f0] sm:$0xff] }
 0x1d2   :  { %v1246_v3 = vmul.f32 0.0625, %v871_v13 }
 0x1d3   :  { %v2776_v11 = vrot.slane %v1263_v53, %v4365_v6  ;;  %948 = vadd.xlane.f32.xlu1 %v947_v25  ;;  %v277_v25 = vld [vmem:[%s6344_s0 + $0x7e8] sm:$0xff] }
 0x1d4   :  { %v2692_v48 = vrot.slane %v1246_v3, %v4295_v7  ;;  %897 = vadd.xlane.f32.xlu0 %v896_v52  ;;  %v1012_v60 = vpop.xlane.xlu1 %1011  ;;  %v1040_v9 = vsel %vm280_vm0, %v277_v25, 0.0 }
 0x1d5   :  { %v961_v40 = vpop.xlane.xlu0 %960  ;;  %v5640_v15 = vsel %vm1729_vm5, %v2776_v11, %v2772_v23  ;;  %v1293_v17 = vmul.f32 0.0625, %v1012_v60  ;;  %v1148_v23 = vmul.f32 0.0625, %v577_v0  ;;  %v1387_v11 = vld [vmem:[%s6345_s1 + $0x288] sm:$0xff] }
 0x1d6   :  { %v5644_v22 = vsel %vm1722_vm4, %v2692_v48, %v5575_v45  ;;  %v1276_v29 = vmul.f32 0.0625, %v961_v40  ;;  %v3689_v48 = vpack.c.bf16 %v1387_v11, %v1386_v20  ;;  %v1371_v60 = vld [vmem:[%s6345_s1 + $0x208] sm:$0xff] }
 0x1d7   :  { %v2924_v62 = vrot.slane %v1293_v17, %v4237_v14  ;;  %1038 = vadd.xlane.f32.xlu1 %v1037_v63 }
 0x1d8   :  { %v2840_v59 = vrot.slane %v1276_v29, %v4214_v57  ;;  %987 = vadd.xlane.f32.xlu0 %v986_v35  ;;  %v541_v55 = vpop.xlane.xlu1 %540  ;;  %3690 = vmatprep.subr.bf16.mxu0 %v3689_v48 }
 0x1d9   :  { %v490_v45 = vpop.xlane.xlu0 %489  ;;  %v5657_v2 = vsel %vm1715_vm3, %v2924_v62, %v2920_v42  ;;  %v1136_v51 = vmul.f32 0.0625, %v541_v55  ;;  %v2208_v42 = vrot.slane %v1148_v23, %v4214_v57  ;;  %v230_v57 = vld [vmem:[%s6344_s0 + $0x670] sm:$0xff]  ;;  %v133_v62 = vld [vmem:[%s6344_s0 + $0x368] sm:$0xff] }
 0x1da   :  { %v5660_v46 = vsel %vm1708_vm2, %v2840_v59, %v2836_v19  ;;  %v1119_v12 = vmul.f32 0.0625, %v490_v45  ;;  %v899_v13 = vsel %vm280_vm0, %v230_v57, 0.0  ;;  %v1390_v57 = vld [vmem:[%s6345_s1 + $0x2a0] sm:$0xff] }
 0x1db   :  { %v2149_v16 = vrot.slane %v1136_v51, %v4429_v1  ;;  %567 = vadd.xlane.f32.xlu1 %v566_v36  ;;  %v103_v36 = vld [vmem:[%s6344_s0 + $0x278] sm:$0xff] }
 0x1dc   :  { %v2065_v28 = vrot.slane %v1119_v12, %v4365_v6  ;;  %516 = vadd.xlane.f32.xlu0 %v515_v58  ;;  %v631_v19 = vpop.xlane.xlu1 %630  ;;  %v1388_v58 = vld [vmem:[%s6345_s1 + $0x290] sm:$0xff]  ;;  %v1373_v12 = vld [vmem:[%s6345_s1 + $0x218] sm:$0xff] }
 0x1dd   :  { %v580_v31 = vpop.xlane.xlu0 %579  ;;  %v5674_v33 = vsel %vm1736_vm6, %v2149_v16, %v2145_v43  ;;  %v1166_v37 = vmul.f32 0.0625, %v631_v19  ;;  %v2209_v43 = vsel %vm1708_vm2, %v2208_v42, %v5562_v44  ;;  %v260_v44 = vld [vmem:[%s6344_s0 + $0x760] sm:$0xff]  ;;  %v608_v19 = vsel %vm280_vm0, %v133_v62, 0.0 }
 0x1de   :  { %v5677_v0 = vsel %vm1729_vm5, %v2065_v28, %v2061_v56  ;;  %v1149_v39 = vmul.f32 0.0625, %v580_v31  ;;  %v989_v4 = vsel %vm280_vm0, %v260_v44, 0.0  ;;  %v518_v31 = vsel %vm280_vm0, %v103_v36, 0.0  ;;  %v134_v36 = vld [vmem:[%s6344_s0 + $0x370] sm:$0xff] }
 0x1df   :  { %v2297_v61 = vrot.slane %v1166_v37, %v4295_v7  ;;  %657 = vadd.xlane.f32.xlu1 %v656_v8  ;;  %v231_v8 = vld [vmem:[%s6344_s0 + $0x678] sm:$0xff] }
 0x1e0   :  { %v2213_v26 = vrot.slane %v1149_v39, %v4237_v14  ;;  %606 = vadd.xlane.f32.xlu0 %v605_v38  ;;  %v925_v56 = vpop.xlane.xlu1 %924  ;;  %v902_v25 = vsel %vm280_vm0, %v231_v8, 0.0 }
 0x1e1   :  { %v874_v41 = vpop.xlane.xlu0 %873  ;;  %v5695_v53 = vsel %vm1722_vm4, %v2297_v61, %v2293_v18  ;;  %v1264_v52 = vmul.f32 0.0625, %v925_v56  ;;  %v1370_v18 = vld [vmem:[%s6345_s1 + $0x200] sm:$0xff] }
 0x1e2   :  { %v5698_v3 = vsel %vm1715_vm3, %v2213_v26, %v2209_v43  ;;  %v1247_v24 = vmul.f32 0.0625, %v874_v41  ;;  %v3691_v35 = vpack.c.bf16 %v1371_v60, %v1370_v18  ;;  %v1375_v26 = vld [vmem:[%s6345_s1 + $0x228] sm:$0xff]  ;;  %v1392_v60 = vld [vmem:[%s6345_s1 + $0x2b0] sm:$0xff] }
 0x1e3   :  { %v2781_v40 = vrot.slane %v1264_v52, %v4429_v1  ;;  %951 = vadd.xlane.f32.xlu1 %v950_v32  ;;  %v659_v52 = vsel %vm280_vm0, %v150_v27, 0.0  ;;  %v261_v18 = vld [vmem:[%s6344_s0 + $0x768] sm:$0xff] }
 0x1e4   :  { %v2697_v63 = vrot.slane %v1247_v24, %v4365_v6  ;;  %900 = vadd.xlane.f32.xlu0 %v899_v13  ;;  %v1015_v17 = vpop.xlane.xlu1 %1014  ;;  %3692 = vmatpush3.bf16.msra.mxu0 %v3691_v35  ;;  %v278_v24 = vld [vmem:[%s6344_s0 + $0x7f0] sm:$0xff] }
 0x1e5   :  { %v964_v29 = vpop.xlane.xlu0 %963  ;;  %v5724_v59 = vsel %vm1736_vm6, %v2781_v40, %v5640_v15  ;;  %v1294_v55 = vmul.f32 0.0625, %v1015_v17  ;;  %v1389_v15 = vld [vmem:[%s6345_s1 + $0x298] sm:$0xff]  ;;  %v1043_v62 = vsel %vm280_vm0, %v278_v24, 0.0 }
 0x1e6   :  { %v5728_v23 = vsel %vm1729_vm5, %v2697_v63, %v5644_v22  ;;  %v1277_v45 = vmul.f32 0.0625, %v964_v29  ;;  %v3693_v51 = vpack.c.bf16 %v1389_v15, %v1388_v58  ;;  %v1372_v22 = vld [vmem:[%s6345_s1 + $0x210] sm:$0xff]  ;;  %v1377_v63 = vld [vmem:[%s6345_s1 + $0x238] sm:$0xff] }
 0x1e7   :  { %v2929_v21 = vrot.slane %v1294_v55, %v4295_v7  ;;  %1041 = vadd.xlane.f32.xlu1 %v1040_v9  ;;  %v3695_v16 = vpack.c.bf16 %v1373_v12, %v1372_v22  ;;  %v992_v55 = vsel %vm280_vm0, %v261_v18, 0.0  ;;  %v1394_v12 = vld [vmem:[%s6345_s1 + $0x2c0] sm:$0xff] }
 0x1e8   :  { %v2845_v47 = vrot.slane %v1277_v45, %v4237_v14  ;;  %990 = vadd.xlane.f32.xlu0 %v989_v4  ;;  %v544_v28 = vpop.xlane.xlu1 %543  ;;  %3694 = vmatprep.subr.bf16.mxu0 %v3693_v51  ;;  %v151_v45 = vld [vmem:[%s6344_s0 + $0x3f8] sm:$0xff] }
 0x1e9   :  { %v493_v42 = vpop.xlane.xlu0 %492  ;;  %v5754_v38 = vsel %vm1722_vm4, %v2929_v21, %v5657_v2  ;;  %v1137_v37 = vmul.f32 0.0625, %v544_v28  ;;  %3696 = vmatpush3.bf16.msra.mxu0 %v3695_v16  ;;  %v1391_v2 = vld [vmem:[%s6345_s1 + $0x2a8] sm:$0xff]  ;;  %v1378_v16 = vld [vmem:[%s6345_s1 + $0x240] sm:$0xff] }
 0x1ea   :  { %v5758_v14 = vsel %vm1715_vm3, %v2845_v47, %v5660_v46  ;;  %v1120_v39 = vmul.f32 0.0625, %v493_v42  ;;  %v3697_v61 = vpack.c.bf16 %v1391_v2, %v1390_v57  ;;  %v1374_v46 = vld [vmem:[%s6345_s1 + $0x220] sm:$0xff]  ;;  %v1395_v21 = vld [vmem:[%s6345_s1 + $0x2c8] sm:$0xff]  ;;  %v662_v2 = vsel %vm280_vm0, %v151_v45, 0.0 }
 0x1eb   :  { %v2154_v43 = vrot.slane %v1137_v37, %v4518_v5  ;;  %609 = vadd.xlane.f32.xlu1 %v608_v19  ;;  %v3699_v41 = vpack.c.bf16 %v1375_v26, %v1374_v46  ;;  %v3705_v47 = vpack.c.bf16 %v1395_v21, %v1394_v12  ;;  %v1379_v28 = vld [vmem:[%s6345_s1 + $0x248] sm:$0xff]  ;;  %v1402_v37 = vld [vmem:[%s6345_s1 + $0x300] sm:$0xff]  ;;  %v279_v46 = vld [vmem:[%s6344_s0 + $0x7f8] sm:$0xff] }
 0x1ec   :  { %v2070_v56 = vrot.slane %v1120_v39, %v4429_v1  ;;  %519 = vadd.xlane.f32.xlu0 %v518_v31  ;;  %v634_v32 = vpop.xlane.xlu1 %633  ;;  %3698 = vmatprep.subr.bf16.mxu0 %v3697_v61  ;;  %v3707_v8 = vpack.c.bf16 %v1379_v28, %v1378_v16  ;;  %v1403_v39 = vld [vmem:[%s6345_s1 + $0x308] sm:$0xff]  ;;  %v611_v61 = vsel %vm280_vm0, %v134_v36, 0.0  ;;  %v262_v26 = vld [vmem:[%s6344_s0 + $0x770] sm:$0xff] }
 0x1ed   :  { %v583_v13 = vpop.xlane.xlu0 %582  ;;  %v5784_v44 = vsel %vm1743_vm7, %v2154_v43, %v5674_v33  ;;  %v1167_v11 = vmul.f32 0.0625, %v634_v32  ;;  %3700 = vmatpush3.bf16.msra.mxu0 %v3699_v41  ;;  %v1393_v33 = vld [vmem:[%s6345_s1 + $0x2b8] sm:$0xff]  ;;  %v3723_v43 = vpack.c.bf16 %v1403_v39, %v1402_v37  ;;  %v1399_v12 = vld [vmem:[%s6345_s1 + $0x2e8] sm:$0xff] }
 0x1ee   :  { %v5788_v20 = vsel %vm1736_vm6, %v2070_v56, %v5677_v0  ;;  %v1150_v48 = vmul.f32 0.0625, %v583_v13  ;;  %v3701_v40 = vpack.c.bf16 %v1393_v33, %v1392_v60  ;;  %v1376_v0 = vld [vmem:[%s6345_s1 + $0x230] sm:$0xff] }
 0x1ef   :  { %v2302_v35 = vrot.slane %v1167_v11, %v4365_v6  ;;  %903 = vadd.xlane.f32.xlu1 %v902_v25  ;;  %v3703_v29 = vpack.c.bf16 %v1377_v63, %v1376_v0  ;;  %v1396_v25 = vld [vmem:[%s6345_s1 + $0x2d0] sm:$0xff]  ;;  %v1405_v63 = vld [vmem:[%s6345_s1 + $0x318] sm:$0xff] }
 0x1f0   :  { %v2218_v17 = vrot.slane %v1150_v48, %v4295_v7  ;;  %660 = vadd.xlane.f32.xlu0 %v659_v52  ;;  %v928_v9 = vpop.xlane.xlu1 %927  ;;  %3702 = vmatprep.subr.bf16.mxu0 %v3701_v40  ;;  %v1397_v52 = vld [vmem:[%s6345_s1 + $0x2d8] sm:$0xff]  ;;  %v1380_v11 = vld [vmem:[%s6345_s1 + $0x250] sm:$0xff] }
 0x1f1   :  { %v877_v4 = vpop.xlane.xlu0 %876  ;;  %v5817_v58 = vsel %vm1729_vm5, %v2302_v35, %v5695_v53  ;;  %v1265_v51 = vmul.f32 0.0625, %v928_v9  ;;  %3704 = vmatpush3.bf16.msra.mxu0 %v3703_v29  ;;  %v1418_v53 = vld [vmem:[%s6345_s1 + $0x380] sm:$0xff]  ;;  %v3709_v24 = vpack.c.bf16 %v1397_v52, %v1396_v25  ;;  %v1381_v48 = vld [vmem:[%s6345_s1 + $0x258] sm:$0xff]  ;;  %v1404_v0 = vld [vmem:[%s6345_s1 + $0x310] sm:$0xff]  ;;  %v1046_v29 = vsel %vm280_vm0, %v279_v46, 0.0 }
 0x1f2   :  { %v5821_v15 = vsel %vm1722_vm4, %v2218_v17, %v5698_v3  ;;  %v1248_v22 = vmul.f32 0.0625, %v877_v4  ;;  %v1419_v3 = vld [vmem:[%s6345_s1 + $0x388] sm:$0xff]  ;;  %3706 = vmatprep.subr.bf16.mxu0 %v3705_v47  ;;  %v3711_v40 = vpack.c.bf16 %v1381_v48, %v1380_v11  ;;  %v995_v9 = vsel %vm280_vm0, %v262_v26, 0.0  ;;  %v135_v4 = vld [vmem:[%s6344_s0 + $0x378] sm:$0xff]  ;;  %v1384_v52 = vld [vmem:[%s6345_s1 + $0x270] sm:$0xff] }
 0x1f3   :  { %v2786_v42 = vrot.slane %v1265_v51, %v4518_v5  ;;  %1044 = vadd.xlane.f32.xlu1 %v1043_v62  ;;  %v3721_v31 = vpack.c.bf16 %v1419_v3, %v1418_v53  ;;  %v3727_v62 = vpack.c.bf16 %v1405_v63, %v1404_v0  ;;  %v1382_v53 = vld [vmem:[%s6345_s1 + $0x260] sm:$0xff]  ;;  %v1383_v47 = vld [vmem:[%s6345_s1 + $0x268] sm:$0xff] }
 0x1f4   :  { %v2702_v19 = vrot.slane %v1248_v22, %v4429_v1  ;;  %993 = vadd.xlane.f32.xlu0 %v992_v55  ;;  %v1018_v27 = vpop.xlane.xlu1 %1017  ;;  %v1398_v22 = vld [vmem:[%s6345_s1 + $0x2e0] sm:$0xff]  ;;  %v6361_v3 = vld [vmem:[#allocation9_spill] sm:$0xff] }
 0x1f5   :  { %v967_v57 = vpop.xlane.xlu0 %966  ;;  %v5859_v56 = vsel %vm1743_vm7, %v2786_v42, %v5724_v59  ;;  %v1295_v32 = vmul.f32 0.0625, %v1018_v27  ;;  %3722 = vmatprep.subr.bf16.mxu1 %v3721_v31  ;;  %3708 = vmatpush3.bf16.msra.mxu0 %v3707_v8  ;;  %v1420_v59 = vld [vmem:[%s6345_s1 + $0x390] sm:$0xff]  ;;  %v3713_v21 = vpack.c.bf16 %v1399_v12, %v1398_v22  ;;  %v1406_v31 = vld [vmem:[%s6345_s1 + $0x320] sm:$0xff]  ;;  %v1407_v8 = vld [vmem:[%s6345_s1 + $0x328] sm:$0xff] }
 0x1f6   :  { %v5863_v41 = vsel %vm1736_vm6, %v2702_v19, %v5728_v23  ;;  %v1278_v13 = vmul.f32 0.0625, %v967_v57  ;;  %3724 = vmatpush3.bf16.msra.mxu1 %v3723_v43  ;;  %v1421_v23 = vld [vmem:[%s6345_s1 + $0x398] sm:$0xff]  ;;  %3710 = vmatprep.subr.bf16.mxu0 %v3709_v24  ;;  %v3715_v19 = vpack.c.bf16 %v1383_v47, %v1382_v53  ;;  %v614_v57 = vsel %vm280_vm0, %v135_v4, 0.0  ;;  %v1428_v53 = vld [vmem:[%s6345_s1 + $0x3d0] sm:$0xff] }
 0x1f7   :  { %v2934_v18 = vrot.slane %v1295_v32, %v4365_v6  ;;  %663 = vadd.xlane.f32.xlu1 %v662_v2  ;;  %v3725_v33 = vpack.c.bf16 %v1421_v23, %v1420_v59  ;;  %v3731_v2 = vpack.c.bf16 %v1407_v8, %v1406_v31  ;;  %v1400_v32 = vld [vmem:[%s6345_s1 + $0x2f0] sm:$0xff]  ;;  %v1385_v59 = vld [vmem:[%s6345_s1 + $0x278] sm:$0xff] }
 0x1f8   :  { %v2850_v60 = vrot.slane %v1278_v13, %v4295_v7  ;;  %612 = vadd.xlane.f32.xlu0 %v611_v61  ;;  %v547_v35 = vpop.xlane.xlu1 %546  ;;  %v263_v7 = vld [vmem:[%s6344_s0 + $0x778] sm:$0xff]  ;;  %v3719_v48 = vpack.c.bf16 %v1385_v59, %v1384_v52 }
 0x1f9   :  { %v496_v17 = vpop.xlane.xlu0 %495  ;;  %v5901_v55 = vsel %vm1729_vm5, %v2934_v18, %v5754_v38  ;;  %v1138_v36 = vmul.f32 0.0625, %v547_v35  ;;  %3726 = vmatprep.subr.bf16.mxu1 %v3725_v33  ;;  %3712 = vmatpush3.bf16.msra.mxu0 %v3711_v40  ;;  %v1422_v38 = vld [vmem:[%s6345_s1 + $0x3a0] sm:$0xff]  ;;  %v998_v27 = vsel %vm280_vm0, %v263_v7, 0.0  ;;  %v1401_v13 = vld [vmem:[%s6345_s1 + $0x2f8] sm:$0xff]  ;;  %v1408_v18 = vld [vmem:[%s6345_s1 + $0x330] sm:$0xff]  ;;  %vm6363_vm0 = vcmask 654912  }
 0x1fa   :  { %v5905_v45 = vsel %vm1722_vm4, %v2850_v60, %v5758_v14  ;;  %v1121_v51 = vmul.f32 0.0625, %v496_v17  ;;  %3728 = vmatpush3.bf16.msra.mxu1 %v3727_v62  ;;  %v1423_v14 = vld [vmem:[%s6345_s1 + $0x3a8] sm:$0xff]  ;;  %3714 = vmatprep.subr.bf16.mxu0 %v3713_v21  ;;  %v3717_v25 = vpack.c.bf16 %v1401_v13, %v1400_v32  ;;  %v1409_v60 = vld [vmem:[%s6345_s1 + $0x338] sm:$0xff]  ;;  %vm6364_vm1 = vmmov %vm6363_vm0 }
 0x1fb   :  { %v2159_v16 = vrot.slane %v1138_v36, %v6361_v3  ;;  %1047 = vadd.xlane.f32.xlu1 %v1046_v29  ;;  %v3729_v42 = vpack.c.bf16 %v1423_v14, %v1422_v38  ;;  %v3735_v0 = vpack.c.bf16 %v1409_v60, %v1408_v18  ;;  %v1427_v7 = vld [vmem:[%s6345_s1 + $0x3c8] sm:$0xff]  ;;  %v1429_v47 = vld [vmem:[%s6345_s1 + $0x3d8] sm:$0xff]  ;;  %vm6365_vm2 = vmmov %vm6363_vm0 }
 0x1fc   :  { %v2075_v28 = vrot.slane %v1121_v51, %v4518_v5  ;;  %996 = vadd.xlane.f32.xlu0 %v995_v9  ;;  %v637_v37 = vpop.xlane.xlu1 %636  ;;  %v1426_v9 = vld [vmem:[%s6345_s1 + $0x3c0] sm:$0xff]  ;;  %v1415_v32 = vld [vmem:[%s6345_s1 + $0x368] sm:$0xff]  ;;  %v6362_v13 = vld [vmem:[#allocation10_spill] sm:$0xff] }
 0x1fd   :  { %v586_v39 = vpop.xlane.xlu0 %585  ;;  %v5937_v61 = vsel %vm1750_vm8, %v2159_v16, %v5784_v44  ;;  %v1168_v26 = vmul.f32 0.0625, %v637_v37  ;;  %3730 = vmatprep.subr.bf16.mxu1 %v3729_v42  ;;  %3716 = vmatpush3.bf16.msra.mxu0 %v3715_v19  ;;  %v1424_v44 = vld [vmem:[%s6345_s1 + $0x3b0] sm:$0xff]  ;;  %v3737_v4 = vpack.c.bf16 %v1427_v7, %v1426_v9  ;;  %vm6366_vm3 = vmmov %vm6363_vm0 }
 0x1fe   :  { %v5941_v46 = vsel %vm1743_vm7, %v2075_v28, %v5788_v20  ;;  %v1151_v43 = vmul.f32 0.0625, %v586_v39  ;;  %3732 = vmatpush3.bf16.msra.mxu1 %v3731_v2  ;;  %v1425_v20 = vld [vmem:[%s6345_s1 + $0x3b8] sm:$0xff]  ;;  %3718 = vmatprep.subr.bf16.mxu0 %v3717_v25  ;;  %v3741_v28 = vpack.c.bf16 %v1429_v47, %v1428_v53  ;;  %v1431_v2 = vld [vmem:[%s6345_s1 + $0x3e8] sm:$0xff]  ;;  %vm6367_vm4 = vmmov %vm6363_vm0 }
 0x1ff   :  { %v2307_v24 = vrot.slane %v1168_v26, %v4429_v1  ;;  %999 = vadd.xlane.f32.xlu1 %v998_v27  ;;  %v3733_v11 = vpack.c.bf16 %v1425_v20, %v1424_v44 }
 0x200   :  { %v2223_v23 = vrot.slane %v1151_v43, %v4365_v6  ;;  %615 = vadd.xlane.f32.xlu0 %v614_v57  ;;  %v931_v33 = vpop.xlane.xlu1 %930  ;;  %v1430_v57 = vld [vmem:[%s6345_s1 + $0x3e0] sm:$0xff] }
 0x201   :  { %v880_v40 = vpop.xlane.xlu0 %879  ;;  %v5971_v63 = vsel %vm1736_vm6, %v2307_v24, %v5817_v58  ;;  %v1266_v17 = vmul.f32 0.0625, %v931_v33  ;;  %3734 = vmatprep.subr.bf16.mxu1 %v3733_v11  ;;  %3720 = vmatpush3.bf16.msra.mxu0 %v3719_v48  ;;  %v1410_v58 = vld [vmem:[%s6345_s1 + $0x340] sm:$0xff]  ;;  %v1433_v11 = vld [vmem:[%s6345_s1 + $0x3f8] sm:$0xff] }
 0x202   :  { %v5975_v35 = vsel %vm1729_vm5, %v2223_v23, %v5821_v15  ;;  %v1249_v29 = vmul.f32 0.0625, %v880_v40  ;;  %3736 = vmatpush3.bf16.msra.mxu1 %v3735_v0  ;;  %v1411_v15 = vld [vmem:[%s6345_s1 + $0x348] sm:$0xff]  ;;  %v1432_v23 = vld [vmem:[%s6345_s1 + $0x3f0] sm:$0xff]  ;;  %v1417_v33 = vld [vmem:[%s6345_s1 + $0x378] sm:$0xff] }
 0x203   :  { %v2791_v62 = vrot.slane %v1266_v17, %v6361_v3  ;;  %v3739_v51 = vpack.c.bf16 %v1411_v15, %v1410_v58  ;;  %3738 = vmatprep.subr.bf16.mxu1 %v3737_v4  ;;  %v3749_v60 = vpack.c.bf16 %v1433_v11, %v1432_v23 }
 0x204   :  { %v2707_v36 = vrot.slane %v1249_v29, %v4518_v5  ;;  %v1021_v22 = vpop.xlane.xlu1 %1020 }
 0x205   :  { %v2792_v12 = vsel %vm1750_vm8, %v2791_v62, %v5859_v56  ;;  %v1296_v21 = vmul.f32 0.0625, %v1021_v22  ;;  %v970_v14 = vpop.xlane.xlu0 %969  ;;  %v1412_v56 = vld [vmem:[%s6345_s1 + $0x350] sm:$0xff] }
 0x206   :  { %v2708_v38 = vsel %vm1743_vm7, %v2707_v36, %v5863_v41  ;;  %v1279_v16 = vmul.f32 0.0625, %v970_v14  ;;  %3740 = vmatpush3.bf16.msra.mxu1 %v3739_v51  ;;  %v1413_v41 = vld [vmem:[%s6345_s1 + $0x358] sm:$0xff]  ;;  %v3834_v14 = vmov 0.0|0.0  }
 0x207   :  { %v2939_v42 = vrot.slane %v1296_v21, %v4429_v1  ;;  %v3743_v19 = vpack.c.bf16 %v1413_v41, %v1412_v56  ;;  %3742 = vmatprep.subr.bf16.mxu1 %v3741_v28  ;;  %3753 = vmatprep.subr.bf16.mxu0 %v3834_v14 }
 0x208   :  { %v2855_v31 = vrot.slane %v1279_v16, %v4365_v6  ;;  %v550_v8 = vpop.xlane.xlu1 %549  ;;  %v3745_v6 = vpack.c.bf16 %v1431_v2, %v1430_v57 }
 0x209   :  { %v2940_v37 = vsel %vm1736_vm6, %v2939_v42, %v5901_v55  ;;  %v1139_v39 = vmul.f32 0.0625, %v550_v8  ;;  %v499_v27 = vpop.xlane.xlu0 %498  ;;  %v1414_v55 = vld [vmem:[%s6345_s1 + $0x360] sm:$0xff] }
 0x20a   :  { %v2856_v26 = vsel %vm1729_vm5, %v2855_v31, %v5905_v45  ;;  %v1122_v43 = vmul.f32 0.0625, %v499_v27  ;;  %3744 = vmatpush3.bf16.msra.mxu1 %v3743_v19  ;;  %v3747_v25 = vpack.c.bf16 %v1415_v32, %v1414_v55  ;;  %vm6368_vm5 = vmmov %vm6363_vm0 }
 0x20b   :  { %v2164_v44 = vrot.slane %v1139_v39, %v6362_v13  ;;  %3746 = vmatprep.subr.bf16.mxu1 %v3745_v6 }
 0x20c   :  { %v2080_v20 = vrot.slane %v1122_v43, %v6361_v3  ;;  %v640_v52 = vpop.xlane.xlu1 %639 }
 0x20d   :  { %v2165_v45 = vsel %vm6363_vm0, %v2164_v44, %v5937_v61  ;;  %v1169_v59 = vmul.f32 0.0625, %v640_v52  ;;  %v589_v24 = vpop.xlane.xlu0 %588  ;;  %v1416_v61 = vld [vmem:[%s6345_s1 + $0x370] sm:$0xff] }
 0x20e   :  { %v2081_v48 = vsel %vm1750_vm8, %v2080_v20, %v5941_v46  ;;  %v1152_v18 = vmul.f32 0.0625, %v589_v24  ;;  %3748 = vmatpush3.bf16.msra.mxu1 %v3747_v25  ;;  %v3751_v0 = vpack.c.bf16 %v1417_v33, %v1416_v61 }
 0x20f   :  { %v2312_v40 = vrot.slane %v1169_v59, %v4518_v5  ;;  %3750 = vmatprep.subr.bf16.mxu1 %v3749_v60 }
 0x210   :  { %v2228_v17 = vrot.slane %v1152_v18, %v4429_v1  ;;  %v934_v29 = vpop.xlane.xlu1 %933 }
 0x211   :  { %v2313_v46 = vsel %vm1743_vm7, %v2312_v40, %v5971_v63  ;;  %v1267_v9 = vmul.f32 0.0625, %v934_v29  ;;  %v883_v7 = vpop.xlane.xlu0 %882 }
 0x212   :  { %v2229_v4 = vsel %vm1736_vm6, %v2228_v17, %v5975_v35  ;;  %v1250_v58 = vmul.f32 0.0625, %v883_v7  ;;  %3752 = vmatpush3.bf16.msra.mxu1 %v3751_v0 }
 0x213   :  { %v2796_v15 = vrot.slane %v1267_v9, %v6362_v13 }
 0x214   :  { %v2712_v62 = vrot.slane %v1250_v58, %v6361_v3  ;;  %v1024_v36 = vpop.xlane.xlu1 %1023 }
 0x215   :  { %v2797_v51 = vsel %vm6364_vm1, %v2796_v15, %v2792_v12  ;;  %v1297_v22 = vmul.f32 0.0625, %v1024_v36  ;;  %v973_v21 = vpop.xlane.xlu0 %972 }
 0x216   :  { %v2713_v63 = vsel %vm1750_vm8, %v2712_v62, %v2708_v38  ;;  %v1280_v53 = vmul.f32 0.0625, %v973_v21 }
 0x217   :  { %v2944_v47 = vrot.slane %v1297_v22, %v4518_v5 }
 0x218   :  { %v2860_v35 = vrot.slane %v1280_v53, %v4429_v1  ;;  %v553_v16 = vpop.xlane.xlu1 %552 }
 0x219   :  { %v2945_v28 = vsel %vm1743_vm7, %v2944_v47, %v2940_v37  ;;  %v1140_v56 = vmul.f32 0.0625, %v553_v16  ;;  %v502_v41 = vpop.xlane.xlu0 %501 }
 0x21a   :  { %v2861_v42 = vsel %vm1736_vm6, %v2860_v35, %v2856_v26  ;;  %v1123_v12 = vmul.f32 0.0625, %v502_v41  ;;  %vm6369_vm6 = vmmov %vm6363_vm0 }
 0x21b   :  { %v2169_v19 = vrot.slane %v1140_v56, %v4911_v30 }
 0x21c   :  { %v2085_v31 = vrot.slane %v1123_v12, %v6362_v13  ;;  %v643_v8 = vpop.xlane.xlu1 %642 }
 0x21d   :  { %v2170_v38 = vsel %vm1764_vm10, %v2169_v19, %v2165_v45  ;;  %v1170_v39 = vmul.f32 0.0625, %v643_v8  ;;  %v592_v27 = vpop.xlane.xlu0 %591 }
 0x21e   :  { %v2086_v57 = vsel %vm6365_vm2, %v2085_v31, %v2081_v48  ;;  %v1153_v1 = vmul.f32 0.0625, %v592_v27 }
 0x21f   :  { %v2317_v2 = vrot.slane %v1170_v39, %v6361_v3 }
 0x220   :  { %v2233_v37 = vrot.slane %v1153_v1, %v4518_v5  ;;  %v937_v43 = vpop.xlane.xlu1 %936 }
 0x221   :  { %v2318_v26 = vsel %vm1750_vm8, %v2317_v2, %v2313_v46  ;;  %v1268_v6 = vmul.f32 0.0625, %v937_v43  ;;  %v886_v55 = vpop.xlane.xlu0 %885 }
 0x222   :  { %v2234_v32 = vsel %vm1743_vm7, %v2233_v37, %v2229_v4  ;;  %v1251_v44 = vmul.f32 0.0625, %v886_v55 }
 0x223   :  { %v2801_v25 = vrot.slane %v1268_v6, %v4911_v30 }
 0x224   :  { %v2717_v20 = vrot.slane %v1251_v44, %v6362_v13  ;;  %v1027_v52 = vpop.xlane.xlu1 %1026 }
 0x225   :  { %v6069_v45 = vsel %vm1764_vm10, %v2801_v25, %v2797_v51  ;;  %v1298_v59 = vmul.f32 0.0625, %v1027_v52  ;;  %v976_v24 = vpop.xlane.xlu0 %975 }
 0x226   :  { %v2718_v23 = vsel %vm6366_vm3, %v2717_v20, %v2713_v63  ;;  %v1281_v11 = vmul.f32 0.0625, %v976_v24 }
 0x227   :  { %v2949_v48 = vrot.slane %v1298_v59, %v6361_v3 }
 0x228   :  { %v2865_v18 = vrot.slane %v1281_v11, %v4518_v5  ;;  %v556_v60 = vpop.xlane.xlu1 %555 }
 0x229   :  { %v2950_v61 = vsel %vm1750_vm8, %v2949_v48, %v2945_v28  ;;  %v1141_v33 = vmul.f32 0.0625, %v556_v60  ;;  %v505_v40 = vpop.xlane.xlu0 %504 }
 0x22a   :  { %v2866_v0 = vsel %vm1743_vm7, %v2865_v18, %v2861_v42  ;;  %v1124_v17 = vmul.f32 0.0625, %v505_v40  ;;  %vm6370_vm7 = vmmov %vm6363_vm0 }
 0x22b   :  { %v2174_v29 = vrot.slane %v1141_v33, %v4969_v49 }
 0x22c   :  { %v2090_v46 = vrot.slane %v1124_v17, %v4911_v30  ;;  %v646_v9 = vpop.xlane.xlu1 %645 }
 0x22d   :  { %v6079_v7 = vsel %vm1771_vm11, %v2174_v29, %v2170_v38  ;;  %v1171_v4 = vmul.f32 0.0625, %v646_v9  ;;  %v595_v58 = vpop.xlane.xlu0 %594 }
 0x22e   :  { %v6082_v5 = vsel %vm1764_vm10, %v2090_v46, %v2086_v57  ;;  %v1154_v15 = vmul.f32 0.0625, %v595_v58 }
 0x22f   :  { %v2322_v62 = vrot.slane %v1171_v4, %v6362_v13 }
 0x230   :  { %v2238_v36 = vrot.slane %v1154_v15, %v6361_v3  ;;  %v940_v51 = vpop.xlane.xlu1 %939 }
 0x231   :  { %v2323_v22 = vsel %vm6367_vm4, %v2322_v62, %v2318_v26  ;;  %v889_v21 = vpop.xlane.xlu0 %888 }
 0x232   :  { %v2239_v63 = vsel %vm1750_vm8, %v2238_v36, %v2234_v32  ;;  %v1252_v53 = vmul.f32 0.0625, %v889_v21  ;;  %v1269_v21 = vmul.f32 0.0625, %v940_v51 }
 0x234   :  { %v2722_v47 = vrot.slane %v1252_v53, %v4911_v30  ;;  %v1030_v35 = vpop.xlane.xlu1 %1029 }
 0x235   :  { %v1299_v16 = vmul.f32 0.0625, %v1030_v35  ;;  %v979_v28 = vpop.xlane.xlu0 %978 }
 0x236   :  { %v6090_v56 = vsel %vm1764_vm10, %v2722_v47, %v2718_v23  ;;  %v1282_v41 = vmul.f32 0.0625, %v979_v28 }
 0x237   :  { %v2954_v42 = vrot.slane %v1299_v16, %v6362_v13 }
 0x238   :  { %v2870_v12 = vrot.slane %v1282_v41, %v6361_v3  ;;  %v559_v19 = vpop.xlane.xlu1 %558 }
 0x239   :  { %v6095_v31 = vsel %vm6368_vm5, %v2954_v42, %v2950_v61  ;;  %v6097_v8 = vpop.xlane.xlu0 %507  ;;  %v1142_v53 = vmul.f32 0.0625, %v559_v19 }
 0x23a   :  { %v2871_v38 = vsel %vm1750_vm8, %v2870_v12, %v2866_v0  ;;  %vm3835_vm8 = vmmov 0  }
 0x23c   :  { %v649_v39 = vpop.xlane.xlu1 %648 }
 0x23d   :  { %v1172_v27 = vmul.f32 0.0625, %v649_v39  ;;  %v598_v57 = vpop.xlane.xlu0 %597 }
 0x23e   :  { %v1155_v1 = vmul.f32 0.0625, %v598_v57  ;;  %v2179_v57 = vrot.slane %v1142_v53, %v5191_v34 }
 0x23f   :  { %v2327_v2 = vrot.slane %v1172_v27, %v4911_v30 }
 0x240   :  { %v2243_v37 = vrot.slane %v1155_v1, %v6362_v13  ;;  %v943_v43 = vpop.xlane.xlu1 %942 }
 0x241   :  { %v6103_v26 = vsel %vm1764_vm10, %v2327_v2, %v2323_v22  ;;  %v6105_v3 = vpop.xlane.xlu0 %891  ;;  %v1270_v47 = vmul.f32 0.0625, %v943_v43 }
 0x242   :  { %v6108_v6 = vsel %vm6369_vm6, %v2243_v37, %v2239_v63 }
 0x243   :  { %v2811_v51 = vrot.slane %v1270_v47, %v5191_v34 }
 0x244   :  { %v6110_v55 = vpop.xlane.xlu1 %1032 }
 0x245   :  { %v982_v32 = vpop.xlane.xlu0 %981 }
 0x246   :  { %v1283_v44 = vmul.f32 0.0625, %v982_v32 }
 0x248   :  { %v2875_v25 = vrot.slane %v1283_v44, %v6362_v13  ;;  %v562_v20 = vpop.xlane.xlu1 %561 }
 0x249   :  { %v511_v52 = vpop.xlane.xlu0 %510  ;;  %v1143_v16 = vmul.f32 0.0625, %v562_v20 }
 0x24a   :  { %v6114_v59 = vsel %vm6370_vm7, %v2875_v25, %v2871_v38  ;;  %v2806_v38 = vrot.slane %v1269_v21, %v4969_v49  ;;  %v1126_v53 = vmul.f32 0.0625, %v511_v52  ;;  %v3311_v52 = vld [vmem:[%s6347_s3 + $0x8] sm:$0xff] }
 0x24b   :  { %v2184_v19 = vrot.slane %v1143_v16, %v5196_v50 }
 0x24c   :  { %v6116_v24 = vpop.xlane.xlu1 %651  ;;  %v2807_v32 = vsel %vm1771_vm11, %v2806_v38, %v6069_v45 }
 0x24d   :  { %v6118_v23 = vpop.xlane.xlu0 %600 }
 0x250   :  { %v946_v11 = vpop.xlane.xlu1 %945 }
 0x251   :  { %v895_v48 = vpop.xlane.xlu0 %894  ;;  %v1271_v28 = vmul.f32 0.0625, %v946_v11  ;;  %v2180_v11 = vsel %vm1778_vm12, %v2179_v57, %v6079_v7 }
 0x252   :  { %v1254_v47 = vmul.f32 0.0625, %v895_v48 }
 0x253   :  { %v2816_v1 = vrot.slane %v1271_v28, %v5196_v50 }
 0x254   :  { %v6120_v18 = vpop.xlane.xlu1 %1035 }
 0x255   :  { %v6122_v60 = vpop.xlane.xlu0 %984 }
 0x256   :  { %v3465_v61 = vpop.f32.mrb[0].mxu0 }
 0x257   :  { %v3466_v33 = vpop.f32.mrb[1].mxu0 }
 0x258   :  { %v3467_v40 = vadd.f32 %v3466_v33, %v3465_v61  ;;  %v565_v0 = vpop.xlane.xlu1 %564  ;;  %v2812_v61 = vsel %vm1778_vm12, %v2811_v51, %v2807_v32  ;;  %v2185_v33 = vsel %vm1785_vm13, %v2184_v19, %v2180_v11  ;;  %v1173_v19 = vmul.f32 0.0625, %v6116_v24 }
 0x259   :  { %v514_v13 = vpop.xlane.xlu0 %513  ;;  %v1144_v41 = vmul.f32 0.0625, %v565_v0  ;;  %v1156_v32 = vmul.f32 0.0625, %v6118_v23  ;;  %v1301_v24 = vmul.f32 0.0625, %v6120_v18 }
 0x25a   :  { %v1127_v28 = vmul.f32 0.0625, %v514_v13  ;;  %v1300_v13 = vmul.f32 0.0625, %v6110_v55 }
 0x25b   :  { %v2189_v2 = vrot.slane %v1144_v41, %v5201_v54 }
 0x25c   :  { %v6124_v17 = vpop.xlane.xlu1 %654 }
 0x25d   :  { %v6126_v29 = vpop.xlane.xlu0 %603  ;;  %v2190_v45 = vsel %vm1792_vm14, %v2189_v2, %v2185_v33 }
 0x260   :  { %v949_v46 = vpop.xlane.xlu1 %948 }
 0x261   :  { %v898_v9 = vpop.xlane.xlu0 %897  ;;  %v1272_v42 = vmul.f32 0.0625, %v949_v46  ;;  %v1125_v46 = vmul.f32 0.0625, %v6097_v8 }
 0x262   :  { %v1255_v8 = vmul.f32 0.0625, %v898_v9  ;;  %v2100_v9 = vrot.slane %v1126_v53, %v5191_v34 }
 0x263   :  { %v2821_v37 = vrot.slane %v1272_v42, %v5201_v54  ;;  %v2095_v41 = vrot.slane %v1125_v46, %v4969_v49  ;;  %v2332_v46 = vrot.slane %v1173_v19, %v4969_v49 }
 0x264   :  { %v6128_v4 = vpop.xlane.xlu1 %1038  ;;  %v2737_v2 = vrot.slane %v1255_v8, %v5196_v50 }
 0x265   :  { %v6130_v58 = vpop.xlane.xlu0 %987 }
 0x267   :  { %v3500_v15 = vpop.f32.mrb[0].mxu1 }
 0x268   :  { %v3501_v62 = vpop.f32.mrb[1].mxu1  ;;  %v568_v22 = vpop.xlane.xlu1 %567 }
 0x269   :  { %v3502_v36 = vadd.f32 %v3501_v62, %v3500_v15  ;;  %v517_v63 = vpop.xlane.xlu0 %516  ;;  %v1145_v39 = vmul.f32 0.0625, %v568_v22 }
 0x26a   :  { %v1128_v42 = vmul.f32 0.0625, %v517_v63  ;;  %v2732_v63 = vrot.slane %v1254_v47, %v5191_v34 }
 0x26b   :  { %v6132_v35 = vadd.f32 %v3502_v36, %v3467_v40  ;;  %v2194_v44 = vrot.slane %v1145_v39, %v5211_v10  ;;  %v2817_v40 = vsel %vm1785_vm13, %v2816_v1, %v2812_v61  ;;  %v1253_v36 = vmul.f32 0.0625, %v6105_v3  ;;  %v3310_v3 = vld [vmem:[%s6347_s3] sm:$0xff] }
 0x26c   :  { %v6134_v12 = vpop.xlane.xlu1 %657  ;;  %v2822_v62 = vsel %vm1792_vm14, %v2821_v37, %v2817_v40  ;;  %v2105_v1 = vrot.slane %v1127_v28, %v5196_v50  ;;  %v3754_v37 = vpack.c.bf16 %v3311_v52, %v3310_v3  ;;  %v2959_v40 = vrot.slane %v1300_v13, %v4911_v30 }
 0x26d   :  { %v6137_v27 = vpop.xlane.xlu0 %606  ;;  %v2195_v7 = vsel %vm1799_vm15, %v2194_v44, %v2190_v45  ;;  %v2727_v48 = vrot.slane %v1253_v36, %v4969_v49  ;;  %v2110_v44 = vrot.slane %v1128_v42, %v5201_v54  ;;  %v3313_v36 = vld [vmem:[%s6347_s3 + $0x18] sm:$0xff]  ;;  %v1302_v28 = vmul.f32 0.0625, %v6128_v4 }
 0x26e   :  { %v1285_v3 = vmul.f32 0.0625, %v6130_v58  ;;  %v1175_v13 = vmul.f32 0.0625, %v6134_v12 }
 0x270   :  { %v952_v43 = vpop.xlane.xlu1 %951 }
 0x271   :  { %v1273_v25 = vmul.f32 0.0625, %v952_v43  ;;  %v901_v20 = vpop.xlane.xlu0 %900  ;;  %v2096_v43 = vsel %vm1771_vm11, %v2095_v41, %v6082_v5 }
 0x272   :  { %v1256_v38 = vmul.f32 0.0625, %v901_v20  ;;  %v2728_v20 = vsel %vm1771_vm11, %v2727_v48, %v6090_v56  ;;  %v2101_v5 = vsel %vm1778_vm12, %v2100_v9, %v2096_v43  ;;  %v2960_v48 = vsel %vm1764_vm10, %v2959_v40, %v6095_v31 }
 0x273   :  { %v2826_v0 = vrot.slane %v1273_v25, %v5211_v10  ;;  %v2733_v23 = vsel %vm1778_vm12, %v2732_v63, %v2728_v20  ;;  %v2106_v45 = vsel %vm1785_vm13, %v2105_v1, %v2101_v5  ;;  %v2333_v9 = vsel %vm1771_vm11, %v2332_v46, %v6103_v26 }
 0x274   :  { %v6155_v15 = vpop.xlane.xlu1 %1041  ;;  %v2742_v55 = vrot.slane %v1256_v38, %v5201_v54  ;;  %v2738_v56 = vsel %vm1785_vm13, %v2737_v2, %v2733_v23  ;;  %v1158_v2 = vmul.f32 0.0625, %v6137_v27 }
 0x275   :  { %v6160_v22 = vpop.xlane.xlu0 %990  ;;  %v2827_v21 = vsel %vm1799_vm15, %v2826_v0, %v2822_v62  ;;  %v1284_v0 = vmul.f32 0.0625, %v6122_v60  ;;  %v3312_v62 = vld [vmem:[%s6347_s3 + $0x10] sm:$0xff]  ;;  %v1174_v60 = vmul.f32 0.0625, %v6124_v17  ;;  %v1303_v4 = vmul.f32 0.0625, %v6155_v15 }
 0x276   :  { %v2992_v16 = vsel %vm2986_vm9, %v2827_v21, %v2195_v7  ;;  %v2248_v7 = vrot.slane %v1156_v32, %v4911_v30  ;;  %v2111_v21 = vsel %vm1792_vm14, %v2110_v44, %v2106_v45  ;;  %v2743_v53 = vsel %vm1792_vm14, %v2742_v55, %v2738_v56 }
 0x277   :  { %3207 = vmatprep.mubr.f32.mxu0 %v2992_v16  ;;  %v2964_v16 = vrot.slane %v1301_v24, %v4969_v49  ;;  %v2880_v38 = vrot.slane %v1284_v0, %v4911_v30  ;;  %v3757_v52 = vpack.c.bf16 %v3313_v36, %v3312_v62  ;;  %v2337_v30 = vrot.slane %v1174_v60, %v5191_v34 }
 0x278   :  { %v6166_v39 = vpop.xlane.xlu1 %609  ;;  %v2249_v19 = vsel %vm1764_vm10, %v2248_v7, %v6108_v6  ;;  %v2885_v15 = vrot.slane %v1285_v3, %v4969_v49  ;;  %v2342_v6 = vrot.slane %v1175_v13, %v5196_v50  ;;  %v2974_v32 = vrot.slane %v1303_v4, %v5196_v50  ;;  %v3314_v4 = vld [vmem:[%s6347_s3 + $0x20] sm:$0xff] }
 0x279   :  { %v520_v57 = vpop.xlane.xlu0 %519  ;;  %v2965_v31 = vsel %vm1771_vm11, %v2964_v16, %v2960_v48  ;;  %v2881_v26 = vsel %vm1764_vm10, %v2880_v38, %v6114_v59  ;;  %v2338_v55 = vsel %vm1778_vm12, %v2337_v30, %v2333_v9  ;;  %v2258_v40 = vrot.slane %v1158_v2, %v5191_v34  ;;  %v3315_v9 = vld [vmem:[%s6347_s3 + $0x28] sm:$0xff] }
 0x27a   :  { %v1129_v51 = vmul.f32 0.0625, %v520_v57  ;;  %v1157_v57 = vmul.f32 0.0625, %v6126_v29  ;;  %v2969_v29 = vrot.slane %v1302_v28, %v5191_v34  ;;  %v2343_v23 = vsel %vm1785_vm13, %v2342_v6, %v2338_v55 }
 0x27b   :  { %v3760_v30 = vpack.c.bf16 %v3315_v9, %v3314_v4 }
 0x27c   :  { %v904_v25 = vpop.xlane.xlu1 %903  ;;  %v2115_v11 = vrot.slane %v1129_v51, %v5211_v10  ;;  %v2253_v43 = vrot.slane %v1157_v57, %v4969_v49  ;;  %v2970_v27 = vsel %vm1778_vm12, %v2969_v29, %v2965_v31  ;;  %v3320_v29 = vld [vmem:[%s6347_s3 + $0x50] sm:$0xff] }
 0x27d   :  { %v1257_v61 = vmul.f32 0.0625, %v904_v25  ;;  %v661_v33 = vpop.xlane.xlu0 %660  ;;  %v1159_v25 = vmul.f32 0.0625, %v6166_v39  ;;  %v2975_v0 = vsel %vm1785_vm13, %v2974_v32, %v2970_v27  ;;  %v3836_v32 = vmov 0.0  }
 0x27e   :  { %v2116_v41 = vsel %vm1799_vm15, %v2115_v11, %v2111_v21  ;;  %v1176_v63 = vmul.f32 0.0625, %v661_v33  ;;  %v2886_v33 = vsel %vm1771_vm11, %v2885_v15, %v2881_v26  ;;  %v2254_v16 = vsel %vm1771_vm11, %v2253_v43, %v2249_v19  ;;  %v3319_v19 = vld [vmem:[%s6347_s3 + $0x48] sm:$0xff]  ;;  %v3322_v26 = vld [vmem:[%s6347_s3 + $0x60] sm:$0xff]  ;;  %v3325_v43 = vld [vmem:[%s6347_s3 + $0x78] sm:$0xff] }
 0x27f   :  { %v2747_v18 = vrot.slane %v1257_v61, %v5211_v10  ;;  %v2263_v56 = vrot.slane %v1159_v25, %v5196_v50  ;;  %v3323_v15 = vld [vmem:[%s6347_s3 + $0x68] sm:$0xff] }
 0x280   :  { %v1045_v47 = vpop.xlane.xlu1 %1044  ;;  %v2347_v20 = vrot.slane %v1176_v63, %v5201_v54  ;;  %v3317_v63 = vld [vmem:[%s6347_s3 + $0x38] sm:$0xff]  ;;  %v3772_v2 = vpack.c.bf16 %v3323_v15, %v3322_v26 }
 0x281   :  { %v994_v8 = vpop.xlane.xlu0 %993  ;;  %v2748_v42 = vsel %vm1799_vm15, %v2747_v18, %v2743_v53  ;;  %v1304_v58 = vmul.f32 0.0625, %v1045_v47 }
 0x282   :  { %v2991_v17 = vsel %vm2986_vm9, %v2748_v42, %v2116_v41  ;;  %v1287_v44 = vmul.f32 0.0625, %v994_v8  ;;  %v2348_v36 = vsel %vm1792_vm14, %v2347_v20, %v2343_v23  ;;  %v2259_v41 = vsel %vm1778_vm12, %v2258_v40, %v2254_v16 }
 0x283   :  { %3208 = vmatmul.mubr.f32.vlgmr.msra.gmra.mrb[2].mxu0 %v2991_v17  ;;  %v2979_v59 = vrot.slane %v1304_v58, %v5201_v54 }
 0x284   :  { %v664_v51 = vpop.xlane.xlu1 %663  ;;  %3755 = vmatpush3.bf16.msra.mxu0 %v3754_v37  ;;  %v1286_v37 = vmul.f32 0.0625, %v6160_v22  ;;  %v2895_v46 = vrot.slane %v1287_v44, %v5196_v50  ;;  %3622 = vmatprep.mubr.msk.f32.mxu0 %vm3835_vm8, %v3836_v32 }
 0x285   :  { %v1177_v12 = vmul.f32 0.0625, %v664_v51  ;;  %v613_v1 = vpop.xlane.xlu0 %612  ;;  %3756 = vmatprep.subr.bf16.mxu0 %v3834_v14  ;;  %v2980_v7 = vsel %vm1792_vm14, %v2979_v59, %v2975_v0  ;;  %v3318_v51 = vld [vmem:[%s6347_s3 + $0x40] sm:$0xff] }
 0x286   :  { %v1160_v49 = vmul.f32 0.0625, %v613_v1  ;;  %v2890_v39 = vrot.slane %v1286_v37, %v5191_v34  ;;  %v3766_v31 = vpack.c.bf16 %v3319_v19, %v3318_v51  ;;  %v3324_v37 = vld [vmem:[%s6347_s3 + $0x70] sm:$0xff]  ;;  %v6371_v59 = vld [vmem:[#allocation8_spill] sm:$0xff] }
 0x287   :  { %v2352_v22 = vrot.slane %v1177_v12, %v5211_v10  ;;  %v3321_v12 = vld [vmem:[%s6347_s3 + $0x58] sm:$0xff]  ;;  %v3775_v6 = vpack.c.bf16 %v3325_v43, %v3324_v37 }
 0x288   :  { %v1048_v24 = vpop.xlane.xlu1 %1047  ;;  %3758 = vmatpush3.bf16.msra.mxu0 %v3757_v52  ;;  %v2268_v34 = vrot.slane %v1160_v49, %v5201_v54  ;;  %v2891_v28 = vsel %vm1778_vm12, %v2890_v39, %v2886_v33  ;;  %v3769_v1 = vpack.c.bf16 %v3321_v12, %v3320_v29 }
 0x289   :  { %v1305_v11 = vmul.f32 0.0625, %v1048_v24  ;;  %v997_v61 = vpop.xlane.xlu0 %996  ;;  %3759 = vmatprep.subr.bf16.mxu0 %v3834_v14  ;;  %v2353_v53 = vsel %vm1799_vm15, %v2352_v22, %v2348_v36  ;;  %v2896_v42 = vsel %vm1785_vm13, %v2895_v46, %v2891_v28  ;;  %v3283_v24 = vld [vmem:[%s6346_s2] sm:$0x3]  ;;  %v3291_v22 = vsub.s32 1, %v6371_v59  ;;  %s3837_s2 = smov [#allocation2]  }
 0x28a   :  { %v1288_v5 = vmul.f32 0.0625, %v997_v61 }
 0x28b   :  { %v2984_v45 = vrot.slane %v1305_v11, %v5211_v10  ;;  %v3292_v40 = vrot.slane %v3283_v24, %v3291_v22 }
 0x28c   :  { %v2900_v18 = vrot.slane %v1288_v5, %v5201_v54  ;;  %v1000_v62 = vpop.xlane.xlu1 %999  ;;  %v2264_v54 = vsel %vm1785_vm13, %v2263_v56, %v2259_v41  ;;  %3761 = vmatpush3.bf16.msra.mxu0 %v3760_v30 }
 0x28d   :  { %v1289_v60 = vmul.f32 0.0625, %v1000_v62  ;;  %v616_v21 = vpop.xlane.xlu0 %615  ;;  %v2985_v47 = vsel %vm1799_vm15, %v2984_v45, %v2980_v7  ;;  %v2269_v52 = vsel %vm1792_vm14, %v2268_v34, %v2264_v54  ;;  %3762 = vmatprep.subr.bf16.mxu0 %v3834_v14 }
 0x28e   :  { %v1161_v50 = vmul.f32 0.0625, %v616_v21  ;;  %v2994_v8 = vsel %vm2986_vm9, %v2985_v47, %v2353_v53  ;;  %v2901_v3 = vsel %vm1792_vm14, %v2900_v18, %v2896_v42 }
 0x28f   :  { %v2905_v38 = vrot.slane %v1289_v60, %v5211_v10  ;;  %3277 = vmatprep.mubr.f32.mxu1 %v2994_v8 }
 0x290   :  { %v2273_v17 = vrot.slane %v1161_v50, %v5211_v10  ;;  %v3316_v10 = vld [vmem:[%s6347_s3 + $0x30] sm:$0xff]  ;;  %s3410_s3 = sshll.u32 %s3837_s2, 4  ;;  %s3411_s3 = int_to_ptr.vmem [resolvable:$true] %s3410_s3 }
 0x291   :  { %v2906_v48 = vsel %vm1799_vm15, %v2905_v38, %v2901_v3  ;;  %v3763_v58 = vpack.c.bf16 %v3317_v63, %v3316_v10  ;;  %s3786_s25 = scalar_lea.vmem %s3411_s3, 32  ;;  %p3791_p1 = scmp.lt.s32.totalorder %s3411_s3, %s3411_s3 }
 0x292   :  { %v2274_v57 = vsel %vm1799_vm15, %v2273_v17, %v2269_v52  ;;  %p3787_p0 = scmp.ne.s32.totalorder %s3411_s3, %s3786_s25  ;;  %p3792_p2 = scmp.lt.s32.totalorder %s3786_s25, %s3786_s25 }
 0x293   :  { %v2993_v13 = vsel %vm2986_vm9, %v2906_v48, %v2274_v57  ;;  %3764 = vmatpush3.bf16.msra.mxu0 %v3763_v58  ;;  %vm3295_vm9 = vcmask 1041408  }
 0x294   :  { %3278 = vmatmul.mubr.f32.vlgmr.msra.gmra.mrb[2].mxu1 %v2993_v13  ;;  %3765 = vmatprep.subr.bf16.mxu0 %v3834_v14  ;;  %p3793_p3 = por %p3792_p2, %p3791_p1 }
 0x296   :  { %p3794_p4 = pnand %p3793_p3, %p3787_p0 }
 0x297   :  { %3767 = vmatpush3.bf16.msra.mxu0 %v3766_v31 }
 0x298   :  { %3768 = vmatprep.subr.bf16.mxu0 %v3834_v14 }
 0x29b   :  { %3770 = vmatpush3.bf16.msra.mxu0 %v3769_v1 }
 0x29c   :  { %3771 = vmatprep.subr.bf16.mxu0 %v3834_v14 }
 0x29f   :  { %3773 = vmatpush3.bf16.msra.mxu0 %v3772_v2 }
 0x2a0   :  { %3774 = vmatprep.subr.bf16.mxu0 %v3834_v14  ;;  %v3286_v14 = vsub.s32 0, %v6371_v59 }
 0x2a2   :  { %v3287_v61 = vrot.slane %v3283_v24, %v3286_v14 }
 0x2a3   :  { %3776 = vmatpush3.bf16.msra.mxu0 %v3775_v6 }
 0x356   :  { %v3535_v44 = vpop.f32.mrb[2].mxu0 }
 0x357   :  { %v3536_v55 = vpop.f32.mrb[3].mxu0 }
 0x358   :  { %v3537_v25 = vadd.f32 %v3536_v55, %v3535_v44 }
 0x35a   :  { %v3210_v20 = vadd.f32 %v3537_v25, %v6132_v35 }
 0x367   :  { %v3570_v27 = vpop.f32.mrb[2].mxu1 }
 0x368   :  { %v3571_v49 = vpop.f32.mrb[3].mxu1 }
 0x369   :  { %v3572_v11 = vadd.f32 %v3571_v49, %v3570_v27 }
 0x36b   :  { %v3280_v33 = vadd.f32 %v3572_v11, %v3210_v20 }
 0x36d   :  { %v3288_v39 = vmul.f32 %v3287_v61, %v3280_v33 }
 0x36f   :  { %v3293_v5 = vadd.f32 %v3292_v40, %v3288_v39 }
 0x371   :  { %3623 = vmatmul.mubr.f32.vlgmr.msra.gmra.mrb[4].mxu0 %v3293_v5  ;;  %v3294_v23 = vmul.f32 %v3293_v5, %v3293_v5 }
 0x373   :  { %v3296_v35 = vsel %vm3295_vm9, %v3294_v23, 0.0 }
 0x374   :  { %3297 = vadd.xlane.f32.xlu0 %v3296_v35 }
 0x401   :  { %v3298_v0 = vpop.xlane.xlu0 %3297 }
 0x402   :  { %3782 = vrsqrt.f32 %v3298_v0  ;;  %vm3301_vm10 = vcmp.eq.f32.partialorder %v3298_v0, inf  ;;  %v3304_v56 = vand.u32 2147483648, %v3298_v0  ;;  %vm3303_vm11 = vcmp.eq.f32.partialorder %v3298_v0, 0.0 }
 0x40c   :  { %v3783_v46 = vpop.eup %3782 }
 0x40d   :  { %v3300_v45 = vmul.f32 %v3783_v46, %v3298_v0 }
 0x40f   :  { %v3302_v18 = vsel %vm3301_vm10, %v3298_v0, %v3300_v45 }
 0x410   :  { %v3305_v62 = vsel %vm3303_vm11, %v3304_v56, %v3302_v18 }
 0x411   :  { %v3306_v36 = vmax.f32 %v3305_v62, 1e-12 }
 0x413   :  { %3784 = vrcp.f32 %v3306_v36 }
 0x41d   :  { %v3785_v7 = vpop.eup %3784 }
 0x41e   :  { %v3308_v34 = vmul.f32 %v3785_v7, %v3293_v5 }
 0x420   :  { %3309 = vst [vmem:[#allocation2] sm:$0x3] %v3308_v34 }
 0x421   :  { %3797 = shalt.err (!%p3794_p4)
}
 0x422   :  { %s3798_s28 = scalar_lea.hbm %s6349_s5, 32 }
 0x423   :  { %p3799_p5 = scmp.ne.s32.totalorder %s6349_s5, %s3798_s28  ;;  %p3802_p6 = scmp.lt.u32.totalorder %s3798_s28, %s6349_s5 }
 0x425   :  { %p3804_p7 = pnand %p3802_p6, %p3799_p5 }
 0x427   :  { %3807 = shalt.err (!%p3804_p7)
}
 0x428   :  { %3413 = dma.vmem_to_hbm [thread:$0]  %s3411_s3, 32, %s6349_s5, [#allocation3]   ;;  %v3432_v60 = vld [vmem:[%s6348_s4] ss:$0 sm:$0xff] }
 0x429   :  { %s3838_s12 = smov [#allocation4]  }
 0x42a   :  { %s3420_s13 = sshll.u32 %s3838_s12, 4  ;;  %s3421_s13 = int_to_ptr.vmem [resolvable:$true] %s3420_s13 }
 0x42b   :  { %s3808_s14 = scalar_lea.vmem %s3421_s13, 32  ;;  %p3813_p9 = scmp.lt.s32.totalorder %s3421_s13, %s3421_s13 }
 0x42c   :  { %p3809_p8 = scmp.ne.s32.totalorder %s3421_s13, %s3808_s14  ;;  %p3814_p10 = scmp.lt.s32.totalorder %s3808_s14, %s3808_s14 }
 0x42e   :  { %p3815_p11 = por %p3814_p10, %p3813_p9 }
 0x430   :  { %p3816_p12 = pnand %p3815_p11, %p3809_p8 }
 0x444   :  { %v3399_v21 = vpop.f32.mrb[4].mxu0 }
 0x445   :  { %v3400_v53 = vadd.f32 %v3432_v60, %v3399_v21  ;;  %v3624_v47 = vpop.f32.mrb[5].mxu0 }
 0x447   :  { %3403 = vst [vmem:[#allocation4] sm:$0x3] %v3400_v53 }
 0x448   :  { %3819 = shalt.err (!%p3816_p12)
}
 0x449   :  { %s3820_s16 = scalar_lea.hbm %s6350_s6, 32 }
 0x44a   :  { %p3821_p13 = scmp.ne.s32.totalorder %s6350_s6, %s3820_s16  ;;  %p3824_p0 = scmp.lt.u32.totalorder %s3820_s16, %s6350_s6 }
 0x44c   :  { %p3826_p1 = pnand %p3824_p0, %p3821_p13 }
 0x44e   :  { %3829 = shalt.err (!%p3826_p1)
}
 0x44f   :  { %3423 = dma.vmem_to_hbm [thread:$0]  %s3421_s13, 32, %s6350_s6, [#allocation5]  }
 0x450   :  { %3830 = dma.done.wait [#allocation3], 32  }
 0x451   :  { %3831 = vsyncadd [#allocation3], 4294967264 }
 0x452   :  { %3832 = dma.done.wait [#allocation5], 32  }
 0x453   :  { %3833 = vsyncadd [#allocation5], 4294967264 }
 0x454   :  { %3430 = vsyncpa [#allocation3], 1 }
 0x455   :  { %3431 = vsyncpa [#allocation5], 1 }

</bundles_post_ra>
